<compile_context>
chip_gen: v7x
topology: tpu7x:2x2x1
jax: 0.10.0
libtpu: 0.0.40
codegen_flags: <defaults>
</compile_context>

<pallas_src>
import functools
import math

import jax
import jax.numpy as jnp
from jax.experimental import pallas as pl
from jax.experimental.pallas import tpu as pltpu

# ---------------- configuration (small, consistent with the module) ----------
DIM = 32          # model dim
DEPTH = 2         # number of transformer layers
HEADS = 4
DIM_HEAD = 8
INNER = HEADS * DIM_HEAD   # 32  (project_out=True since heads != 1)
MLP_DIM = 64
B = 2             # batch
N = 8             # sequence length
EPS = 1e-5
SCALE = DIM_HEAD ** -0.5

# float32 erf rational-approximation coefficients (Eigen/XLA); pure VPU + one EUP recip.
_ERF_ALPHA = [-2.72614225801306e-10, 2.77068142495902e-08, -2.10102402082508e-06,
              -5.69250639462346e-05, -7.34990630326855e-04, -2.95459980854025e-03,
              -1.60960333262415e-02]
_ERF_BETA = [-1.45660718464996e-05, -2.13374055278905e-04, -1.68282697438203e-03,
             -7.37332916720468e-03, -1.42647390514189e-02]


# ---------------- in-kernel helpers ------------------------------------------
def _layernorm(x, g, b):
    mu = jnp.mean(x, axis=-1, keepdims=True)
    var = jnp.mean((x - mu) ** 2, axis=-1, keepdims=True)
    return (x - mu) * jax.lax.rsqrt(var + EPS) * g + b


def _erf(x):
    x = jnp.clip(x, -4.0, 4.0)
    z = x * x
    p = jnp.full_like(z, _ERF_ALPHA[0])
    for c in _ERF_ALPHA[1:]:
        p = p * z + c
    p = p * x
    q = jnp.full_like(z, _ERF_BETA[0])
    for c in _ERF_BETA[1:]:
        q = q * z + c
    # divide -> EUP approximate reciprocal (error ~2^-12, far inside test tolerance)
    return p * pl.reciprocal(q, approx=True)


def _gelu_exact(x):
    # matches torch.nn.GELU() (erf-based, approximate='none')
    return 0.5 * x * (1.0 + _erf(x * (1.0 / math.sqrt(2.0))))


# ---------------- the Pallas kernel -------------------------------------------
def transformer_kernel(x_ref,
                       a_ln_g_ref, a_ln_b_ref, wq_ref, wk_ref, wv_ref,
                       w_out_ref, b_out_ref,
                       f_ln_g_ref, f_ln_b_ref, w1_ref, b1_ref, w2_ref, b2_ref,
                       n_g_ref, n_b_ref,
                       o_ref):
    nb = x_ref.shape[0]                      # B (collapsed grid) or 1 (batch grid)
    for b in range(nb):                      # tiny, static unroll
        x = x_ref[b].astype(jnp.float32)     # (N, DIM)

        for l in range(DEPTH):               # depth is small -> static unroll
            # ---- ViTAttention(x) + x ----
            h = _layernorm(x, a_ln_g_ref[l], a_ln_b_ref[l])          # (N, DIM)
            h_b = jnp.broadcast_to(h, (HEADS,) + h.shape)            # (H, N, DIM)
            q = jnp.einsum('hnd,hde->hne', h_b, wq_ref[l],
                           preferred_element_type=jnp.float32)       # (H, N, E)
            k = jnp.einsum('hnd,hde->hne', h_b, wk_ref[l],
                           preferred_element_type=jnp.float32)
            v = jnp.einsum('hnd,hde->hne', h_b, wv_ref[l],
                           preferred_element_type=jnp.float32)

            dots = jnp.einsum('hqd,hkd->hqk', q, k,
                              preferred_element_type=jnp.float32) * SCALE  # (H, N, N)
            dots = dots - jnp.max(dots, axis=-1, keepdims=True)
            p = jnp.exp(dots)
            p = p * pl.reciprocal(jnp.sum(p, axis=-1, keepdims=True), approx=True)

            o_h = jnp.einsum('hqk,hkd->hqd', p, v,
                             preferred_element_type=jnp.float32)     # (H, N, E)
            proj = jnp.einsum('hnd,hde->hne', o_h, w_out_ref[l],
                              preferred_element_type=jnp.float32)    # (H, N, DIM)
            x = jnp.sum(proj, axis=0) + b_out_ref[l] + x             # (N, DIM)

            # ---- ViTFeedForward(x) + x ----
            h = _layernorm(x, f_ln_g_ref[l], f_ln_b_ref[l])
            h = jnp.dot(h, w1_ref[l], preferred_element_type=jnp.float32) + b1_ref[l]
            h = _gelu_exact(h)
            h = jnp.dot(h, w2_ref[l], preferred_element_type=jnp.float32) + b2_ref[l]
            x = h + x

        # ---- final LayerNorm ----
        o_ref[b] = _layernorm(x, n_g_ref[...], n_b_ref[...]).astype(o_ref.dtype)


# ---------------- wrapper ------------------------------------------------------
def _prep_weights(params):
    """Host-side re-layout so the kernel sees per-head weight slabs (no in-kernel
    slicing / transposes). All reshapes/transposes happen outside the kernel."""
    (a_ln_g, a_ln_b, w_qkv, w_out, b_out,
     f_ln_g, f_ln_b, w1, b1, w2, b2, n_g, n_b) = params

    wq, wk, wv = jnp.split(w_qkv, 3, axis=-1)            # each (DEPTH, DIM, INNER)

    def to_heads(w):                                     # -> (DEPTH, HEADS, DIM, DIM_HEAD)
        return w.reshape(DEPTH, DIM, HEADS, DIM_HEAD).transpose(0, 2, 1, 3)

    wq_h, wk_h, wv_h = to_heads(wq), to_heads(wk), to_heads(wv)
    w_out_h = w_out.reshape(DEPTH, HEADS, DIM_HEAD, DIM)  # head-major rows of to_out

    return (a_ln_g, a_ln_b, wq_h, wk_h, wv_h, w_out_h, b_out,
            f_ln_g, f_ln_b, w1, b1, w2, b2, n_g, n_b)


def _zero_map(ndim, b):
    return (0,) * ndim


def transformer_forward(x, params, collapse_batch_grid=True):
    weights = _prep_weights(params)

    if collapse_batch_grid:
        # Single program: whole (B, N, DIM) slab + all weights resident in VMEM.
        # Best on single-TC chips (v5e / v6e) — removes all grid-step overhead.
        return pl.pallas_call(
            transformer_kernel,
            out_shape=jax.ShapeDtypeStruct(x.shape, x.dtype),
        )(x, *weights)

    # Batch-grid variant: one batch element per program, "parallel" so a multi-TC
    # chip (v7x) can split the batch across TensorCores.
    x_spec = pl.BlockSpec((1, N, DIM), lambda b: (b, 0, 0))
    w_specs = [pl.BlockSpec(w.shape, functools.partial(_zero_map, w.ndim))
               for w in weights]
    return pl.pallas_call(
        transformer_kernel,
        out_shape=jax.ShapeDtypeStruct(x.shape, x.dtype),
        grid=(x.shape[0],),
        in_specs=[x_spec] + w_specs,
        out_specs=x_spec,
        compiler_params=pltpu.CompilerParams(dimension_semantics=("parallel",)),
    )(x, *weights)


# ---------------- deterministic parameter init ---------------------------------
def init_params(key):
    ks = jax.random.split(key, 8)

    def lin_w(k, fan_in, fan_out):
        bound = 1.0 / math.sqrt(fan_in)
        return jax.random.uniform(k, (DEPTH, fan_in, fan_out), jnp.float32, -bound, bound)

    def lin_b(k, fan_in, fan_out):
        bound = 1.0 / math.sqrt(fan_in)
        return jax.random.uniform(k, (DEPTH, 1, fan_out), jnp.float32, -bound, bound)

    a_ln_g = jnp.ones((DEPTH, 1, DIM), jnp.float32)
    a_ln_b = jnp.zeros((DEPTH, 1, DIM), jnp.float32)
    w_qkv = lin_w(ks[0], DIM, 3 * INNER)                     # to_qkv (bias=False)
    w_out = lin_w(ks[1], INNER, DIM)                         # to_out linear
    b_out = lin_b(ks[2], INNER, DIM)
    f_ln_g = jnp.ones((DEPTH, 1, DIM), jnp.float32)
    f_ln_b = jnp.zeros((DEPTH, 1, DIM), jnp.float32)
    w1 = lin_w(ks[3], DIM, MLP_DIM)
    b1 = lin_b(ks[4], DIM, MLP_DIM)
    w2 = lin_w(ks[5], MLP_DIM, DIM)
    b2 = lin_b(ks[6], MLP_DIM, DIM)
    n_g = jnp.ones((1, DIM), jnp.float32)
    n_b = jnp.zeros((1, DIM), jnp.float32)
    return (a_ln_g, a_ln_b, w_qkv, w_out, b_out,
            f_ln_g, f_ln_b, w1, b1, w2, b2, n_g, n_b)


# ---------------- pure-JAX reference (for correctness check) -------------------
def reference(x, params):
    (a_ln_g, a_ln_b, w_qkv, w_out, b_out,
     f_ln_g, f_ln_b, w1, b1, w2, b2, n_g, n_b) = params

    def ln(t, g, b):
        mu = jnp.mean(t, axis=-1, keepdims=True)
        var = jnp.mean((t - mu) ** 2, axis=-1, keepdims=True)
        return (t - mu) * jax.lax.rsqrt(var + EPS) * g + b

    for l in range(DEPTH):
        h = ln(x, a_ln_g[l, 0], a_ln_b[l, 0])
        qkv = h @ w_qkv[l]
        q, k, v = jnp.split(qkv, 3, axis=-1)

        def split_heads(t):
            return t.reshape(B, N, HEADS, DIM_HEAD).transpose(0, 2, 1, 3)

        q, k, v = split_heads(q), split_heads(k), split_heads(v)
        dots = jnp.einsum('bhnd,bhmd->bhnm', q, k) * SCALE
        attn = jax.nn.softmax(dots, axis=-1)
        out = jnp.einsum('bhnm,bhmd->bhnd', attn, v)
        out = out.transpose(0, 2, 1, 3).reshape(B, N, INNER)
        out = out @ w_out[l] + b_out[l, 0]
        x = out + x

        h = ln(x, f_ln_g[l, 0], f_ln_b[l, 0])
        h = jax.nn.gelu(h @ w1[l] + b1[l, 0], approximate=False)
        h = h @ w2[l] + b2[l, 0]
        x = h + x
    return ln(x, n_g[0], n_b[0])


# ---------------- main ----------------------------------------------------------
if __name__ == "__main__":
    key = jax.random.PRNGKey(0)
    k_x, k_p = jax.random.split(key)
    x = jax.random.normal(k_x, (B, N, DIM), jnp.float32)
    params = init_params(k_p)

    ref = jax.block_until_ready(reference(x, params))

    # default path: collapsed batch grid (single program) — best on v5e / v6e
    out = jax.block_until_ready(transformer_forward(x, params))
    assert out.shape == (B, N, DIM)
    assert jnp.allclose(out, ref, atol=2e-3, rtol=1e-3), (
        f"max abs diff = {jnp.max(jnp.abs(out - ref))}")

    # batch-grid ("parallel") path — preferred on multi-TensorCore chips (v7x)
    out_grid = jax.block_until_ready(
        transformer_forward(x, params, collapse_batch_grid=False))
    assert jnp.allclose(out_grid, ref, atol=2e-3, rtol=1e-3), (
        f"max abs diff (grid path) = {jnp.max(jnp.abs(out_grid - ref))}")

    print("KERNEL_OK")
</pallas_src>

<mosaic_0001>
module attributes {stable_mosaic.version = 11 : i64} {
  func.func @transformer_kernel(%arg0: memref<2x8x32xf32, #tpu.memory_space<vmem>>, %arg1: memref<2x1x32xf32, #tpu.memory_space<vmem>>, %arg2: memref<2x1x32xf32, #tpu.memory_space<vmem>>, %arg3: memref<2x4x32x8xf32, #tpu.memory_space<vmem>>, %arg4: memref<2x4x32x8xf32, #tpu.memory_space<vmem>>, %arg5: memref<2x4x32x8xf32, #tpu.memory_space<vmem>>, %arg6: memref<2x4x8x32xf32, #tpu.memory_space<vmem>>, %arg7: memref<2x1x32xf32, #tpu.memory_space<vmem>>, %arg8: memref<2x1x32xf32, #tpu.memory_space<vmem>>, %arg9: memref<2x1x32xf32, #tpu.memory_space<vmem>>, %arg10: memref<2x32x64xf32, #tpu.memory_space<vmem>>, %arg11: memref<2x1x64xf32, #tpu.memory_space<vmem>>, %arg12: memref<2x64x32xf32, #tpu.memory_space<vmem>>, %arg13: memref<2x1x32xf32, #tpu.memory_space<vmem>>, %arg14: memref<1x32xf32, #tpu.memory_space<vmem>>, %arg15: memref<1x32xf32, #tpu.memory_space<vmem>>, %arg16: memref<2x8x32xf32, #tpu.memory_space<vmem>>) attributes {dimension_semantics = [], scalar_prefetch = 0 : i64, scratch_operands = 0 : i64, tpu.core_type = #tpu.core_type<tc>} {
    %c0 = arith.constant 0 : index
    %c0_0 = arith.constant 0 : index
    %c0_1 = arith.constant 0 : index
    %0 = vector.load %arg0[%c0, %c0_0, %c0_1] : memref<2x8x32xf32, #tpu.memory_space<vmem>>, vector<1x8x32xf32>
    %1 = vector.shape_cast %0 : vector<1x8x32xf32> to vector<8x32xf32>
    %c0_2 = arith.constant 0 : index
    %c0_3 = arith.constant 0 : index
    %c0_4 = arith.constant 0 : index
    %2 = vector.load %arg1[%c0_2, %c0_3, %c0_4] : memref<2x1x32xf32, #tpu.memory_space<vmem>>, vector<1x1x32xf32>
    %3 = vector.shape_cast %2 : vector<1x1x32xf32> to vector<1x32xf32>
    %c0_5 = arith.constant 0 : index
    %c0_6 = arith.constant 0 : index
    %c0_7 = arith.constant 0 : index
    %4 = vector.load %arg2[%c0_5, %c0_6, %c0_7] : memref<2x1x32xf32, #tpu.memory_space<vmem>>, vector<1x1x32xf32>
    %5 = vector.shape_cast %4 : vector<1x1x32xf32> to vector<1x32xf32>
    %cst = arith.constant dense<0.000000e+00> : vector<8xf32>
    %6 = vector.multi_reduction <add>, %1, %cst [1] : vector<8x32xf32> to vector<8xf32>
    %7 = vector.shape_cast %6 : vector<8xf32> to vector<8x1xf32>
    %cst_8 = arith.constant 3.200000e+01 : f32
    %8 = vector.broadcast %cst_8 : f32 to vector<8x1xf32>
    %9 = arith.divf %7, %8 : vector<8x1xf32>
    %10 = vector.broadcast %9 : vector<8x1xf32> to vector<8x32xf32>
    %11 = arith.subf %1, %10 : vector<8x32xf32>
    %12 = arith.mulf %11, %11 : vector<8x32xf32>
    %cst_9 = arith.constant dense<0.000000e+00> : vector<8xf32>
    %13 = vector.multi_reduction <add>, %12, %cst_9 [1] : vector<8x32xf32> to vector<8xf32>
    %14 = vector.shape_cast %13 : vector<8xf32> to vector<8x1xf32>
    %cst_10 = arith.constant 3.200000e+01 : f32
    %15 = vector.broadcast %cst_10 : f32 to vector<8x1xf32>
    %16 = arith.divf %14, %15 : vector<8x1xf32>
    %17 = vector.broadcast %9 : vector<8x1xf32> to vector<8x32xf32>
    %18 = arith.subf %1, %17 : vector<8x32xf32>
    %cst_11 = arith.constant 9.99999974E-6 : f32
    %19 = vector.broadcast %cst_11 : f32 to vector<8x1xf32>
    %20 = arith.addf %16, %19 : vector<8x1xf32>
    %21 = math.rsqrt %20 : vector<8x1xf32>
    %22 = vector.broadcast %21 : vector<8x1xf32> to vector<8x32xf32>
    %23 = arith.mulf %18, %22 : vector<8x32xf32>
    %24 = vector.broadcast %3 : vector<1x32xf32> to vector<8x32xf32>
    %25 = arith.mulf %23, %24 : vector<8x32xf32>
    %26 = vector.broadcast %5 : vector<1x32xf32> to vector<8x32xf32>
    %27 = arith.addf %25, %26 : vector<8x32xf32>
    %28 = vector.shape_cast %27 : vector<8x32xf32> to vector<1x8x32xf32>
    %29 = vector.broadcast %28 : vector<1x8x32xf32> to vector<4x8x32xf32>
    %c0_12 = arith.constant 0 : index
    %c0_13 = arith.constant 0 : index
    %c0_14 = arith.constant 0 : index
    %c0_15 = arith.constant 0 : index
    %30 = vector.load %arg3[%c0_12, %c0_13, %c0_14, %c0_15] : memref<2x4x32x8xf32, #tpu.memory_space<vmem>>, vector<1x4x32x8xf32>
    %31 = vector.shape_cast %30 : vector<1x4x32x8xf32> to vector<4x32x8xf32>
    "tpu.trace_start"() <{level = 10 : i32, message = "hnd,hde->hne"}> : () -> ()
    %cst_16 = arith.constant dense<0.000000e+00> : vector<4x8x8xf32>
    %32 = tpu.matmul %29, %31, %cst_16 {dimension_numbers = #tpu.dot_dimension_numbers<[2], [1], [1], [2], [0, 0, 0, 1, 1, 2], [0], [0]>} : vector<4x8x32xf32>, vector<4x32x8xf32>, vector<4x8x8xf32> -> vector<4x8x8xf32>
    "tpu.trace_stop"() : () -> ()
    %c0_17 = arith.constant 0 : index
    %c0_18 = arith.constant 0 : index
    %c0_19 = arith.constant 0 : index
    %c0_20 = arith.constant 0 : index
    %33 = vector.load %arg4[%c0_17, %c0_18, %c0_19, %c0_20] : memref<2x4x32x8xf32, #tpu.memory_space<vmem>>, vector<1x4x32x8xf32>
    %34 = vector.shape_cast %33 : vector<1x4x32x8xf32> to vector<4x32x8xf32>
    "tpu.trace_start"() <{level = 10 : i32, message = "hnd,hde->hne"}> : () -> ()
    %cst_21 = arith.constant dense<0.000000e+00> : vector<4x8x8xf32>
    %35 = tpu.matmul %29, %34, %cst_21 {dimension_numbers = #tpu.dot_dimension_numbers<[2], [1], [1], [2], [0, 0, 0, 1, 1, 2], [0], [0]>} : vector<4x8x32xf32>, vector<4x32x8xf32>, vector<4x8x8xf32> -> vector<4x8x8xf32>
    "tpu.trace_stop"() : () -> ()
    %c0_22 = arith.constant 0 : index
    %c0_23 = arith.constant 0 : index
    %c0_24 = arith.constant 0 : index
    %c0_25 = arith.constant 0 : index
    %36 = vector.load %arg5[%c0_22, %c0_23, %c0_24, %c0_25] : memref<2x4x32x8xf32, #tpu.memory_space<vmem>>, vector<1x4x32x8xf32>
    %37 = vector.shape_cast %36 : vector<1x4x32x8xf32> to vector<4x32x8xf32>
    "tpu.trace_start"() <{level = 10 : i32, message = "hnd,hde->hne"}> : () -> ()
    %cst_26 = arith.constant dense<0.000000e+00> : vector<4x8x8xf32>
    %38 = tpu.matmul %29, %37, %cst_26 {dimension_numbers = #tpu.dot_dimension_numbers<[2], [1], [1], [2], [0, 0, 0, 1, 1, 2], [0], [0]>} : vector<4x8x32xf32>, vector<4x32x8xf32>, vector<4x8x8xf32> -> vector<4x8x8xf32>
    "tpu.trace_stop"() : () -> ()
    "tpu.trace_start"() <{level = 10 : i32, message = "hqd,hkd->hqk"}> : () -> ()
    %cst_27 = arith.constant dense<0.000000e+00> : vector<4x8x8xf32>
    %39 = tpu.matmul %32, %35, %cst_27 {dimension_numbers = #tpu.dot_dimension_numbers<[2], [2], [1], [1], [0, 0, 0, 1, 1, 1], [0], [0]>} : vector<4x8x8xf32>, vector<4x8x8xf32>, vector<4x8x8xf32> -> vector<4x8x8xf32>
    "tpu.trace_stop"() : () -> ()
    %cst_28 = arith.constant 0.353553385 : f32
    %40 = vector.broadcast %cst_28 : f32 to vector<4x8x8xf32>
    %41 = arith.mulf %39, %40 : vector<4x8x8xf32>
    %cst_29 = arith.constant dense<0xFF800000> : vector<4x8xf32>
    %42 = vector.multi_reduction <maximumf>, %41, %cst_29 [2] : vector<4x8x8xf32> to vector<4x8xf32>
    %43 = vector.shape_cast %42 : vector<4x8xf32> to vector<4x8x1xf32>
    %44 = vector.broadcast %43 : vector<4x8x1xf32> to vector<4x8x8xf32>
    %45 = arith.subf %41, %44 : vector<4x8x8xf32>
    %46 = math.exp %45 : vector<4x8x8xf32>
    %cst_30 = arith.constant dense<0.000000e+00> : vector<4x8xf32>
    %47 = vector.multi_reduction <add>, %46, %cst_30 [2] : vector<4x8x8xf32> to vector<4x8xf32>
    %48 = vector.shape_cast %47 : vector<4x8xf32> to vector<4x8x1xf32>
    %49 = tpu.reciprocal %48 {approx = true} : vector<4x8x1xf32> -> vector<4x8x1xf32>
    %50 = vector.broadcast %49 : vector<4x8x1xf32> to vector<4x8x8xf32>
    %51 = arith.mulf %46, %50 : vector<4x8x8xf32>
    "tpu.trace_start"() <{level = 10 : i32, message = "hqk,hkd->hqd"}> : () -> ()
    %cst_31 = arith.constant dense<0.000000e+00> : vector<4x8x8xf32>
    %52 = tpu.matmul %51, %38, %cst_31 {dimension_numbers = #tpu.dot_dimension_numbers<[2], [1], [1], [2], [0, 0, 0, 1, 1, 2], [0], [0]>} : vector<4x8x8xf32>, vector<4x8x8xf32>, vector<4x8x8xf32> -> vector<4x8x8xf32>
    "tpu.trace_stop"() : () -> ()
    %c0_32 = arith.constant 0 : index
    %c0_33 = arith.constant 0 : index
    %c0_34 = arith.constant 0 : index
    %c0_35 = arith.constant 0 : index
    %53 = vector.load %arg6[%c0_32, %c0_33, %c0_34, %c0_35] : memref<2x4x8x32xf32, #tpu.memory_space<vmem>>, vector<1x4x8x32xf32>
    %54 = vector.shape_cast %53 : vector<1x4x8x32xf32> to vector<4x8x32xf32>
    "tpu.trace_start"() <{level = 10 : i32, message = "hnd,hde->hne"}> : () -> ()
    %cst_36 = arith.constant dense<0.000000e+00> : vector<4x8x32xf32>
    %55 = tpu.matmul %52, %54, %cst_36 {dimension_numbers = #tpu.dot_dimension_numbers<[2], [1], [1], [2], [0, 0, 0, 1, 1, 2], [0], [0]>} : vector<4x8x8xf32>, vector<4x8x32xf32>, vector<4x8x32xf32> -> vector<4x8x32xf32>
    "tpu.trace_stop"() : () -> ()
    %cst_37 = arith.constant dense<0.000000e+00> : vector<8x32xf32>
    %56 = vector.multi_reduction <add>, %55, %cst_37 [0] : vector<4x8x32xf32> to vector<8x32xf32>
    %c0_38 = arith.constant 0 : index
    %c0_39 = arith.constant 0 : index
    %c0_40 = arith.constant 0 : index
    %57 = vector.load %arg7[%c0_38, %c0_39, %c0_40] : memref<2x1x32xf32, #tpu.memory_space<vmem>>, vector<1x1x32xf32>
    %58 = vector.shape_cast %57 : vector<1x1x32xf32> to vector<1x32xf32>
    %59 = vector.broadcast %58 : vector<1x32xf32> to vector<8x32xf32>
    %60 = arith.addf %56, %59 : vector<8x32xf32>
    %61 = arith.addf %60, %1 : vector<8x32xf32>
    %c0_41 = arith.constant 0 : index
    %c0_42 = arith.constant 0 : index
    %c0_43 = arith.constant 0 : index
    %62 = vector.load %arg8[%c0_41, %c0_42, %c0_43] : memref<2x1x32xf32, #tpu.memory_space<vmem>>, vector<1x1x32xf32>
    %63 = vector.shape_cast %62 : vector<1x1x32xf32> to vector<1x32xf32>
    %c0_44 = arith.constant 0 : index
    %c0_45 = arith.constant 0 : index
    %c0_46 = arith.constant 0 : index
    %64 = vector.load %arg9[%c0_44, %c0_45, %c0_46] : memref<2x1x32xf32, #tpu.memory_space<vmem>>, vector<1x1x32xf32>
    %65 = vector.shape_cast %64 : vector<1x1x32xf32> to vector<1x32xf32>
    %cst_47 = arith.constant dense<0.000000e+00> : vector<8xf32>
    %66 = vector.multi_reduction <add>, %61, %cst_47 [1] : vector<8x32xf32> to vector<8xf32>
    %67 = vector.shape_cast %66 : vector<8xf32> to vector<8x1xf32>
    %cst_48 = arith.constant 3.200000e+01 : f32
    %68 = vector.broadcast %cst_48 : f32 to vector<8x1xf32>
    %69 = arith.divf %67, %68 : vector<8x1xf32>
    %70 = vector.broadcast %69 : vector<8x1xf32> to vector<8x32xf32>
    %71 = arith.subf %61, %70 : vector<8x32xf32>
    %72 = arith.mulf %71, %71 : vector<8x32xf32>
    %cst_49 = arith.constant dense<0.000000e+00> : vector<8xf32>
    %73 = vector.multi_reduction <add>, %72, %cst_49 [1] : vector<8x32xf32> to vector<8xf32>
    %74 = vector.shape_cast %73 : vector<8xf32> to vector<8x1xf32>
    %cst_50 = arith.constant 3.200000e+01 : f32
    %75 = vector.broadcast %cst_50 : f32 to vector<8x1xf32>
    %76 = arith.divf %74, %75 : vector<8x1xf32>
    %77 = vector.broadcast %69 : vector<8x1xf32> to vector<8x32xf32>
    %78 = arith.subf %61, %77 : vector<8x32xf32>
    %cst_51 = arith.constant 9.99999974E-6 : f32
    %79 = vector.broadcast %cst_51 : f32 to vector<8x1xf32>
    %80 = arith.addf %76, %79 : vector<8x1xf32>
    %81 = math.rsqrt %80 : vector<8x1xf32>
    %82 = vector.broadcast %81 : vector<8x1xf32> to vector<8x32xf32>
    %83 = arith.mulf %78, %82 : vector<8x32xf32>
    %84 = vector.broadcast %63 : vector<1x32xf32> to vector<8x32xf32>
    %85 = arith.mulf %83, %84 : vector<8x32xf32>
    %86 = vector.broadcast %65 : vector<1x32xf32> to vector<8x32xf32>
    %87 = arith.addf %85, %86 : vector<8x32xf32>
    %c0_52 = arith.constant 0 : index
    %c0_53 = arith.constant 0 : index
    %c0_54 = arith.constant 0 : index
    %88 = vector.load %arg10[%c0_52, %c0_53, %c0_54] : memref<2x32x64xf32, #tpu.memory_space<vmem>>, vector<1x32x64xf32>
    %89 = vector.shape_cast %88 : vector<1x32x64xf32> to vector<32x64xf32>
    %cst_55 = arith.constant dense<0.000000e+00> : vector<8x64xf32>
    %90 = tpu.matmul %87, %89, %cst_55 {dimension_numbers = #tpu.dot_dimension_numbers<[1], [0], [0], [1], [0, 0, 1, 1], [], []>} : vector<8x32xf32>, vector<32x64xf32>, vector<8x64xf32> -> vector<8x64xf32>
    %c0_56 = arith.constant 0 : index
    %c0_57 = arith.constant 0 : index
    %c0_58 = arith.constant 0 : index
    %91 = vector.load %arg11[%c0_56, %c0_57, %c0_58] : memref<2x1x64xf32, #tpu.memory_space<vmem>>, vector<1x1x64xf32>
    %92 = vector.shape_cast %91 : vector<1x1x64xf32> to vector<1x64xf32>
    %93 = vector.broadcast %92 : vector<1x64xf32> to vector<8x64xf32>
    %94 = arith.addf %90, %93 : vector<8x64xf32>
    %cst_59 = arith.constant 5.000000e-01 : f32
    %95 = vector.broadcast %cst_59 : f32 to vector<8x64xf32>
    %96 = arith.mulf %95, %94 : vector<8x64xf32>
    %cst_60 = arith.constant 0.707106769 : f32
    %97 = vector.broadcast %cst_60 : f32 to vector<8x64xf32>
    %98 = arith.mulf %94, %97 : vector<8x64xf32>
    %cst_61 = arith.constant -4.000000e+00 : f32
    %cst_62 = arith.constant 4.000000e+00 : f32
    %99 = vector.broadcast %cst_61 : f32 to vector<8x64xf32>
    %100 = arith.maximumf %99, %98 : vector<8x64xf32>
    %101 = vector.broadcast %cst_62 : f32 to vector<8x64xf32>
    %102 = arith.minimumf %101, %100 : vector<8x64xf32>
    %103 = arith.mulf %102, %102 : vector<8x64xf32>
    %cst_63 = arith.constant -2.72614237E-10 : f32
    %104 = vector.broadcast %cst_63 : f32 to vector<8x64xf32>
    %105 = arith.mulf %104, %103 : vector<8x64xf32>
    %cst_64 = arith.constant 2.77068146E-8 : f32
    %106 = vector.broadcast %cst_64 : f32 to vector<8x64xf32>
    %107 = arith.addf %105, %106 : vector<8x64xf32>
    %108 = arith.mulf %107, %103 : vector<8x64xf32>
    %cst_65 = arith.constant -2.10102394E-6 : f32
    %109 = vector.broadcast %cst_65 : f32 to vector<8x64xf32>
    %110 = arith.addf %108, %109 : vector<8x64xf32>
    %111 = arith.mulf %110, %103 : vector<8x64xf32>
    %cst_66 = arith.constant -5.69250624E-5 : f32
    %112 = vector.broadcast %cst_66 : f32 to vector<8x64xf32>
    %113 = arith.addf %111, %112 : vector<8x64xf32>
    %114 = arith.mulf %113, %103 : vector<8x64xf32>
    %cst_67 = arith.constant -7.34990637E-4 : f32
    %115 = vector.broadcast %cst_67 : f32 to vector<8x64xf32>
    %116 = arith.addf %114, %115 : vector<8x64xf32>
    %117 = arith.mulf %116, %103 : vector<8x64xf32>
    %cst_68 = arith.constant -2.954600e-03 : f32
    %118 = vector.broadcast %cst_68 : f32 to vector<8x64xf32>
    %119 = arith.addf %117, %118 : vector<8x64xf32>
    %120 = arith.mulf %119, %103 : vector<8x64xf32>
    %cst_69 = arith.constant -0.0160960332 : f32
    %121 = vector.broadcast %cst_69 : f32 to vector<8x64xf32>
    %122 = arith.addf %120, %121 : vector<8x64xf32>
    %123 = arith.mulf %122, %102 : vector<8x64xf32>
    %cst_70 = arith.constant -1.45660715E-5 : f32
    %124 = vector.broadcast %cst_70 : f32 to vector<8x64xf32>
    %125 = arith.mulf %124, %103 : vector<8x64xf32>
    %cst_71 = arith.constant -2.13374049E-4 : f32
    %126 = vector.broadcast %cst_71 : f32 to vector<8x64xf32>
    %127 = arith.addf %125, %126 : vector<8x64xf32>
    %128 = arith.mulf %127, %103 : vector<8x64xf32>
    %cst_72 = arith.constant -0.00168282702 : f32
    %129 = vector.broadcast %cst_72 : f32 to vector<8x64xf32>
    %130 = arith.addf %128, %129 : vector<8x64xf32>
    %131 = arith.mulf %130, %103 : vector<8x64xf32>
    %cst_73 = arith.constant -0.00737332925 : f32
    %132 = vector.broadcast %cst_73 : f32 to vector<8x64xf32>
    %133 = arith.addf %131, %132 : vector<8x64xf32>
    %134 = arith.mulf %133, %103 : vector<8x64xf32>
    %cst_74 = arith.constant -0.0142647391 : f32
    %135 = vector.broadcast %cst_74 : f32 to vector<8x64xf32>
    %136 = arith.addf %134, %135 : vector<8x64xf32>
    %137 = tpu.reciprocal %136 {approx = true} : vector<8x64xf32> -> vector<8x64xf32>
    %138 = arith.mulf %123, %137 : vector<8x64xf32>
    %cst_75 = arith.constant 1.000000e+00 : f32
    %139 = vector.broadcast %cst_75 : f32 to vector<8x64xf32>
    %140 = arith.addf %139, %138 : vector<8x64xf32>
    %141 = arith.mulf %96, %140 : vector<8x64xf32>
    %c0_76 = arith.constant 0 : index
    %c0_77 = arith.constant 0 : index
    %c0_78 = arith.constant 0 : index
    %142 = vector.load %arg12[%c0_76, %c0_77, %c0_78] : memref<2x64x32xf32, #tpu.memory_space<vmem>>, vector<1x64x32xf32>
    %143 = vector.shape_cast %142 : vector<1x64x32xf32> to vector<64x32xf32>
    %cst_79 = arith.constant dense<0.000000e+00> : vector<8x32xf32>
    %144 = tpu.matmul %141, %143, %cst_79 {dimension_numbers = #tpu.dot_dimension_numbers<[1], [0], [0], [1], [0, 0, 1, 1], [], []>} : vector<8x64xf32>, vector<64x32xf32>, vector<8x32xf32> -> vector<8x32xf32>
    %c0_80 = arith.constant 0 : index
    %c0_81 = arith.constant 0 : index
    %c0_82 = arith.constant 0 : index
    %145 = vector.load %arg13[%c0_80, %c0_81, %c0_82] : memref<2x1x32xf32, #tpu.memory_space<vmem>>, vector<1x1x32xf32>
    %146 = vector.shape_cast %145 : vector<1x1x32xf32> to vector<1x32xf32>
    %147 = vector.broadcast %146 : vector<1x32xf32> to vector<8x32xf32>
    %148 = arith.addf %144, %147 : vector<8x32xf32>
    %149 = arith.addf %148, %61 : vector<8x32xf32>
    %c1 = arith.constant 1 : index
    %c0_83 = arith.constant 0 : index
    %c0_84 = arith.constant 0 : index
    %150 = vector.load %arg1[%c1, %c0_83, %c0_84] : memref<2x1x32xf32, #tpu.memory_space<vmem>>, vector<1x1x32xf32>
    %151 = vector.shape_cast %150 : vector<1x1x32xf32> to vector<1x32xf32>
    %c1_85 = arith.constant 1 : index
    %c0_86 = arith.constant 0 : index
    %c0_87 = arith.constant 0 : index
    %152 = vector.load %arg2[%c1_85, %c0_86, %c0_87] : memref<2x1x32xf32, #tpu.memory_space<vmem>>, vector<1x1x32xf32>
    %153 = vector.shape_cast %152 : vector<1x1x32xf32> to vector<1x32xf32>
    %cst_88 = arith.constant dense<0.000000e+00> : vector<8xf32>
    %154 = vector.multi_reduction <add>, %149, %cst_88 [1] : vector<8x32xf32> to vector<8xf32>
    %155 = vector.shape_cast %154 : vector<8xf32> to vector<8x1xf32>
    %cst_89 = arith.constant 3.200000e+01 : f32
    %156 = vector.broadcast %cst_89 : f32 to vector<8x1xf32>
    %157 = arith.divf %155, %156 : vector<8x1xf32>
    %158 = vector.broadcast %157 : vector<8x1xf32> to vector<8x32xf32>
    %159 = arith.subf %149, %158 : vector<8x32xf32>
    %160 = arith.mulf %159, %159 : vector<8x32xf32>
    %cst_90 = arith.constant dense<0.000000e+00> : vector<8xf32>
    %161 = vector.multi_reduction <add>, %160, %cst_90 [1] : vector<8x32xf32> to vector<8xf32>
    %162 = vector.shape_cast %161 : vector<8xf32> to vector<8x1xf32>
    %cst_91 = arith.constant 3.200000e+01 : f32
    %163 = vector.broadcast %cst_91 : f32 to vector<8x1xf32>
    %164 = arith.divf %162, %163 : vector<8x1xf32>
    %165 = vector.broadcast %157 : vector<8x1xf32> to vector<8x32xf32>
    %166 = arith.subf %149, %165 : vector<8x32xf32>
    %cst_92 = arith.constant 9.99999974E-6 : f32
    %167 = vector.broadcast %cst_92 : f32 to vector<8x1xf32>
    %168 = arith.addf %164, %167 : vector<8x1xf32>
    %169 = math.rsqrt %168 : vector<8x1xf32>
    %170 = vector.broadcast %169 : vector<8x1xf32> to vector<8x32xf32>
    %171 = arith.mulf %166, %170 : vector<8x32xf32>
    %172 = vector.broadcast %151 : vector<1x32xf32> to vector<8x32xf32>
    %173 = arith.mulf %171, %172 : vector<8x32xf32>
    %174 = vector.broadcast %153 : vector<1x32xf32> to vector<8x32xf32>
    %175 = arith.addf %173, %174 : vector<8x32xf32>
    %176 = vector.shape_cast %175 : vector<8x32xf32> to vector<1x8x32xf32>
    %177 = vector.broadcast %176 : vector<1x8x32xf32> to vector<4x8x32xf32>
    %c1_93 = arith.constant 1 : index
    %c0_94 = arith.constant 0 : index
    %c0_95 = arith.constant 0 : index
    %c0_96 = arith.constant 0 : index
    %178 = vector.load %arg3[%c1_93, %c0_94, %c0_95, %c0_96] : memref<2x4x32x8xf32, #tpu.memory_space<vmem>>, vector<1x4x32x8xf32>
    %179 = vector.shape_cast %178 : vector<1x4x32x8xf32> to vector<4x32x8xf32>
    "tpu.trace_start"() <{level = 10 : i32, message = "hnd,hde->hne"}> : () -> ()
    %cst_97 = arith.constant dense<0.000000e+00> : vector<4x8x8xf32>
    %180 = tpu.matmul %177, %179, %cst_97 {dimension_numbers = #tpu.dot_dimension_numbers<[2], [1], [1], [2], [0, 0, 0, 1, 1, 2], [0], [0]>} : vector<4x8x32xf32>, vector<4x32x8xf32>, vector<4x8x8xf32> -> vector<4x8x8xf32>
    "tpu.trace_stop"() : () -> ()
    %c1_98 = arith.constant 1 : index
    %c0_99 = arith.constant 0 : index
    %c0_100 = arith.constant 0 : index
    %c0_101 = arith.constant 0 : index
    %181 = vector.load %arg4[%c1_98, %c0_99, %c0_100, %c0_101] : memref<2x4x32x8xf32, #tpu.memory_space<vmem>>, vector<1x4x32x8xf32>
    %182 = vector.shape_cast %181 : vector<1x4x32x8xf32> to vector<4x32x8xf32>
    "tpu.trace_start"() <{level = 10 : i32, message = "hnd,hde->hne"}> : () -> ()
    %cst_102 = arith.constant dense<0.000000e+00> : vector<4x8x8xf32>
    %183 = tpu.matmul %177, %182, %cst_102 {dimension_numbers = #tpu.dot_dimension_numbers<[2], [1], [1], [2], [0, 0, 0, 1, 1, 2], [0], [0]>} : vector<4x8x32xf32>, vector<4x32x8xf32>, vector<4x8x8xf32> -> vector<4x8x8xf32>
    "tpu.trace_stop"() : () -> ()
    %c1_103 = arith.constant 1 : index
    %c0_104 = arith.constant 0 : index
    %c0_105 = arith.constant 0 : index
    %c0_106 = arith.constant 0 : index
    %184 = vector.load %arg5[%c1_103, %c0_104, %c0_105, %c0_106] : memref<2x4x32x8xf32, #tpu.memory_space<vmem>>, vector<1x4x32x8xf32>
    %185 = vector.shape_cast %184 : vector<1x4x32x8xf32> to vector<4x32x8xf32>
    "tpu.trace_start"() <{level = 10 : i32, message = "hnd,hde->hne"}> : () -> ()
    %cst_107 = arith.constant dense<0.000000e+00> : vector<4x8x8xf32>
    %186 = tpu.matmul %177, %185, %cst_107 {dimension_numbers = #tpu.dot_dimension_numbers<[2], [1], [1], [2], [0, 0, 0, 1, 1, 2], [0], [0]>} : vector<4x8x32xf32>, vector<4x32x8xf32>, vector<4x8x8xf32> -> vector<4x8x8xf32>
    "tpu.trace_stop"() : () -> ()
    "tpu.trace_start"() <{level = 10 : i32, message = "hqd,hkd->hqk"}> : () -> ()
    %cst_108 = arith.constant dense<0.000000e+00> : vector<4x8x8xf32>
    %187 = tpu.matmul %180, %183, %cst_108 {dimension_numbers = #tpu.dot_dimension_numbers<[2], [2], [1], [1], [0, 0, 0, 1, 1, 1], [0], [0]>} : vector<4x8x8xf32>, vector<4x8x8xf32>, vector<4x8x8xf32> -> vector<4x8x8xf32>
    "tpu.trace_stop"() : () -> ()
    %cst_109 = arith.constant 0.353553385 : f32
    %188 = vector.broadcast %cst_109 : f32 to vector<4x8x8xf32>
    %189 = arith.mulf %187, %188 : vector<4x8x8xf32>
    %cst_110 = arith.constant dense<0xFF800000> : vector<4x8xf32>
    %190 = vector.multi_reduction <maximumf>, %189, %cst_110 [2] : vector<4x8x8xf32> to vector<4x8xf32>
    %191 = vector.shape_cast %190 : vector<4x8xf32> to vector<4x8x1xf32>
    %192 = vector.broadcast %191 : vector<4x8x1xf32> to vector<4x8x8xf32>
    %193 = arith.subf %189, %192 : vector<4x8x8xf32>
    %194 = math.exp %193 : vector<4x8x8xf32>
    %cst_111 = arith.constant dense<0.000000e+00> : vector<4x8xf32>
    %195 = vector.multi_reduction <add>, %194, %cst_111 [2] : vector<4x8x8xf32> to vector<4x8xf32>
    %196 = vector.shape_cast %195 : vector<4x8xf32> to vector<4x8x1xf32>
    %197 = tpu.reciprocal %196 {approx = true} : vector<4x8x1xf32> -> vector<4x8x1xf32>
    %198 = vector.broadcast %197 : vector<4x8x1xf32> to vector<4x8x8xf32>
    %199 = arith.mulf %194, %198 : vector<4x8x8xf32>
    "tpu.trace_start"() <{level = 10 : i32, message = "hqk,hkd->hqd"}> : () -> ()
    %cst_112 = arith.constant dense<0.000000e+00> : vector<4x8x8xf32>
    %200 = tpu.matmul %199, %186, %cst_112 {dimension_numbers = #tpu.dot_dimension_numbers<[2], [1], [1], [2], [0, 0, 0, 1, 1, 2], [0], [0]>} : vector<4x8x8xf32>, vector<4x8x8xf32>, vector<4x8x8xf32> -> vector<4x8x8xf32>
    "tpu.trace_stop"() : () -> ()
    %c1_113 = arith.constant 1 : index
    %c0_114 = arith.constant 0 : index
    %c0_115 = arith.constant 0 : index
    %c0_116 = arith.constant 0 : index
    %201 = vector.load %arg6[%c1_113, %c0_114, %c0_115, %c0_116] : memref<2x4x8x32xf32, #tpu.memory_space<vmem>>, vector<1x4x8x32xf32>
    %202 = vector.shape_cast %201 : vector<1x4x8x32xf32> to vector<4x8x32xf32>
    "tpu.trace_start"() <{level = 10 : i32, message = "hnd,hde->hne"}> : () -> ()
    %cst_117 = arith.constant dense<0.000000e+00> : vector<4x8x32xf32>
    %203 = tpu.matmul %200, %202, %cst_117 {dimension_numbers = #tpu.dot_dimension_numbers<[2], [1], [1], [2], [0, 0, 0, 1, 1, 2], [0], [0]>} : vector<4x8x8xf32>, vector<4x8x32xf32>, vector<4x8x32xf32> -> vector<4x8x32xf32>
    "tpu.trace_stop"() : () -> ()
    %cst_118 = arith.constant dense<0.000000e+00> : vector<8x32xf32>
    %204 = vector.multi_reduction <add>, %203, %cst_118 [0] : vector<4x8x32xf32> to vector<8x32xf32>
    %c1_119 = arith.constant 1 : index
    %c0_120 = arith.constant 0 : index
    %c0_121 = arith.constant 0 : index
    %205 = vector.load %arg7[%c1_119, %c0_120, %c0_121] : memref<2x1x32xf32, #tpu.memory_space<vmem>>, vector<1x1x32xf32>
    %206 = vector.shape_cast %205 : vector<1x1x32xf32> to vector<1x32xf32>
    %207 = vector.broadcast %206 : vector<1x32xf32> to vector<8x32xf32>
    %208 = arith.addf %204, %207 : vector<8x32xf32>
    %209 = arith.addf %208, %149 : vector<8x32xf32>
    %c1_122 = arith.constant 1 : index
    %c0_123 = arith.constant 0 : index
    %c0_124 = arith.constant 0 : index
    %210 = vector.load %arg8[%c1_122, %c0_123, %c0_124] : memref<2x1x32xf32, #tpu.memory_space<vmem>>, vector<1x1x32xf32>
    %211 = vector.shape_cast %210 : vector<1x1x32xf32> to vector<1x32xf32>
    %c1_125 = arith.constant 1 : index
    %c0_126 = arith.constant 0 : index
    %c0_127 = arith.constant 0 : index
    %212 = vector.load %arg9[%c1_125, %c0_126, %c0_127] : memref<2x1x32xf32, #tpu.memory_space<vmem>>, vector<1x1x32xf32>
    %213 = vector.shape_cast %212 : vector<1x1x32xf32> to vector<1x32xf32>
    %cst_128 = arith.constant dense<0.000000e+00> : vector<8xf32>
    %214 = vector.multi_reduction <add>, %209, %cst_128 [1] : vector<8x32xf32> to vector<8xf32>
    %215 = vector.shape_cast %214 : vector<8xf32> to vector<8x1xf32>
    %cst_129 = arith.constant 3.200000e+01 : f32
    %216 = vector.broadcast %cst_129 : f32 to vector<8x1xf32>
    %217 = arith.divf %215, %216 : vector<8x1xf32>
    %218 = vector.broadcast %217 : vector<8x1xf32> to vector<8x32xf32>
    %219 = arith.subf %209, %218 : vector<8x32xf32>
    %220 = arith.mulf %219, %219 : vector<8x32xf32>
    %cst_130 = arith.constant dense<0.000000e+00> : vector<8xf32>
    %221 = vector.multi_reduction <add>, %220, %cst_130 [1] : vector<8x32xf32> to vector<8xf32>
    %222 = vector.shape_cast %221 : vector<8xf32> to vector<8x1xf32>
    %cst_131 = arith.constant 3.200000e+01 : f32
    %223 = vector.broadcast %cst_131 : f32 to vector<8x1xf32>
    %224 = arith.divf %222, %223 : vector<8x1xf32>
    %225 = vector.broadcast %217 : vector<8x1xf32> to vector<8x32xf32>
    %226 = arith.subf %209, %225 : vector<8x32xf32>
    %cst_132 = arith.constant 9.99999974E-6 : f32
    %227 = vector.broadcast %cst_132 : f32 to vector<8x1xf32>
    %228 = arith.addf %224, %227 : vector<8x1xf32>
    %229 = math.rsqrt %228 : vector<8x1xf32>
    %230 = vector.broadcast %229 : vector<8x1xf32> to vector<8x32xf32>
    %231 = arith.mulf %226, %230 : vector<8x32xf32>
    %232 = vector.broadcast %211 : vector<1x32xf32> to vector<8x32xf32>
    %233 = arith.mulf %231, %232 : vector<8x32xf32>
    %234 = vector.broadcast %213 : vector<1x32xf32> to vector<8x32xf32>
    %235 = arith.addf %233, %234 : vector<8x32xf32>
    %c1_133 = arith.constant 1 : index
    %c0_134 = arith.constant 0 : index
    %c0_135 = arith.constant 0 : index
    %236 = vector.load %arg10[%c1_133, %c0_134, %c0_135] : memref<2x32x64xf32, #tpu.memory_space<vmem>>, vector<1x32x64xf32>
    %237 = vector.shape_cast %236 : vector<1x32x64xf32> to vector<32x64xf32>
    %cst_136 = arith.constant dense<0.000000e+00> : vector<8x64xf32>
    %238 = tpu.matmul %235, %237, %cst_136 {dimension_numbers = #tpu.dot_dimension_numbers<[1], [0], [0], [1], [0, 0, 1, 1], [], []>} : vector<8x32xf32>, vector<32x64xf32>, vector<8x64xf32> -> vector<8x64xf32>
    %c1_137 = arith.constant 1 : index
    %c0_138 = arith.constant 0 : index
    %c0_139 = arith.constant 0 : index
    %239 = vector.load %arg11[%c1_137, %c0_138, %c0_139] : memref<2x1x64xf32, #tpu.memory_space<vmem>>, vector<1x1x64xf32>
    %240 = vector.shape_cast %239 : vector<1x1x64xf32> to vector<1x64xf32>
    %241 = vector.broadcast %240 : vector<1x64xf32> to vector<8x64xf32>
    %242 = arith.addf %238, %241 : vector<8x64xf32>
    %cst_140 = arith.constant 5.000000e-01 : f32
    %243 = vector.broadcast %cst_140 : f32 to vector<8x64xf32>
    %244 = arith.mulf %243, %242 : vector<8x64xf32>
    %cst_141 = arith.constant 0.707106769 : f32
    %245 = vector.broadcast %cst_141 : f32 to vector<8x64xf32>
    %246 = arith.mulf %242, %245 : vector<8x64xf32>
    %cst_142 = arith.constant -4.000000e+00 : f32
    %cst_143 = arith.constant 4.000000e+00 : f32
    %247 = vector.broadcast %cst_142 : f32 to vector<8x64xf32>
    %248 = arith.maximumf %247, %246 : vector<8x64xf32>
    %249 = vector.broadcast %cst_143 : f32 to vector<8x64xf32>
    %250 = arith.minimumf %249, %248 : vector<8x64xf32>
    %251 = arith.mulf %250, %250 : vector<8x64xf32>
    %cst_144 = arith.constant -2.72614237E-10 : f32
    %252 = vector.broadcast %cst_144 : f32 to vector<8x64xf32>
    %253 = arith.mulf %252, %251 : vector<8x64xf32>
    %cst_145 = arith.constant 2.77068146E-8 : f32
    %254 = vector.broadcast %cst_145 : f32 to vector<8x64xf32>
    %255 = arith.addf %253, %254 : vector<8x64xf32>
    %256 = arith.mulf %255, %251 : vector<8x64xf32>
    %cst_146 = arith.constant -2.10102394E-6 : f32
    %257 = vector.broadcast %cst_146 : f32 to vector<8x64xf32>
    %258 = arith.addf %256, %257 : vector<8x64xf32>
    %259 = arith.mulf %258, %251 : vector<8x64xf32>
    %cst_147 = arith.constant -5.69250624E-5 : f32
    %260 = vector.broadcast %cst_147 : f32 to vector<8x64xf32>
    %261 = arith.addf %259, %260 : vector<8x64xf32>
    %262 = arith.mulf %261, %251 : vector<8x64xf32>
    %cst_148 = arith.constant -7.34990637E-4 : f32
    %263 = vector.broadcast %cst_148 : f32 to vector<8x64xf32>
    %264 = arith.addf %262, %263 : vector<8x64xf32>
    %265 = arith.mulf %264, %251 : vector<8x64xf32>
    %cst_149 = arith.constant -2.954600e-03 : f32
    %266 = vector.broadcast %cst_149 : f32 to vector<8x64xf32>
    %267 = arith.addf %265, %266 : vector<8x64xf32>
    %268 = arith.mulf %267, %251 : vector<8x64xf32>
    %cst_150 = arith.constant -0.0160960332 : f32
    %269 = vector.broadcast %cst_150 : f32 to vector<8x64xf32>
    %270 = arith.addf %268, %269 : vector<8x64xf32>
    %271 = arith.mulf %270, %250 : vector<8x64xf32>
    %cst_151 = arith.constant -1.45660715E-5 : f32
    %272 = vector.broadcast %cst_151 : f32 to vector<8x64xf32>
    %273 = arith.mulf %272, %251 : vector<8x64xf32>
    %cst_152 = arith.constant -2.13374049E-4 : f32
    %274 = vector.broadcast %cst_152 : f32 to vector<8x64xf32>
    %275 = arith.addf %273, %274 : vector<8x64xf32>
    %276 = arith.mulf %275, %251 : vector<8x64xf32>
    %cst_153 = arith.constant -0.00168282702 : f32
    %277 = vector.broadcast %cst_153 : f32 to vector<8x64xf32>
    %278 = arith.addf %276, %277 : vector<8x64xf32>
    %279 = arith.mulf %278, %251 : vector<8x64xf32>
    %cst_154 = arith.constant -0.00737332925 : f32
    %280 = vector.broadcast %cst_154 : f32 to vector<8x64xf32>
    %281 = arith.addf %279, %280 : vector<8x64xf32>
    %282 = arith.mulf %281, %251 : vector<8x64xf32>
    %cst_155 = arith.constant -0.0142647391 : f32
    %283 = vector.broadcast %cst_155 : f32 to vector<8x64xf32>
    %284 = arith.addf %282, %283 : vector<8x64xf32>
    %285 = tpu.reciprocal %284 {approx = true} : vector<8x64xf32> -> vector<8x64xf32>
    %286 = arith.mulf %271, %285 : vector<8x64xf32>
    %cst_156 = arith.constant 1.000000e+00 : f32
    %287 = vector.broadcast %cst_156 : f32 to vector<8x64xf32>
    %288 = arith.addf %287, %286 : vector<8x64xf32>
    %289 = arith.mulf %244, %288 : vector<8x64xf32>
    %c1_157 = arith.constant 1 : index
    %c0_158 = arith.constant 0 : index
    %c0_159 = arith.constant 0 : index
    %290 = vector.load %arg12[%c1_157, %c0_158, %c0_159] : memref<2x64x32xf32, #tpu.memory_space<vmem>>, vector<1x64x32xf32>
    %291 = vector.shape_cast %290 : vector<1x64x32xf32> to vector<64x32xf32>
    %cst_160 = arith.constant dense<0.000000e+00> : vector<8x32xf32>
    %292 = tpu.matmul %289, %291, %cst_160 {dimension_numbers = #tpu.dot_dimension_numbers<[1], [0], [0], [1], [0, 0, 1, 1], [], []>} : vector<8x64xf32>, vector<64x32xf32>, vector<8x32xf32> -> vector<8x32xf32>
    %c1_161 = arith.constant 1 : index
    %c0_162 = arith.constant 0 : index
    %c0_163 = arith.constant 0 : index
    %293 = vector.load %arg13[%c1_161, %c0_162, %c0_163] : memref<2x1x32xf32, #tpu.memory_space<vmem>>, vector<1x1x32xf32>
    %294 = vector.shape_cast %293 : vector<1x1x32xf32> to vector<1x32xf32>
    %295 = vector.broadcast %294 : vector<1x32xf32> to vector<8x32xf32>
    %296 = arith.addf %292, %295 : vector<8x32xf32>
    %297 = arith.addf %296, %209 : vector<8x32xf32>
    %c0_164 = arith.constant 0 : index
    %c0_165 = arith.constant 0 : index
    %298 = vector.load %arg14[%c0_164, %c0_165] : memref<1x32xf32, #tpu.memory_space<vmem>>, vector<1x32xf32>
    %c0_166 = arith.constant 0 : index
    %c0_167 = arith.constant 0 : index
    %299 = vector.load %arg15[%c0_166, %c0_167] : memref<1x32xf32, #tpu.memory_space<vmem>>, vector<1x32xf32>
    %cst_168 = arith.constant dense<0.000000e+00> : vector<8xf32>
    %300 = vector.multi_reduction <add>, %297, %cst_168 [1] : vector<8x32xf32> to vector<8xf32>
    %301 = vector.shape_cast %300 : vector<8xf32> to vector<8x1xf32>
    %cst_169 = arith.constant 3.200000e+01 : f32
    %302 = vector.broadcast %cst_169 : f32 to vector<8x1xf32>
    %303 = arith.divf %301, %302 : vector<8x1xf32>
    %304 = vector.broadcast %303 : vector<8x1xf32> to vector<8x32xf32>
    %305 = arith.subf %297, %304 : vector<8x32xf32>
    %306 = arith.mulf %305, %305 : vector<8x32xf32>
    %cst_170 = arith.constant dense<0.000000e+00> : vector<8xf32>
    %307 = vector.multi_reduction <add>, %306, %cst_170 [1] : vector<8x32xf32> to vector<8xf32>
    %308 = vector.shape_cast %307 : vector<8xf32> to vector<8x1xf32>
    %cst_171 = arith.constant 3.200000e+01 : f32
    %309 = vector.broadcast %cst_171 : f32 to vector<8x1xf32>
    %310 = arith.divf %308, %309 : vector<8x1xf32>
    %311 = vector.broadcast %303 : vector<8x1xf32> to vector<8x32xf32>
    %312 = arith.subf %297, %311 : vector<8x32xf32>
    %cst_172 = arith.constant 9.99999974E-6 : f32
    %313 = vector.broadcast %cst_172 : f32 to vector<8x1xf32>
    %314 = arith.addf %310, %313 : vector<8x1xf32>
    %315 = math.rsqrt %314 : vector<8x1xf32>
    %316 = vector.broadcast %315 : vector<8x1xf32> to vector<8x32xf32>
    %317 = arith.mulf %312, %316 : vector<8x32xf32>
    %318 = vector.broadcast %298 : vector<1x32xf32> to vector<8x32xf32>
    %319 = arith.mulf %317, %318 : vector<8x32xf32>
    %320 = vector.broadcast %299 : vector<1x32xf32> to vector<8x32xf32>
    %321 = arith.addf %319, %320 : vector<8x32xf32>
    %c0_173 = arith.constant 0 : index
    %c0_174 = arith.constant 0 : index
    %c0_175 = arith.constant 0 : index
    %322 = vector.load %arg16[%c0_173, %c0_174, %c0_175] : memref<2x8x32xf32, #tpu.memory_space<vmem>>, vector<1x8x32xf32>
    %323 = vector.shape_cast %322 : vector<1x8x32xf32> to vector<8x32xf32>
    %324 = vector.shape_cast %321 : vector<8x32xf32> to vector<1x8x32xf32>
    tpu.vector_store %arg16[%c0_173, %c0_174, %c0_175], %324 {strides = array<i32>} : memref<2x8x32xf32, #tpu.memory_space<vmem>>, vector<1x8x32xf32>,
    %c1_176 = arith.constant 1 : index
    %c0_177 = arith.constant 0 : index
    %c0_178 = arith.constant 0 : index
    %325 = vector.load %arg0[%c1_176, %c0_177, %c0_178] : memref<2x8x32xf32, #tpu.memory_space<vmem>>, vector<1x8x32xf32>
    %326 = vector.shape_cast %325 : vector<1x8x32xf32> to vector<8x32xf32>
    %c0_179 = arith.constant 0 : index
    %c0_180 = arith.constant 0 : index
    %c0_181 = arith.constant 0 : index
    %327 = vector.load %arg1[%c0_179, %c0_180, %c0_181] : memref<2x1x32xf32, #tpu.memory_space<vmem>>, vector<1x1x32xf32>
    %328 = vector.shape_cast %327 : vector<1x1x32xf32> to vector<1x32xf32>
    %c0_182 = arith.constant 0 : index
    %c0_183 = arith.constant 0 : index
    %c0_184 = arith.constant 0 : index
    %329 = vector.load %arg2[%c0_182, %c0_183, %c0_184] : memref<2x1x32xf32, #tpu.memory_space<vmem>>, vector<1x1x32xf32>
    %330 = vector.shape_cast %329 : vector<1x1x32xf32> to vector<1x32xf32>
    %cst_185 = arith.constant dense<0.000000e+00> : vector<8xf32>
    %331 = vector.multi_reduction <add>, %326, %cst_185 [1] : vector<8x32xf32> to vector<8xf32>
    %332 = vector.shape_cast %331 : vector<8xf32> to vector<8x1xf32>
    %cst_186 = arith.constant 3.200000e+01 : f32
    %333 = vector.broadcast %cst_186 : f32 to vector<8x1xf32>
    %334 = arith.divf %332, %333 : vector<8x1xf32>
    %335 = vector.broadcast %334 : vector<8x1xf32> to vector<8x32xf32>
    %336 = arith.subf %326, %335 : vector<8x32xf32>
    %337 = arith.mulf %336, %336 : vector<8x32xf32>
    %cst_187 = arith.constant dense<0.000000e+00> : vector<8xf32>
    %338 = vector.multi_reduction <add>, %337, %cst_187 [1] : vector<8x32xf32> to vector<8xf32>
    %339 = vector.shape_cast %338 : vector<8xf32> to vector<8x1xf32>
    %cst_188 = arith.constant 3.200000e+01 : f32
    %340 = vector.broadcast %cst_188 : f32 to vector<8x1xf32>
    %341 = arith.divf %339, %340 : vector<8x1xf32>
    %342 = vector.broadcast %334 : vector<8x1xf32> to vector<8x32xf32>
    %343 = arith.subf %326, %342 : vector<8x32xf32>
    %cst_189 = arith.constant 9.99999974E-6 : f32
    %344 = vector.broadcast %cst_189 : f32 to vector<8x1xf32>
    %345 = arith.addf %341, %344 : vector<8x1xf32>
    %346 = math.rsqrt %345 : vector<8x1xf32>
    %347 = vector.broadcast %346 : vector<8x1xf32> to vector<8x32xf32>
    %348 = arith.mulf %343, %347 : vector<8x32xf32>
    %349 = vector.broadcast %328 : vector<1x32xf32> to vector<8x32xf32>
    %350 = arith.mulf %348, %349 : vector<8x32xf32>
    %351 = vector.broadcast %330 : vector<1x32xf32> to vector<8x32xf32>
    %352 = arith.addf %350, %351 : vector<8x32xf32>
    %353 = vector.shape_cast %352 : vector<8x32xf32> to vector<1x8x32xf32>
    %354 = vector.broadcast %353 : vector<1x8x32xf32> to vector<4x8x32xf32>
    %c0_190 = arith.constant 0 : index
    %c0_191 = arith.constant 0 : index
    %c0_192 = arith.constant 0 : index
    %c0_193 = arith.constant 0 : index
    %355 = vector.load %arg3[%c0_190, %c0_191, %c0_192, %c0_193] : memref<2x4x32x8xf32, #tpu.memory_space<vmem>>, vector<1x4x32x8xf32>
    %356 = vector.shape_cast %355 : vector<1x4x32x8xf32> to vector<4x32x8xf32>
    "tpu.trace_start"() <{level = 10 : i32, message = "hnd,hde->hne"}> : () -> ()
    %cst_194 = arith.constant dense<0.000000e+00> : vector<4x8x8xf32>
    %357 = tpu.matmul %354, %356, %cst_194 {dimension_numbers = #tpu.dot_dimension_numbers<[2], [1], [1], [2], [0, 0, 0, 1, 1, 2], [0], [0]>} : vector<4x8x32xf32>, vector<4x32x8xf32>, vector<4x8x8xf32> -> vector<4x8x8xf32>
    "tpu.trace_stop"() : () -> ()
    %c0_195 = arith.constant 0 : index
    %c0_196 = arith.constant 0 : index
    %c0_197 = arith.constant 0 : index
    %c0_198 = arith.constant 0 : index
    %358 = vector.load %arg4[%c0_195, %c0_196, %c0_197, %c0_198] : memref<2x4x32x8xf32, #tpu.memory_space<vmem>>, vector<1x4x32x8xf32>
    %359 = vector.shape_cast %358 : vector<1x4x32x8xf32> to vector<4x32x8xf32>
    "tpu.trace_start"() <{level = 10 : i32, message = "hnd,hde->hne"}> : () -> ()
    %cst_199 = arith.constant dense<0.000000e+00> : vector<4x8x8xf32>
    %360 = tpu.matmul %354, %359, %cst_199 {dimension_numbers = #tpu.dot_dimension_numbers<[2], [1], [1], [2], [0, 0, 0, 1, 1, 2], [0], [0]>} : vector<4x8x32xf32>, vector<4x32x8xf32>, vector<4x8x8xf32> -> vector<4x8x8xf32>
    "tpu.trace_stop"() : () -> ()
    %c0_200 = arith.constant 0 : index
    %c0_201 = arith.constant 0 : index
    %c0_202 = arith.constant 0 : index
    %c0_203 = arith.constant 0 : index
    %361 = vector.load %arg5[%c0_200, %c0_201, %c0_202, %c0_203] : memref<2x4x32x8xf32, #tpu.memory_space<vmem>>, vector<1x4x32x8xf32>
    %362 = vector.shape_cast %361 : vector<1x4x32x8xf32> to vector<4x32x8xf32>
    "tpu.trace_start"() <{level = 10 : i32, message = "hnd,hde->hne"}> : () -> ()
    %cst_204 = arith.constant dense<0.000000e+00> : vector<4x8x8xf32>
    %363 = tpu.matmul %354, %362, %cst_204 {dimension_numbers = #tpu.dot_dimension_numbers<[2], [1], [1], [2], [0, 0, 0, 1, 1, 2], [0], [0]>} : vector<4x8x32xf32>, vector<4x32x8xf32>, vector<4x8x8xf32> -> vector<4x8x8xf32>
    "tpu.trace_stop"() : () -> ()
    "tpu.trace_start"() <{level = 10 : i32, message = "hqd,hkd->hqk"}> : () -> ()
    %cst_205 = arith.constant dense<0.000000e+00> : vector<4x8x8xf32>
    %364 = tpu.matmul %357, %360, %cst_205 {dimension_numbers = #tpu.dot_dimension_numbers<[2], [2], [1], [1], [0, 0, 0, 1, 1, 1], [0], [0]>} : vector<4x8x8xf32>, vector<4x8x8xf32>, vector<4x8x8xf32> -> vector<4x8x8xf32>
    "tpu.trace_stop"() : () -> ()
    %cst_206 = arith.constant 0.353553385 : f32
    %365 = vector.broadcast %cst_206 : f32 to vector<4x8x8xf32>
    %366 = arith.mulf %364, %365 : vector<4x8x8xf32>
    %cst_207 = arith.constant dense<0xFF800000> : vector<4x8xf32>
    %367 = vector.multi_reduction <maximumf>, %366, %cst_207 [2] : vector<4x8x8xf32> to vector<4x8xf32>
    %368 = vector.shape_cast %367 : vector<4x8xf32> to vector<4x8x1xf32>
    %369 = vector.broadcast %368 : vector<4x8x1xf32> to vector<4x8x8xf32>
    %370 = arith.subf %366, %369 : vector<4x8x8xf32>
    %371 = math.exp %370 : vector<4x8x8xf32>
    %cst_208 = arith.constant dense<0.000000e+00> : vector<4x8xf32>
    %372 = vector.multi_reduction <add>, %371, %cst_208 [2] : vector<4x8x8xf32> to vector<4x8xf32>
    %373 = vector.shape_cast %372 : vector<4x8xf32> to vector<4x8x1xf32>
    %374 = tpu.reciprocal %373 {approx = true} : vector<4x8x1xf32> -> vector<4x8x1xf32>
    %375 = vector.broadcast %374 : vector<4x8x1xf32> to vector<4x8x8xf32>
    %376 = arith.mulf %371, %375 : vector<4x8x8xf32>
    "tpu.trace_start"() <{level = 10 : i32, message = "hqk,hkd->hqd"}> : () -> ()
    %cst_209 = arith.constant dense<0.000000e+00> : vector<4x8x8xf32>
    %377 = tpu.matmul %376, %363, %cst_209 {dimension_numbers = #tpu.dot_dimension_numbers<[2], [1], [1], [2], [0, 0, 0, 1, 1, 2], [0], [0]>} : vector<4x8x8xf32>, vector<4x8x8xf32>, vector<4x8x8xf32> -> vector<4x8x8xf32>
    "tpu.trace_stop"() : () -> ()
    %c0_210 = arith.constant 0 : index
    %c0_211 = arith.constant 0 : index
    %c0_212 = arith.constant 0 : index
    %c0_213 = arith.constant 0 : index
    %378 = vector.load %arg6[%c0_210, %c0_211, %c0_212, %c0_213] : memref<2x4x8x32xf32, #tpu.memory_space<vmem>>, vector<1x4x8x32xf32>
    %379 = vector.shape_cast %378 : vector<1x4x8x32xf32> to vector<4x8x32xf32>
    "tpu.trace_start"() <{level = 10 : i32, message = "hnd,hde->hne"}> : () -> ()
    %cst_214 = arith.constant dense<0.000000e+00> : vector<4x8x32xf32>
    %380 = tpu.matmul %377, %379, %cst_214 {dimension_numbers = #tpu.dot_dimension_numbers<[2], [1], [1], [2], [0, 0, 0, 1, 1, 2], [0], [0]>} : vector<4x8x8xf32>, vector<4x8x32xf32>, vector<4x8x32xf32> -> vector<4x8x32xf32>
    "tpu.trace_stop"() : () -> ()
    %cst_215 = arith.constant dense<0.000000e+00> : vector<8x32xf32>
    %381 = vector.multi_reduction <add>, %380, %cst_215 [0] : vector<4x8x32xf32> to vector<8x32xf32>
    %c0_216 = arith.constant 0 : index
    %c0_217 = arith.constant 0 : index
    %c0_218 = arith.constant 0 : index
    %382 = vector.load %arg7[%c0_216, %c0_217, %c0_218] : memref<2x1x32xf32, #tpu.memory_space<vmem>>, vector<1x1x32xf32>
    %383 = vector.shape_cast %382 : vector<1x1x32xf32> to vector<1x32xf32>
    %384 = vector.broadcast %383 : vector<1x32xf32> to vector<8x32xf32>
    %385 = arith.addf %381, %384 : vector<8x32xf32>
    %386 = arith.addf %385, %326 : vector<8x32xf32>
    %c0_219 = arith.constant 0 : index
    %c0_220 = arith.constant 0 : index
    %c0_221 = arith.constant 0 : index
    %387 = vector.load %arg8[%c0_219, %c0_220, %c0_221] : memref<2x1x32xf32, #tpu.memory_space<vmem>>, vector<1x1x32xf32>
    %388 = vector.shape_cast %387 : vector<1x1x32xf32> to vector<1x32xf32>
    %c0_222 = arith.constant 0 : index
    %c0_223 = arith.constant 0 : index
    %c0_224 = arith.constant 0 : index
    %389 = vector.load %arg9[%c0_222, %c0_223, %c0_224] : memref<2x1x32xf32, #tpu.memory_space<vmem>>, vector<1x1x32xf32>
    %390 = vector.shape_cast %389 : vector<1x1x32xf32> to vector<1x32xf32>
    %cst_225 = arith.constant dense<0.000000e+00> : vector<8xf32>
    %391 = vector.multi_reduction <add>, %386, %cst_225 [1] : vector<8x32xf32> to vector<8xf32>
    %392 = vector.shape_cast %391 : vector<8xf32> to vector<8x1xf32>
    %cst_226 = arith.constant 3.200000e+01 : f32
    %393 = vector.broadcast %cst_226 : f32 to vector<8x1xf32>
    %394 = arith.divf %392, %393 : vector<8x1xf32>
    %395 = vector.broadcast %394 : vector<8x1xf32> to vector<8x32xf32>
    %396 = arith.subf %386, %395 : vector<8x32xf32>
    %397 = arith.mulf %396, %396 : vector<8x32xf32>
    %cst_227 = arith.constant dense<0.000000e+00> : vector<8xf32>
    %398 = vector.multi_reduction <add>, %397, %cst_227 [1] : vector<8x32xf32> to vector<8xf32>
    %399 = vector.shape_cast %398 : vector<8xf32> to vector<8x1xf32>
    %cst_228 = arith.constant 3.200000e+01 : f32
    %400 = vector.broadcast %cst_228 : f32 to vector<8x1xf32>
    %401 = arith.divf %399, %400 : vector<8x1xf32>
    %402 = vector.broadcast %394 : vector<8x1xf32> to vector<8x32xf32>
    %403 = arith.subf %386, %402 : vector<8x32xf32>
    %cst_229 = arith.constant 9.99999974E-6 : f32
    %404 = vector.broadcast %cst_229 : f32 to vector<8x1xf32>
    %405 = arith.addf %401, %404 : vector<8x1xf32>
    %406 = math.rsqrt %405 : vector<8x1xf32>
    %407 = vector.broadcast %406 : vector<8x1xf32> to vector<8x32xf32>
    %408 = arith.mulf %403, %407 : vector<8x32xf32>
    %409 = vector.broadcast %388 : vector<1x32xf32> to vector<8x32xf32>
    %410 = arith.mulf %408, %409 : vector<8x32xf32>
    %411 = vector.broadcast %390 : vector<1x32xf32> to vector<8x32xf32>
    %412 = arith.addf %410, %411 : vector<8x32xf32>
    %c0_230 = arith.constant 0 : index
    %c0_231 = arith.constant 0 : index
    %c0_232 = arith.constant 0 : index
    %413 = vector.load %arg10[%c0_230, %c0_231, %c0_232] : memref<2x32x64xf32, #tpu.memory_space<vmem>>, vector<1x32x64xf32>
    %414 = vector.shape_cast %413 : vector<1x32x64xf32> to vector<32x64xf32>
    %cst_233 = arith.constant dense<0.000000e+00> : vector<8x64xf32>
    %415 = tpu.matmul %412, %414, %cst_233 {dimension_numbers = #tpu.dot_dimension_numbers<[1], [0], [0], [1], [0, 0, 1, 1], [], []>} : vector<8x32xf32>, vector<32x64xf32>, vector<8x64xf32> -> vector<8x64xf32>
    %c0_234 = arith.constant 0 : index
    %c0_235 = arith.constant 0 : index
    %c0_236 = arith.constant 0 : index
    %416 = vector.load %arg11[%c0_234, %c0_235, %c0_236] : memref<2x1x64xf32, #tpu.memory_space<vmem>>, vector<1x1x64xf32>
    %417 = vector.shape_cast %416 : vector<1x1x64xf32> to vector<1x64xf32>
    %418 = vector.broadcast %417 : vector<1x64xf32> to vector<8x64xf32>
    %419 = arith.addf %415, %418 : vector<8x64xf32>
    %cst_237 = arith.constant 5.000000e-01 : f32
    %420 = vector.broadcast %cst_237 : f32 to vector<8x64xf32>
    %421 = arith.mulf %420, %419 : vector<8x64xf32>
    %cst_238 = arith.constant 0.707106769 : f32
    %422 = vector.broadcast %cst_238 : f32 to vector<8x64xf32>
    %423 = arith.mulf %419, %422 : vector<8x64xf32>
    %cst_239 = arith.constant -4.000000e+00 : f32
    %cst_240 = arith.constant 4.000000e+00 : f32
    %424 = vector.broadcast %cst_239 : f32 to vector<8x64xf32>
    %425 = arith.maximumf %424, %423 : vector<8x64xf32>
    %426 = vector.broadcast %cst_240 : f32 to vector<8x64xf32>
    %427 = arith.minimumf %426, %425 : vector<8x64xf32>
    %428 = arith.mulf %427, %427 : vector<8x64xf32>
    %cst_241 = arith.constant -2.72614237E-10 : f32
    %429 = vector.broadcast %cst_241 : f32 to vector<8x64xf32>
    %430 = arith.mulf %429, %428 : vector<8x64xf32>
    %cst_242 = arith.constant 2.77068146E-8 : f32
    %431 = vector.broadcast %cst_242 : f32 to vector<8x64xf32>
    %432 = arith.addf %430, %431 : vector<8x64xf32>
    %433 = arith.mulf %432, %428 : vector<8x64xf32>
    %cst_243 = arith.constant -2.10102394E-6 : f32
    %434 = vector.broadcast %cst_243 : f32 to vector<8x64xf32>
    %435 = arith.addf %433, %434 : vector<8x64xf32>
    %436 = arith.mulf %435, %428 : vector<8x64xf32>
    %cst_244 = arith.constant -5.69250624E-5 : f32
    %437 = vector.broadcast %cst_244 : f32 to vector<8x64xf32>
    %438 = arith.addf %436, %437 : vector<8x64xf32>
    %439 = arith.mulf %438, %428 : vector<8x64xf32>
    %cst_245 = arith.constant -7.34990637E-4 : f32
    %440 = vector.broadcast %cst_245 : f32 to vector<8x64xf32>
    %441 = arith.addf %439, %440 : vector<8x64xf32>
    %442 = arith.mulf %441, %428 : vector<8x64xf32>
    %cst_246 = arith.constant -2.954600e-03 : f32
    %443 = vector.broadcast %cst_246 : f32 to vector<8x64xf32>
    %444 = arith.addf %442, %443 : vector<8x64xf32>
    %445 = arith.mulf %444, %428 : vector<8x64xf32>
    %cst_247 = arith.constant -0.0160960332 : f32
    %446 = vector.broadcast %cst_247 : f32 to vector<8x64xf32>
    %447 = arith.addf %445, %446 : vector<8x64xf32>
    %448 = arith.mulf %447, %427 : vector<8x64xf32>
    %cst_248 = arith.constant -1.45660715E-5 : f32
    %449 = vector.broadcast %cst_248 : f32 to vector<8x64xf32>
    %450 = arith.mulf %449, %428 : vector<8x64xf32>
    %cst_249 = arith.constant -2.13374049E-4 : f32
    %451 = vector.broadcast %cst_249 : f32 to vector<8x64xf32>
    %452 = arith.addf %450, %451 : vector<8x64xf32>
    %453 = arith.mulf %452, %428 : vector<8x64xf32>
    %cst_250 = arith.constant -0.00168282702 : f32
    %454 = vector.broadcast %cst_250 : f32 to vector<8x64xf32>
    %455 = arith.addf %453, %454 : vector<8x64xf32>
    %456 = arith.mulf %455, %428 : vector<8x64xf32>
    %cst_251 = arith.constant -0.00737332925 : f32
    %457 = vector.broadcast %cst_251 : f32 to vector<8x64xf32>
    %458 = arith.addf %456, %457 : vector<8x64xf32>
    %459 = arith.mulf %458, %428 : vector<8x64xf32>
    %cst_252 = arith.constant -0.0142647391 : f32
    %460 = vector.broadcast %cst_252 : f32 to vector<8x64xf32>
    %461 = arith.addf %459, %460 : vector<8x64xf32>
    %462 = tpu.reciprocal %461 {approx = true} : vector<8x64xf32> -> vector<8x64xf32>
    %463 = arith.mulf %448, %462 : vector<8x64xf32>
    %cst_253 = arith.constant 1.000000e+00 : f32
    %464 = vector.broadcast %cst_253 : f32 to vector<8x64xf32>
    %465 = arith.addf %464, %463 : vector<8x64xf32>
    %466 = arith.mulf %421, %465 : vector<8x64xf32>
    %c0_254 = arith.constant 0 : index
    %c0_255 = arith.constant 0 : index
    %c0_256 = arith.constant 0 : index
    %467 = vector.load %arg12[%c0_254, %c0_255, %c0_256] : memref<2x64x32xf32, #tpu.memory_space<vmem>>, vector<1x64x32xf32>
    %468 = vector.shape_cast %467 : vector<1x64x32xf32> to vector<64x32xf32>
    %cst_257 = arith.constant dense<0.000000e+00> : vector<8x32xf32>
    %469 = tpu.matmul %466, %468, %cst_257 {dimension_numbers = #tpu.dot_dimension_numbers<[1], [0], [0], [1], [0, 0, 1, 1], [], []>} : vector<8x64xf32>, vector<64x32xf32>, vector<8x32xf32> -> vector<8x32xf32>
    %c0_258 = arith.constant 0 : index
    %c0_259 = arith.constant 0 : index
    %c0_260 = arith.constant 0 : index
    %470 = vector.load %arg13[%c0_258, %c0_259, %c0_260] : memref<2x1x32xf32, #tpu.memory_space<vmem>>, vector<1x1x32xf32>
    %471 = vector.shape_cast %470 : vector<1x1x32xf32> to vector<1x32xf32>
    %472 = vector.broadcast %471 : vector<1x32xf32> to vector<8x32xf32>
    %473 = arith.addf %469, %472 : vector<8x32xf32>
    %474 = arith.addf %473, %386 : vector<8x32xf32>
    %c1_261 = arith.constant 1 : index
    %c0_262 = arith.constant 0 : index
    %c0_263 = arith.constant 0 : index
    %475 = vector.load %arg1[%c1_261, %c0_262, %c0_263] : memref<2x1x32xf32, #tpu.memory_space<vmem>>, vector<1x1x32xf32>
    %476 = vector.shape_cast %475 : vector<1x1x32xf32> to vector<1x32xf32>
    %c1_264 = arith.constant 1 : index
    %c0_265 = arith.constant 0 : index
    %c0_266 = arith.constant 0 : index
    %477 = vector.load %arg2[%c1_264, %c0_265, %c0_266] : memref<2x1x32xf32, #tpu.memory_space<vmem>>, vector<1x1x32xf32>
    %478 = vector.shape_cast %477 : vector<1x1x32xf32> to vector<1x32xf32>
    %cst_267 = arith.constant dense<0.000000e+00> : vector<8xf32>
    %479 = vector.multi_reduction <add>, %474, %cst_267 [1] : vector<8x32xf32> to vector<8xf32>
    %480 = vector.shape_cast %479 : vector<8xf32> to vector<8x1xf32>
    %cst_268 = arith.constant 3.200000e+01 : f32
    %481 = vector.broadcast %cst_268 : f32 to vector<8x1xf32>
    %482 = arith.divf %480, %481 : vector<8x1xf32>
    %483 = vector.broadcast %482 : vector<8x1xf32> to vector<8x32xf32>
    %484 = arith.subf %474, %483 : vector<8x32xf32>
    %485 = arith.mulf %484, %484 : vector<8x32xf32>
    %cst_269 = arith.constant dense<0.000000e+00> : vector<8xf32>
    %486 = vector.multi_reduction <add>, %485, %cst_269 [1] : vector<8x32xf32> to vector<8xf32>
    %487 = vector.shape_cast %486 : vector<8xf32> to vector<8x1xf32>
    %cst_270 = arith.constant 3.200000e+01 : f32
    %488 = vector.broadcast %cst_270 : f32 to vector<8x1xf32>
    %489 = arith.divf %487, %488 : vector<8x1xf32>
    %490 = vector.broadcast %482 : vector<8x1xf32> to vector<8x32xf32>
    %491 = arith.subf %474, %490 : vector<8x32xf32>
    %cst_271 = arith.constant 9.99999974E-6 : f32
    %492 = vector.broadcast %cst_271 : f32 to vector<8x1xf32>
    %493 = arith.addf %489, %492 : vector<8x1xf32>
    %494 = math.rsqrt %493 : vector<8x1xf32>
    %495 = vector.broadcast %494 : vector<8x1xf32> to vector<8x32xf32>
    %496 = arith.mulf %491, %495 : vector<8x32xf32>
    %497 = vector.broadcast %476 : vector<1x32xf32> to vector<8x32xf32>
    %498 = arith.mulf %496, %497 : vector<8x32xf32>
    %499 = vector.broadcast %478 : vector<1x32xf32> to vector<8x32xf32>
    %500 = arith.addf %498, %499 : vector<8x32xf32>
    %501 = vector.shape_cast %500 : vector<8x32xf32> to vector<1x8x32xf32>
    %502 = vector.broadcast %501 : vector<1x8x32xf32> to vector<4x8x32xf32>
    %c1_272 = arith.constant 1 : index
    %c0_273 = arith.constant 0 : index
    %c0_274 = arith.constant 0 : index
    %c0_275 = arith.constant 0 : index
    %503 = vector.load %arg3[%c1_272, %c0_273, %c0_274, %c0_275] : memref<2x4x32x8xf32, #tpu.memory_space<vmem>>, vector<1x4x32x8xf32>
    %504 = vector.shape_cast %503 : vector<1x4x32x8xf32> to vector<4x32x8xf32>
    "tpu.trace_start"() <{level = 10 : i32, message = "hnd,hde->hne"}> : () -> ()
    %cst_276 = arith.constant dense<0.000000e+00> : vector<4x8x8xf32>
    %505 = tpu.matmul %502, %504, %cst_276 {dimension_numbers = #tpu.dot_dimension_numbers<[2], [1], [1], [2], [0, 0, 0, 1, 1, 2], [0], [0]>} : vector<4x8x32xf32>, vector<4x32x8xf32>, vector<4x8x8xf32> -> vector<4x8x8xf32>
    "tpu.trace_stop"() : () -> ()
    %c1_277 = arith.constant 1 : index
    %c0_278 = arith.constant 0 : index
    %c0_279 = arith.constant 0 : index
    %c0_280 = arith.constant 0 : index
    %506 = vector.load %arg4[%c1_277, %c0_278, %c0_279, %c0_280] : memref<2x4x32x8xf32, #tpu.memory_space<vmem>>, vector<1x4x32x8xf32>
    %507 = vector.shape_cast %506 : vector<1x4x32x8xf32> to vector<4x32x8xf32>
    "tpu.trace_start"() <{level = 10 : i32, message = "hnd,hde->hne"}> : () -> ()
    %cst_281 = arith.constant dense<0.000000e+00> : vector<4x8x8xf32>
    %508 = tpu.matmul %502, %507, %cst_281 {dimension_numbers = #tpu.dot_dimension_numbers<[2], [1], [1], [2], [0, 0, 0, 1, 1, 2], [0], [0]>} : vector<4x8x32xf32>, vector<4x32x8xf32>, vector<4x8x8xf32> -> vector<4x8x8xf32>
    "tpu.trace_stop"() : () -> ()
    %c1_282 = arith.constant 1 : index
    %c0_283 = arith.constant 0 : index
    %c0_284 = arith.constant 0 : index
    %c0_285 = arith.constant 0 : index
    %509 = vector.load %arg5[%c1_282, %c0_283, %c0_284, %c0_285] : memref<2x4x32x8xf32, #tpu.memory_space<vmem>>, vector<1x4x32x8xf32>
    %510 = vector.shape_cast %509 : vector<1x4x32x8xf32> to vector<4x32x8xf32>
    "tpu.trace_start"() <{level = 10 : i32, message = "hnd,hde->hne"}> : () -> ()
    %cst_286 = arith.constant dense<0.000000e+00> : vector<4x8x8xf32>
    %511 = tpu.matmul %502, %510, %cst_286 {dimension_numbers = #tpu.dot_dimension_numbers<[2], [1], [1], [2], [0, 0, 0, 1, 1, 2], [0], [0]>} : vector<4x8x32xf32>, vector<4x32x8xf32>, vector<4x8x8xf32> -> vector<4x8x8xf32>
    "tpu.trace_stop"() : () -> ()
    "tpu.trace_start"() <{level = 10 : i32, message = "hqd,hkd->hqk"}> : () -> ()
    %cst_287 = arith.constant dense<0.000000e+00> : vector<4x8x8xf32>
    %512 = tpu.matmul %505, %508, %cst_287 {dimension_numbers = #tpu.dot_dimension_numbers<[2], [2], [1], [1], [0, 0, 0, 1, 1, 1], [0], [0]>} : vector<4x8x8xf32>, vector<4x8x8xf32>, vector<4x8x8xf32> -> vector<4x8x8xf32>
    "tpu.trace_stop"() : () -> ()
    %cst_288 = arith.constant 0.353553385 : f32
    %513 = vector.broadcast %cst_288 : f32 to vector<4x8x8xf32>
    %514 = arith.mulf %512, %513 : vector<4x8x8xf32>
    %cst_289 = arith.constant dense<0xFF800000> : vector<4x8xf32>
    %515 = vector.multi_reduction <maximumf>, %514, %cst_289 [2] : vector<4x8x8xf32> to vector<4x8xf32>
    %516 = vector.shape_cast %515 : vector<4x8xf32> to vector<4x8x1xf32>
    %517 = vector.broadcast %516 : vector<4x8x1xf32> to vector<4x8x8xf32>
    %518 = arith.subf %514, %517 : vector<4x8x8xf32>
    %519 = math.exp %518 : vector<4x8x8xf32>
    %cst_290 = arith.constant dense<0.000000e+00> : vector<4x8xf32>
    %520 = vector.multi_reduction <add>, %519, %cst_290 [2] : vector<4x8x8xf32> to vector<4x8xf32>
    %521 = vector.shape_cast %520 : vector<4x8xf32> to vector<4x8x1xf32>
    %522 = tpu.reciprocal %521 {approx = true} : vector<4x8x1xf32> -> vector<4x8x1xf32>
    %523 = vector.broadcast %522 : vector<4x8x1xf32> to vector<4x8x8xf32>
    %524 = arith.mulf %519, %523 : vector<4x8x8xf32>
    "tpu.trace_start"() <{level = 10 : i32, message = "hqk,hkd->hqd"}> : () -> ()
    %cst_291 = arith.constant dense<0.000000e+00> : vector<4x8x8xf32>
    %525 = tpu.matmul %524, %511, %cst_291 {dimension_numbers = #tpu.dot_dimension_numbers<[2], [1], [1], [2], [0, 0, 0, 1, 1, 2], [0], [0]>} : vector<4x8x8xf32>, vector<4x8x8xf32>, vector<4x8x8xf32> -> vector<4x8x8xf32>
    "tpu.trace_stop"() : () -> ()
    %c1_292 = arith.constant 1 : index
    %c0_293 = arith.constant 0 : index
    %c0_294 = arith.constant 0 : index
    %c0_295 = arith.constant 0 : index
    %526 = vector.load %arg6[%c1_292, %c0_293, %c0_294, %c0_295] : memref<2x4x8x32xf32, #tpu.memory_space<vmem>>, vector<1x4x8x32xf32>
    %527 = vector.shape_cast %526 : vector<1x4x8x32xf32> to vector<4x8x32xf32>
    "tpu.trace_start"() <{level = 10 : i32, message = "hnd,hde->hne"}> : () -> ()
    %cst_296 = arith.constant dense<0.000000e+00> : vector<4x8x32xf32>
    %528 = tpu.matmul %525, %527, %cst_296 {dimension_numbers = #tpu.dot_dimension_numbers<[2], [1], [1], [2], [0, 0, 0, 1, 1, 2], [0], [0]>} : vector<4x8x8xf32>, vector<4x8x32xf32>, vector<4x8x32xf32> -> vector<4x8x32xf32>
    "tpu.trace_stop"() : () -> ()
    %cst_297 = arith.constant dense<0.000000e+00> : vector<8x32xf32>
    %529 = vector.multi_reduction <add>, %528, %cst_297 [0] : vector<4x8x32xf32> to vector<8x32xf32>
    %c1_298 = arith.constant 1 : index
    %c0_299 = arith.constant 0 : index
    %c0_300 = arith.constant 0 : index
    %530 = vector.load %arg7[%c1_298, %c0_299, %c0_300] : memref<2x1x32xf32, #tpu.memory_space<vmem>>, vector<1x1x32xf32>
    %531 = vector.shape_cast %530 : vector<1x1x32xf32> to vector<1x32xf32>
    %532 = vector.broadcast %531 : vector<1x32xf32> to vector<8x32xf32>
    %533 = arith.addf %529, %532 : vector<8x32xf32>
    %534 = arith.addf %533, %474 : vector<8x32xf32>
    %c1_301 = arith.constant 1 : index
    %c0_302 = arith.constant 0 : index
    %c0_303 = arith.constant 0 : index
    %535 = vector.load %arg8[%c1_301, %c0_302, %c0_303] : memref<2x1x32xf32, #tpu.memory_space<vmem>>, vector<1x1x32xf32>
    %536 = vector.shape_cast %535 : vector<1x1x32xf32> to vector<1x32xf32>
    %c1_304 = arith.constant 1 : index
    %c0_305 = arith.constant 0 : index
    %c0_306 = arith.constant 0 : index
    %537 = vector.load %arg9[%c1_304, %c0_305, %c0_306] : memref<2x1x32xf32, #tpu.memory_space<vmem>>, vector<1x1x32xf32>
    %538 = vector.shape_cast %537 : vector<1x1x32xf32> to vector<1x32xf32>
    %cst_307 = arith.constant dense<0.000000e+00> : vector<8xf32>
    %539 = vector.multi_reduction <add>, %534, %cst_307 [1] : vector<8x32xf32> to vector<8xf32>
    %540 = vector.shape_cast %539 : vector<8xf32> to vector<8x1xf32>
    %cst_308 = arith.constant 3.200000e+01 : f32
    %541 = vector.broadcast %cst_308 : f32 to vector<8x1xf32>
    %542 = arith.divf %540, %541 : vector<8x1xf32>
    %543 = vector.broadcast %542 : vector<8x1xf32> to vector<8x32xf32>
    %544 = arith.subf %534, %543 : vector<8x32xf32>
    %545 = arith.mulf %544, %544 : vector<8x32xf32>
    %cst_309 = arith.constant dense<0.000000e+00> : vector<8xf32>
    %546 = vector.multi_reduction <add>, %545, %cst_309 [1] : vector<8x32xf32> to vector<8xf32>
    %547 = vector.shape_cast %546 : vector<8xf32> to vector<8x1xf32>
    %cst_310 = arith.constant 3.200000e+01 : f32
    %548 = vector.broadcast %cst_310 : f32 to vector<8x1xf32>
    %549 = arith.divf %547, %548 : vector<8x1xf32>
    %550 = vector.broadcast %542 : vector<8x1xf32> to vector<8x32xf32>
    %551 = arith.subf %534, %550 : vector<8x32xf32>
    %cst_311 = arith.constant 9.99999974E-6 : f32
    %552 = vector.broadcast %cst_311 : f32 to vector<8x1xf32>
    %553 = arith.addf %549, %552 : vector<8x1xf32>
    %554 = math.rsqrt %553 : vector<8x1xf32>
    %555 = vector.broadcast %554 : vector<8x1xf32> to vector<8x32xf32>
    %556 = arith.mulf %551, %555 : vector<8x32xf32>
    %557 = vector.broadcast %536 : vector<1x32xf32> to vector<8x32xf32>
    %558 = arith.mulf %556, %557 : vector<8x32xf32>
    %559 = vector.broadcast %538 : vector<1x32xf32> to vector<8x32xf32>
    %560 = arith.addf %558, %559 : vector<8x32xf32>
    %c1_312 = arith.constant 1 : index
    %c0_313 = arith.constant 0 : index
    %c0_314 = arith.constant 0 : index
    %561 = vector.load %arg10[%c1_312, %c0_313, %c0_314] : memref<2x32x64xf32, #tpu.memory_space<vmem>>, vector<1x32x64xf32>
    %562 = vector.shape_cast %561 : vector<1x32x64xf32> to vector<32x64xf32>
    %cst_315 = arith.constant dense<0.000000e+00> : vector<8x64xf32>
    %563 = tpu.matmul %560, %562, %cst_315 {dimension_numbers = #tpu.dot_dimension_numbers<[1], [0], [0], [1], [0, 0, 1, 1], [], []>} : vector<8x32xf32>, vector<32x64xf32>, vector<8x64xf32> -> vector<8x64xf32>
    %c1_316 = arith.constant 1 : index
    %c0_317 = arith.constant 0 : index
    %c0_318 = arith.constant 0 : index
    %564 = vector.load %arg11[%c1_316, %c0_317, %c0_318] : memref<2x1x64xf32, #tpu.memory_space<vmem>>, vector<1x1x64xf32>
    %565 = vector.shape_cast %564 : vector<1x1x64xf32> to vector<1x64xf32>
    %566 = vector.broadcast %565 : vector<1x64xf32> to vector<8x64xf32>
    %567 = arith.addf %563, %566 : vector<8x64xf32>
    %cst_319 = arith.constant 5.000000e-01 : f32
    %568 = vector.broadcast %cst_319 : f32 to vector<8x64xf32>
    %569 = arith.mulf %568, %567 : vector<8x64xf32>
    %cst_320 = arith.constant 0.707106769 : f32
    %570 = vector.broadcast %cst_320 : f32 to vector<8x64xf32>
    %571 = arith.mulf %567, %570 : vector<8x64xf32>
    %cst_321 = arith.constant -4.000000e+00 : f32
    %cst_322 = arith.constant 4.000000e+00 : f32
    %572 = vector.broadcast %cst_321 : f32 to vector<8x64xf32>
    %573 = arith.maximumf %572, %571 : vector<8x64xf32>
    %574 = vector.broadcast %cst_322 : f32 to vector<8x64xf32>
    %575 = arith.minimumf %574, %573 : vector<8x64xf32>
    %576 = arith.mulf %575, %575 : vector<8x64xf32>
    %cst_323 = arith.constant -2.72614237E-10 : f32
    %577 = vector.broadcast %cst_323 : f32 to vector<8x64xf32>
    %578 = arith.mulf %577, %576 : vector<8x64xf32>
    %cst_324 = arith.constant 2.77068146E-8 : f32
    %579 = vector.broadcast %cst_324 : f32 to vector<8x64xf32>
    %580 = arith.addf %578, %579 : vector<8x64xf32>
    %581 = arith.mulf %580, %576 : vector<8x64xf32>
    %cst_325 = arith.constant -2.10102394E-6 : f32
    %582 = vector.broadcast %cst_325 : f32 to vector<8x64xf32>
    %583 = arith.addf %581, %582 : vector<8x64xf32>
    %584 = arith.mulf %583, %576 : vector<8x64xf32>
    %cst_326 = arith.constant -5.69250624E-5 : f32
    %585 = vector.broadcast %cst_326 : f32 to vector<8x64xf32>
    %586 = arith.addf %584, %585 : vector<8x64xf32>
    %587 = arith.mulf %586, %576 : vector<8x64xf32>
    %cst_327 = arith.constant -7.34990637E-4 : f32
    %588 = vector.broadcast %cst_327 : f32 to vector<8x64xf32>
    %589 = arith.addf %587, %588 : vector<8x64xf32>
    %590 = arith.mulf %589, %576 : vector<8x64xf32>
    %cst_328 = arith.constant -2.954600e-03 : f32
    %591 = vector.broadcast %cst_328 : f32 to vector<8x64xf32>
    %592 = arith.addf %590, %591 : vector<8x64xf32>
    %593 = arith.mulf %592, %576 : vector<8x64xf32>
    %cst_329 = arith.constant -0.0160960332 : f32
    %594 = vector.broadcast %cst_329 : f32 to vector<8x64xf32>
    %595 = arith.addf %593, %594 : vector<8x64xf32>
    %596 = arith.mulf %595, %575 : vector<8x64xf32>
    %cst_330 = arith.constant -1.45660715E-5 : f32
    %597 = vector.broadcast %cst_330 : f32 to vector<8x64xf32>
    %598 = arith.mulf %597, %576 : vector<8x64xf32>
    %cst_331 = arith.constant -2.13374049E-4 : f32
    %599 = vector.broadcast %cst_331 : f32 to vector<8x64xf32>
    %600 = arith.addf %598, %599 : vector<8x64xf32>
    %601 = arith.mulf %600, %576 : vector<8x64xf32>
    %cst_332 = arith.constant -0.00168282702 : f32
    %602 = vector.broadcast %cst_332 : f32 to vector<8x64xf32>
    %603 = arith.addf %601, %602 : vector<8x64xf32>
    %604 = arith.mulf %603, %576 : vector<8x64xf32>
    %cst_333 = arith.constant -0.00737332925 : f32
    %605 = vector.broadcast %cst_333 : f32 to vector<8x64xf32>
    %606 = arith.addf %604, %605 : vector<8x64xf32>
    %607 = arith.mulf %606, %576 : vector<8x64xf32>
    %cst_334 = arith.constant -0.0142647391 : f32
    %608 = vector.broadcast %cst_334 : f32 to vector<8x64xf32>
    %609 = arith.addf %607, %608 : vector<8x64xf32>
    %610 = tpu.reciprocal %609 {approx = true} : vector<8x64xf32> -> vector<8x64xf32>
    %611 = arith.mulf %596, %610 : vector<8x64xf32>
    %cst_335 = arith.constant 1.000000e+00 : f32
    %612 = vector.broadcast %cst_335 : f32 to vector<8x64xf32>
    %613 = arith.addf %612, %611 : vector<8x64xf32>
    %614 = arith.mulf %569, %613 : vector<8x64xf32>
    %c1_336 = arith.constant 1 : index
    %c0_337 = arith.constant 0 : index
    %c0_338 = arith.constant 0 : index
    %615 = vector.load %arg12[%c1_336, %c0_337, %c0_338] : memref<2x64x32xf32, #tpu.memory_space<vmem>>, vector<1x64x32xf32>
    %616 = vector.shape_cast %615 : vector<1x64x32xf32> to vector<64x32xf32>
    %cst_339 = arith.constant dense<0.000000e+00> : vector<8x32xf32>
    %617 = tpu.matmul %614, %616, %cst_339 {dimension_numbers = #tpu.dot_dimension_numbers<[1], [0], [0], [1], [0, 0, 1, 1], [], []>} : vector<8x64xf32>, vector<64x32xf32>, vector<8x32xf32> -> vector<8x32xf32>
    %c1_340 = arith.constant 1 : index
    %c0_341 = arith.constant 0 : index
    %c0_342 = arith.constant 0 : index
    %618 = vector.load %arg13[%c1_340, %c0_341, %c0_342] : memref<2x1x32xf32, #tpu.memory_space<vmem>>, vector<1x1x32xf32>
    %619 = vector.shape_cast %618 : vector<1x1x32xf32> to vector<1x32xf32>
    %620 = vector.broadcast %619 : vector<1x32xf32> to vector<8x32xf32>
    %621 = arith.addf %617, %620 : vector<8x32xf32>
    %622 = arith.addf %621, %534 : vector<8x32xf32>
    %c0_343 = arith.constant 0 : index
    %c0_344 = arith.constant 0 : index
    %623 = vector.load %arg14[%c0_343, %c0_344] : memref<1x32xf32, #tpu.memory_space<vmem>>, vector<1x32xf32>
    %c0_345 = arith.constant 0 : index
    %c0_346 = arith.constant 0 : index
    %624 = vector.load %arg15[%c0_345, %c0_346] : memref<1x32xf32, #tpu.memory_space<vmem>>, vector<1x32xf32>
    %cst_347 = arith.constant dense<0.000000e+00> : vector<8xf32>
    %625 = vector.multi_reduction <add>, %622, %cst_347 [1] : vector<8x32xf32> to vector<8xf32>
    %626 = vector.shape_cast %625 : vector<8xf32> to vector<8x1xf32>
    %cst_348 = arith.constant 3.200000e+01 : f32
    %627 = vector.broadcast %cst_348 : f32 to vector<8x1xf32>
    %628 = arith.divf %626, %627 : vector<8x1xf32>
    %629 = vector.broadcast %628 : vector<8x1xf32> to vector<8x32xf32>
    %630 = arith.subf %622, %629 : vector<8x32xf32>
    %631 = arith.mulf %630, %630 : vector<8x32xf32>
    %cst_349 = arith.constant dense<0.000000e+00> : vector<8xf32>
    %632 = vector.multi_reduction <add>, %631, %cst_349 [1] : vector<8x32xf32> to vector<8xf32>
    %633 = vector.shape_cast %632 : vector<8xf32> to vector<8x1xf32>
    %cst_350 = arith.constant 3.200000e+01 : f32
    %634 = vector.broadcast %cst_350 : f32 to vector<8x1xf32>
    %635 = arith.divf %633, %634 : vector<8x1xf32>
    %636 = vector.broadcast %628 : vector<8x1xf32> to vector<8x32xf32>
    %637 = arith.subf %622, %636 : vector<8x32xf32>
    %cst_351 = arith.constant 9.99999974E-6 : f32
    %638 = vector.broadcast %cst_351 : f32 to vector<8x1xf32>
    %639 = arith.addf %635, %638 : vector<8x1xf32>
    %640 = math.rsqrt %639 : vector<8x1xf32>
    %641 = vector.broadcast %640 : vector<8x1xf32> to vector<8x32xf32>
    %642 = arith.mulf %637, %641 : vector<8x32xf32>
    %643 = vector.broadcast %623 : vector<1x32xf32> to vector<8x32xf32>
    %644 = arith.mulf %642, %643 : vector<8x32xf32>
    %645 = vector.broadcast %624 : vector<1x32xf32> to vector<8x32xf32>
    %646 = arith.addf %644, %645 : vector<8x32xf32>
    %c1_352 = arith.constant 1 : index
    %c0_353 = arith.constant 0 : index
    %c0_354 = arith.constant 0 : index
    %647 = vector.load %arg16[%c1_352, %c0_353, %c0_354] : memref<2x8x32xf32, #tpu.memory_space<vmem>>, vector<1x8x32xf32>
    %648 = vector.shape_cast %647 : vector<1x8x32xf32> to vector<8x32xf32>
    %649 = vector.shape_cast %646 : vector<8x32xf32> to vector<1x8x32xf32>
    tpu.vector_store %arg16[%c1_352, %c0_353, %c0_354], %649 {strides = array<i32>} : memref<2x8x32xf32, #tpu.memory_space<vmem>>, vector<1x8x32xf32>,
    return
  }
}

</mosaic_0001>

<bundles_post_ra>
// kernel: tpu_custom_call.1
= control target key start
LH: loop header
LB: loop body
LE: loop exit
PB: predicated region body
PF: predicated region fallthrough
CT: control target
= control target key end

     0   :  { %s12323_s0 = inlined_call_operand.vmem [shape: f32[2,8,32], index: 0, kind: input, shape index: {}]   ;;  %s12324_s1 = inlined_call_operand.vmem [shape: f32[2,1,32], index: 1, kind: input, shape index: {}]   ;;  %s12325_s2 = inlined_call_operand.vmem [shape: f32[2,1,32], index: 2, kind: input, shape index: {}]   ;;  %s12326_s3 = inlined_call_operand.vmem [shape: f32[2,4,32,8], index: 3, kind: input, shape index: {}]   ;;  %s12327_s4 = inlined_call_operand.vmem [shape: f32[2,4,32,8], index: 4, kind: input, shape index: {}]   ;;  %s12328_s5 = inlined_call_operand.vmem [shape: f32[2,4,32,8], index: 5, kind: input, shape index: {}]   ;;  %s12329_s6 = inlined_call_operand.vmem [shape: f32[2,4,8,32], index: 6, kind: input, shape index: {}]   ;;  %s12330_s7 = inlined_call_operand.vmem [shape: f32[2,1,32], index: 7, kind: input, shape index: {}]   ;;  %s12331_s8 = inlined_call_operand.vmem [shape: f32[2,1,32], index: 8, kind: input, shape index: {}]   ;;  %s12332_s9 = inlined_call_operand.vmem [shape: f32[2,1,32], index: 9, kind: input, shape index: {}]   ;;  %s12333_s10 = inlined_call_operand.vmem [shape: f32[2,32,64], index: 10, kind: input, shape index: {}]   ;;  %s12334_s11 = inlined_call_operand.vmem [shape: f32[2,1,64], index: 11, kind: input, shape index: {}]   ;;  %s12335_s12 = inlined_call_operand.vmem [shape: f32[2,64,32], index: 12, kind: input, shape index: {}]   ;;  %s12336_s13 = inlined_call_operand.vmem [shape: f32[2,1,32], index: 13, kind: input, shape index: {}]   ;;  %s12337_s14 = inlined_call_operand.vmem [shape: f32[1,32], index: 14, kind: input, shape index: {}]   ;;  %s12338_s15 = inlined_call_operand.vmem [shape: f32[1,32], index: 15, kind: input, shape index: {}]   ;;  %s12339_s16 = inlined_call_operand.hbm [shape: f32[2,8,32], index: 16, kind: output, shape index: {}]  }
   0x1   :  { %12341 = sst [smem:[#allocation5_spill]] %s12323_s0 }
   0x2   :  { %s12342_s23 = sld [smem:[#allocation5_spill]]  ;;  %vm57_vm0 = vcmask 261120  }
   0x8   :  { %v10738_v0 = vld [vmem:[%s12342_s23] sm:$0xff] }
   0x9   :  { %21 = vsyncpa [#allocation3], 0  ;;  %v58_v1 = vsel %vm57_vm0, %v10738_v0, 0.0  ;;  %v86_v7 = vld [vmem:[%s12326_s3] sm:$0xff]  ;;  %v87_v8 = vld [vmem:[%s12326_s3 + $0x8] sm:$0xff]  ;;  %v10644_v12 = vmov 0.0|0.0  }
   0xa   :  { %59 = vadd.xlane.f32.xlu0 %v58_v1  ;;  %v90_v9 = vld [vmem:[%s12326_s3 + $0x20] sm:$0xff]  ;;  %v10163_v10 = vpack.c.bf16 %v87_v8, %v86_v7  ;;  %v91_v11 = vld [vmem:[%s12326_s3 + $0x28] sm:$0xff]  ;;  %10162 = vmatprep.subr.bf16.mxu0 %v10644_v12  ;;  %v88_v14 = vld [vmem:[%s12326_s3 + $0x10] sm:$0xff]  ;;  %vm10645_vm1 = vmmov 0   ;;  %v10646_v20 = vmov 0.0   ;;  %vm977_vm2 = vcmask 64512  }
   0xb   :  { %10168 = vmatprep.subr.bf16.mxu1 %v10644_v12  ;;  %v10169_v13 = vpack.c.bf16 %v91_v11, %v90_v9  ;;  %v89_v15 = vld [vmem:[%s12326_s3 + $0x18] sm:$0xff]  ;;  %v92_v16 = vld [vmem:[%s12326_s3 + $0x30] sm:$0xff]  ;;  %9282 = vmatprep.mubr.msk.f32.mxu0 %vm10645_vm1, %v10646_v20  ;;  %v8583_v25 = vld [vmem:[%s12324_s1] ss:$0 sm:$0xff]  ;;  %vm2092_vm3 = vcmask 523264  }
   0xc   :  { %10164 = vmatpush3.bf16.msra.mxu0 %v10163_v10  ;;  %v10166_v17 = vpack.c.bf16 %v89_v15, %v88_v14  ;;  %v93_v18 = vld [vmem:[%s12326_s3 + $0x38] sm:$0xff]  ;;  %9293 = vmatprep.mubr.msk.f32.mxu1 %vm10645_vm1, %v10646_v20  ;;  %v94_v26 = vld [vmem:[%s12326_s3 + $0x40] sm:$0xff]  ;;  %v95_v28 = vld [vmem:[%s12326_s3 + $0x48] sm:$0xff] }
   0xd   :  { %10170 = vmatpush3.bf16.msra.mxu1 %v10169_v13  ;;  %10165 = vmatprep.subr.bf16.mxu0 %v10644_v12  ;;  %v10172_v19 = vpack.c.bf16 %v93_v18, %v92_v16  ;;  %v98_v29 = vld [vmem:[%s12326_s3 + $0x60] sm:$0xff]  ;;  %v99_v30 = vld [vmem:[%s12326_s3 + $0x68] sm:$0xff]  ;;  %v10175_v33 = vpack.c.bf16 %v95_v28, %v94_v26  ;;  %v96_v35 = vld [vmem:[%s12326_s3 + $0x50] sm:$0xff] }
   0xe   :  { %10171 = vmatprep.subr.bf16.mxu1 %v10644_v12  ;;  %v8584_v31 = vld [vmem:[%s12325_s2] ss:$0 sm:$0xff]  ;;  %v10181_v34 = vpack.c.bf16 %v99_v30, %v98_v29  ;;  %v97_v37 = vld [vmem:[%s12326_s3 + $0x58] sm:$0xff]  ;;  %v100_v38 = vld [vmem:[%s12326_s3 + $0x70] sm:$0xff] }
   0xf   :  { %v101_v39 = vld [vmem:[%s12326_s3 + $0x78] sm:$0xff]  ;;  %v10178_v40 = vpack.c.bf16 %v97_v37, %v96_v35  ;;  %v385_v42 = vld [vmem:[%s12327_s4] sm:$0xff]  ;;  %v386_v43 = vld [vmem:[%s12327_s4 + $0x8] sm:$0xff] }
  0x10   :  { %10167 = vmatpush3.bf16.msra.mxu0 %v10166_v17  ;;  %v10184_v41 = vpack.c.bf16 %v101_v39, %v100_v38  ;;  %v389_v44 = vld [vmem:[%s12327_s4 + $0x20] sm:$0xff]  ;;  %v390_v45 = vld [vmem:[%s12327_s4 + $0x28] sm:$0xff]  ;;  %v10187_v46 = vpack.c.bf16 %v386_v43, %v385_v42  ;;  %v387_v48 = vld [vmem:[%s12327_s4 + $0x10] sm:$0xff] }
  0x11   :  { %10173 = vmatpush3.bf16.msra.mxu1 %v10172_v19  ;;  %10174 = vmatprep.subr.bf16.mxu0 %v10644_v12  ;;  %v10193_v47 = vpack.c.bf16 %v390_v45, %v389_v44  ;;  %v388_v49 = vld [vmem:[%s12327_s4 + $0x18] sm:$0xff]  ;;  %v391_v50 = vld [vmem:[%s12327_s4 + $0x30] sm:$0xff]  ;;  %v393_v54 = vld [vmem:[%s12327_s4 + $0x40] sm:$0xff] }
  0x12   :  { %10180 = vmatprep.subr.bf16.mxu1 %v10644_v12  ;;  %v392_v51 = vld [vmem:[%s12327_s4 + $0x38] sm:$0xff]  ;;  %v10190_v52 = vpack.c.bf16 %v388_v49, %v387_v48  ;;  %v394_v55 = vld [vmem:[%s12327_s4 + $0x48] sm:$0xff]  ;;  %v397_v56 = vld [vmem:[%s12327_s4 + $0x60] sm:$0xff] }
  0x13   :  { %v10196_v53 = vpack.c.bf16 %v392_v51, %v391_v50  ;;  %v398_v57 = vld [vmem:[%s12327_s4 + $0x68] sm:$0xff]  ;;  %v10199_v58 = vpack.c.bf16 %v394_v55, %v393_v54  ;;  %v395_v60 = vld [vmem:[%s12327_s4 + $0x50] sm:$0xff]  ;;  %v396_v61 = vld [vmem:[%s12327_s4 + $0x58] sm:$0xff] }
  0x14   :  { %v10205_v59 = vpack.c.bf16 %v398_v57, %v397_v56  ;;  %v399_v62 = vld [vmem:[%s12327_s4 + $0x70] sm:$0xff]  ;;  %v400_v63 = vld [vmem:[%s12327_s4 + $0x78] sm:$0xff]  ;;  %v10202_v1 = vpack.c.bf16 %v396_v61, %v395_v60  ;;  %v689_v16 = vld [vmem:[%s12328_s5 + $0x40] sm:$0xff] }
  0x15   :  { %v683_v9 = vld [vmem:[%s12328_s5 + $0x10] sm:$0xff]  ;;  %v684_v10 = vld [vmem:[%s12328_s5 + $0x18] sm:$0xff]  ;;  %v690_v17 = vld [vmem:[%s12328_s5 + $0x48] sm:$0xff] }
  0x16   :  { %v687_v11 = vld [vmem:[%s12328_s5 + $0x30] sm:$0xff]  ;;  %v688_v13 = vld [vmem:[%s12328_s5 + $0x38] sm:$0xff]  ;;  %v10214_v14 = vpack.c.bf16 %v684_v10, %v683_v9  ;;  %v693_v18 = vld [vmem:[%s12328_s5 + $0x60] sm:$0xff] }
  0x17   :  { %v10220_v15 = vpack.c.bf16 %v688_v13, %v687_v11  ;;  %v694_v19 = vld [vmem:[%s12328_s5 + $0x68] sm:$0xff]  ;;  %v696_v26 = vld [vmem:[%s12328_s5 + $0x78] sm:$0xff] }
  0x97   :  { %v60_v2 = vpop.xlane.xlu0 %59 }
  0x98   :  { %v62_v3 = vmul.f32 0.03125, %v60_v2  ;;  %v10208_v2 = vpack.c.bf16 %v400_v63, %v399_v62 }
  0x9a   :  { %v63_v4 = vsub.f32 %v10738_v0, %v62_v3  ;;  %v681_v3 = vld [vmem:[%s12328_s5] sm:$0xff] }
  0x9c   :  { %v64_v5 = vmul.f32 %v63_v4, %v63_v4 }
  0x9e   :  { %v65_v6 = vsel %vm57_vm0, %v64_v5, 0.0  ;;  %v685_v5 = vld [vmem:[%s12328_s5 + $0x20] sm:$0xff] }
  0x9f   :  { %66 = vadd.xlane.f32.xlu0 %v65_v6  ;;  %v686_v6 = vld [vmem:[%s12328_s5 + $0x28] sm:$0xff] }
  0xa0   :  { %v10217_v8 = vpack.c.bf16 %v686_v6, %v685_v5 }
 0x12c   :  { %v67_v21 = vpop.xlane.xlu0 %66 }
 0x12d   :  { %v68_v22 = vmul.f32 0.03125, %v67_v21  ;;  %v10223_v21 = vpack.c.bf16 %v690_v17, %v689_v16 }
 0x12f   :  { %v69_v23 = vadd.f32 1e-05, %v68_v22  ;;  %v10229_v22 = vpack.c.bf16 %v694_v19, %v693_v18 }
 0x131   :  { %10528 = vrsqrt.f32 %v69_v23  ;;  %v691_v23 = vld [vmem:[%s12328_s5 + $0x50] sm:$0xff] }
 0x13b   :  { %v10529_v24 = vpop.eup %10528 }
 0x13c   :  { %v71_v27 = vmul.f32 %v10529_v24, %v63_v4  ;;  %v682_v4 = vld [vmem:[%s12328_s5 + $0x8] sm:$0xff]  ;;  %v692_v24 = vld [vmem:[%s12328_s5 + $0x58] sm:$0xff] }
 0x13d   :  { %v10211_v7 = vpack.c.bf16 %v682_v4, %v681_v3 }
 0x13e   :  { %v78_v32 = vmul.f32 %v8583_v25, %v71_v27  ;;  %v695_v25 = vld [vmem:[%s12328_s5 + $0x70] sm:$0xff]  ;;  %v10226_v27 = vpack.c.bf16 %v692_v24, %v691_v23 }
 0x13f   :  { %v10232_v28 = vpack.c.bf16 %v696_v26, %v695_v25 }
 0x140   :  { %v10799_v36 = vadd.f32 %v8584_v31, %v78_v32 }
 0x142   :  { %9283 = vmatmul.mubr.msk.f32.vlgmr.msra.gmra.mrb[0].mxu0 %vm57_vm0, %v10799_v36  ;;  %9294 = vmatmul.mubr.msk.f32.vlgmr.msra.gmra.mrb[0].mxu1 %vm57_vm0, %v10799_v36 }
 0x143   :  { %10176 = vmatpush3.bf16.msra.mxu0 %v10175_v33  ;;  %10182 = vmatpush3.bf16.msra.mxu1 %v10181_v34 }
 0x144   :  { %10177 = vmatprep.subr.bf16.mxu0 %v10644_v12  ;;  %10183 = vmatprep.subr.bf16.mxu1 %v10644_v12 }
 0x145   :  { %9304 = vmatprep.mubr.msk.f32.mxu0 %vm10645_vm1, %v10646_v20  ;;  %9315 = vmatprep.mubr.msk.f32.mxu1 %vm10645_vm1, %v10646_v20 }
 0x147   :  { %10179 = vmatpush3.bf16.msra.mxu0 %v10178_v40  ;;  %10185 = vmatpush3.bf16.msra.mxu1 %v10184_v41 }
 0x148   :  { %10186 = vmatprep.subr.bf16.mxu0 %v10644_v12  ;;  %10192 = vmatprep.subr.bf16.mxu1 %v10644_v12 }
 0x14a   :  { %9305 = vmatmul.mubr.msk.f32.vlgmr.msra.gmra.mrb[2].mxu0 %vm57_vm0, %v10799_v36  ;;  %9316 = vmatmul.mubr.msk.f32.vlgmr.msra.gmra.mrb[2].mxu1 %vm57_vm0, %v10799_v36 }
 0x14b   :  { %10188 = vmatpush3.bf16.msra.mxu0 %v10187_v46  ;;  %10194 = vmatpush3.bf16.msra.mxu1 %v10193_v47 }
 0x14c   :  { %10189 = vmatprep.subr.bf16.mxu0 %v10644_v12  ;;  %10195 = vmatprep.subr.bf16.mxu1 %v10644_v12 }
 0x14d   :  { %9326 = vmatprep.mubr.msk.f32.mxu0 %vm10645_vm1, %v10646_v20  ;;  %9337 = vmatprep.mubr.msk.f32.mxu1 %vm10645_vm1, %v10646_v20 }
 0x14f   :  { %10191 = vmatpush3.bf16.msra.mxu0 %v10190_v52  ;;  %10197 = vmatpush3.bf16.msra.mxu1 %v10196_v53 }
 0x150   :  { %10198 = vmatprep.subr.bf16.mxu0 %v10644_v12  ;;  %10204 = vmatprep.subr.bf16.mxu1 %v10644_v12 }
 0x152   :  { %9327 = vmatmul.mubr.msk.f32.vlgmr.msra.gmra.mrb[4].mxu0 %vm57_vm0, %v10799_v36  ;;  %9338 = vmatmul.mubr.msk.f32.vlgmr.msra.gmra.mrb[4].mxu1 %vm57_vm0, %v10799_v36 }
 0x153   :  { %10200 = vmatpush3.bf16.msra.mxu0 %v10199_v58  ;;  %10206 = vmatpush3.bf16.msra.mxu1 %v10205_v59 }
 0x154   :  { %10201 = vmatprep.subr.bf16.mxu0 %v10644_v12  ;;  %10207 = vmatprep.subr.bf16.mxu1 %v10644_v12 }
 0x155   :  { %9348 = vmatprep.mubr.msk.f32.mxu0 %vm10645_vm1, %v10646_v20  ;;  %9359 = vmatprep.mubr.msk.f32.mxu1 %vm10645_vm1, %v10646_v20 }
 0x157   :  { %10203 = vmatpush3.bf16.msra.mxu0 %v10202_v1  ;;  %10209 = vmatpush3.bf16.msra.mxu1 %v10208_v2 }
 0x158   :  { %10210 = vmatprep.subr.bf16.mxu0 %v10644_v12  ;;  %10216 = vmatprep.subr.bf16.mxu1 %v10644_v12 }
 0x15a   :  { %9349 = vmatmul.mubr.msk.f32.vlgmr.msra.gmra.mrb[6].mxu0 %vm57_vm0, %v10799_v36  ;;  %9360 = vmatmul.mubr.msk.f32.vlgmr.msra.gmra.mrb[6].mxu1 %vm57_vm0, %v10799_v36 }
 0x15b   :  { %10212 = vmatpush3.bf16.msra.mxu0 %v10211_v7  ;;  %10218 = vmatpush3.bf16.msra.mxu1 %v10217_v8 }
 0x15c   :  { %10213 = vmatprep.subr.bf16.mxu0 %v10644_v12  ;;  %10219 = vmatprep.subr.bf16.mxu1 %v10644_v12 }
 0x15d   :  { %9370 = vmatprep.mubr.msk.f32.mxu0 %vm10645_vm1, %v10646_v20  ;;  %9381 = vmatprep.mubr.msk.f32.mxu1 %vm10645_vm1, %v10646_v20 }
 0x15f   :  { %10215 = vmatpush3.bf16.msra.mxu0 %v10214_v14  ;;  %10221 = vmatpush3.bf16.msra.mxu1 %v10220_v15 }
 0x160   :  { %10222 = vmatprep.subr.bf16.mxu0 %v10644_v12  ;;  %10228 = vmatprep.subr.bf16.mxu1 %v10644_v12 }
 0x162   :  { %9371 = vmatmul.mubr.msk.f32.vlgmr.msra.gmra.mrb[8].mxu0 %vm57_vm0, %v10799_v36  ;;  %9382 = vmatmul.mubr.msk.f32.vlgmr.msra.gmra.mrb[8].mxu1 %vm57_vm0, %v10799_v36 }
 0x163   :  { %10224 = vmatpush3.bf16.msra.mxu0 %v10223_v21  ;;  %10230 = vmatpush3.bf16.msra.mxu1 %v10229_v22 }
 0x164   :  { %10225 = vmatprep.subr.bf16.mxu0 %v10644_v12  ;;  %10231 = vmatprep.subr.bf16.mxu1 %v10644_v12 }
 0x165   :  { %9392 = vmatprep.mubr.msk.f32.mxu0 %vm10645_vm1, %v10646_v20  ;;  %9403 = vmatprep.mubr.msk.f32.mxu1 %vm10645_vm1, %v10646_v20 }
 0x167   :  { %10227 = vmatpush3.bf16.msra.mxu0 %v10226_v27  ;;  %10233 = vmatpush3.bf16.msra.mxu1 %v10232_v28 }
 0x168   :  { %9406 = vmatprep.subr.mxu0 %v10646_v20  ;;  %9421 = vmatprep.subr.mxu1 %v10646_v20 }
 0x16a   :  { %9393 = vmatmul.mubr.msk.f32.vlgmr.msra.gmra.mrb[10].mxu0 %vm57_vm0, %v10799_v36  ;;  %9404 = vmatmul.mubr.msk.f32.vlgmr.msra.gmra.mrb[10].mxu1 %vm57_vm0, %v10799_v36 }
 0x16b   :  { %9408 = vmatprep.mubr.msk.f32.mxu0 %vm10645_vm1, %v10646_v20  ;;  %9423 = vmatprep.mubr.msk.f32.mxu1 %vm10645_vm1, %v10646_v20 }
 0x215   :  { %v171_v29 = vpop.f32.mrb[0].mxu0  ;;  %v241_v30 = vpop.f32.mrb[0].mxu1 }
 0x216   :  { %v9284_v31 = vpop.f32.mrb[1].mxu0  ;;  %v9295_v32 = vpop.f32.mrb[1].mxu1 }
 0x21d   :  { %v311_v33 = vpop.f32.mrb[2].mxu0  ;;  %v381_v34 = vpop.f32.mrb[2].mxu1 }
 0x21e   :  { %v9306_v35 = vpop.f32.mrb[3].mxu0  ;;  %v9317_v37 = vpop.f32.mrb[3].mxu1 }
 0x225   :  { %v467_v38 = vpop.f32.mrb[4].mxu0  ;;  %v537_v39 = vpop.f32.mrb[4].mxu1 }
 0x226   :  { %v9328_v40 = vpop.f32.mrb[5].mxu0  ;;  %v9339_v41 = vpop.f32.mrb[5].mxu1  ;;  %9407 = vmatpush3.xpose.msk.msra.mxu0 %vm977_vm2, %v467_v38 }
 0x227   :  { %9411 = vmatprep.subr.mxu0 %v10646_v20  ;;  %v1622_v41 = vld [vmem:[%s12329_s6] sm:$0xff] }
 0x229   :  { %9409 = vmatmul.mubr.msk.f32.vlgmr.msra.gmra.mrb[12].mxu0 %vm977_vm2, %v171_v29 }
 0x22a   :  { %9412 = vmatpush3.xpose.msk.msra.mxu0 %vm977_vm2, %v537_v39  ;;  %9413 = vmatprep.mubr.msk.f32.mxu0 %vm10645_vm1, %v10646_v20 }
 0x22b   :  { %9416 = vmatprep.subr.mxu0 %v10646_v20 }
 0x22d   :  { %v607_v36 = vpop.f32.mrb[6].mxu0  ;;  %v677_v42 = vpop.f32.mrb[6].mxu1  ;;  %9414 = vmatmul.mubr.msk.f32.vlgmr.msra.gmra.mrb[14].mxu0 %vm977_vm2, %v241_v30 }
 0x22e   :  { %v9350_v43 = vpop.f32.mrb[7].mxu0  ;;  %v9361_v44 = vpop.f32.mrb[7].mxu1  ;;  %9417 = vmatpush3.xpose.msk.msra.mxu0 %vm977_vm2, %v607_v36  ;;  %9422 = vmatpush3.xpose.msk.msra.mxu1 %vm977_vm2, %v677_v42  ;;  %v1623_v36 = vld [vmem:[%s12329_s6 + $0x8] sm:$0xff]  ;;  %v1624_v42 = vld [vmem:[%s12329_s6 + $0x10] sm:$0xff] }
 0x22f   :  { %9418 = vmatprep.mubr.msk.f32.mxu0 %vm10645_vm1, %v10646_v20  ;;  %9426 = vmatprep.subr.mxu0 %v10646_v20 }
 0x230   :  { %9431 = vmatprep.subr.mxu1 %v10646_v20 }
 0x231   :  { %9419 = vmatmul.mubr.msk.f32.vlgmr.msra.gmra.mrb[16].mxu0 %vm977_vm2, %v311_v33  ;;  %9424 = vmatmul.mubr.msk.f32.vlgmr.msra.gmra.mrb[12].mxu1 %vm977_vm2, %v381_v34 }
 0x232   :  { %9428 = vmatprep.mubr.msk.f32.mxu0 %vm10645_vm1, %v10646_v20  ;;  %9433 = vmatprep.mubr.msk.f32.mxu1 %vm10645_vm1, %v10646_v20 }
 0x235   :  { %v763_v45 = vpop.f32.mrb[8].mxu0  ;;  %v833_v46 = vpop.f32.mrb[8].mxu1 }
 0x236   :  { %v9372_v47 = vpop.f32.mrb[9].mxu0  ;;  %v9383_v48 = vpop.f32.mrb[9].mxu1  ;;  %9427 = vmatpush3.msra.mxu0 %v763_v45  ;;  %9432 = vmatpush3.msra.mxu1 %v833_v46  ;;  %v1625_v45 = vld [vmem:[%s12329_s6 + $0x18] sm:$0xff] }
 0x237   :  { %9436 = vmatprep.subr.mxu0 %v10646_v20  ;;  %9441 = vmatprep.subr.mxu1 %v10646_v20 }
 0x23d   :  { %v10996_v49 = vpop.f32.mrb[10].mxu0  ;;  %v10998_v50 = vpop.f32.mrb[10].mxu1 }
 0x23e   :  { %v9394_v51 = vpop.f32.mrb[11].mxu0  ;;  %v9405_v52 = vpop.f32.mrb[11].mxu1 }
 0x2fc   :  { %v1050_v53 = vpop.f32.mrb[12].mxu0 }
 0x2fd   :  { %v1282_v54 = vmul.f32 0.35355338, %v1050_v53  ;;  %v9410_v55 = vpop.f32.mrb[13].mxu0 }
 0x2ff   :  { %v1286_v56 = vsel %vm977_vm2, %v1282_v54, -inf }
 0x300   :  { %1287 = vmax.xlane.f32.xlu1 %v1286_v56  ;;  %v1126_v57 = vpop.f32.mrb[14].mxu0 }
 0x301   :  { %v1283_v58 = vmul.f32 0.35355338, %v1126_v57  ;;  %v9415_v59 = vpop.f32.mrb[15].mxu0 }
 0x303   :  { %v1289_v60 = vsel %vm977_vm2, %v1283_v58, -inf }
 0x304   :  { %v1278_v61 = vpop.f32.mrb[12].mxu1  ;;  %1290 = vmax.xlane.f32.xlu1 %v1289_v60  ;;  %v1202_v62 = vpop.f32.mrb[16].mxu0 }
 0x305   :  { %v1285_v63 = vmul.f32 0.35355338, %v1278_v61  ;;  %v1284_v1 = vmul.f32 0.35355338, %v1202_v62  ;;  %v9420_v2 = vpop.f32.mrb[17].mxu0  ;;  %v9425_v3 = vpop.f32.mrb[13].mxu1 }
 0x306   :  { %v8613_v3 = vld [vmem:[%s12330_s7] ss:$0 sm:$0xff] }
 0x307   :  { %v1295_v4 = vsel %vm977_vm2, %v1285_v63, -inf  ;;  %v1292_v5 = vsel %vm977_vm2, %v1284_v1, -inf }
 0x308   :  { %1296 = vmax.xlane.f32.xlu1 %v1295_v4  ;;  %1293 = vmax.xlane.f32.xlu0 %v1292_v5 }
 0x38d   :  { %v1288_v6 = vpop.xlane.xlu1 %1287 }
 0x38e   :  { %v1298_v7 = vsub.f32 %v1282_v54, %v1288_v6 }
 0x390   :  { %v1302_v8 = vmul.f32 1.442695, %v1298_v7 }
 0x391   :  { %v1291_v9 = vpop.xlane.xlu1 %1290 }
 0x392   :  { %10530 = vpow2.f32 %v1302_v8  ;;  %v1299_v10 = vsub.f32 %v1283_v58, %v1291_v9 }
 0x394   :  { %v1304_v11 = vmul.f32 1.442695, %v1299_v10 }
 0x395   :  { %v1297_v13 = vpop.xlane.xlu1 %1296  ;;  %v1294_v14 = vpop.xlane.xlu0 %1293 }
 0x396   :  { %10532 = vpow2.f32 %v1304_v11  ;;  %v1301_v15 = vsub.f32 %v1285_v63, %v1297_v13  ;;  %v1300_v16 = vsub.f32 %v1284_v1, %v1294_v14  ;;  %v1963_v14 = vld [vmem:[%s12333_s10] sm:$0xff] }
 0x398   :  { %v1308_v17 = vmul.f32 1.442695, %v1301_v15  ;;  %v1306_v18 = vmul.f32 1.442695, %v1300_v16  ;;  %v1965_v16 = vld [vmem:[%s12333_s10 + $0x10] sm:$0xff] }
 0x39a   :  { %10534 = vpow2.f32 %v1308_v17  ;;  %v1966_v17 = vld [vmem:[%s12333_s10 + $0x18] sm:$0xff] }
 0x39b   :  { %10536 = vpow2.f32 %v1306_v18  ;;  %v10238_v18 = vpack.c.bf16 %v1966_v17, %v1965_v16 }
 0x39c   :  { %v10531_v19 = vpop.eup %10530 }
 0x39d   :  { %v1310_v21 = vsel %vm977_vm2, %v10531_v19, 0.0 }
 0x39e   :  { %1311 = vadd.xlane.f32.xlu0 %v1310_v21 }
 0x3a0   :  { %v10533_v22 = vpop.eup %10532 }
 0x3a1   :  { %v1313_v23 = vsel %vm977_vm2, %v10533_v22, 0.0 }
 0x3a2   :  { %1314 = vadd.xlane.f32.xlu1 %v1313_v23 }
 0x3a4   :  { %v10535_v24 = vpop.eup %10534 }
 0x3a5   :  { %v10537_v25 = vpop.eup %10536  ;;  %v1319_v26 = vsel %vm977_vm2, %v10535_v24, 0.0 }
 0x3a6   :  { %1320 = vadd.xlane.f32.xlu1 %v1319_v26  ;;  %v1316_v27 = vsel %vm977_vm2, %v10537_v25, 0.0  ;;  %v8615_v26 = vld [vmem:[%s12332_s9] ss:$0 sm:$0xff] }
 0x3a7   :  { %1317 = vadd.xlane.f32.xlu0 %v1316_v27 }
 0x42b   :  { %v1312_v28 = vpop.xlane.xlu0 %1311 }
 0x42c   :  { %10538 = vrcp.f32 %v1312_v28 }
 0x42f   :  { %v1315_v29 = vpop.xlane.xlu1 %1314 }
 0x430   :  { %10540 = vrcp.f32 %v1315_v29  ;;  %v2077_v29 = vld [vmem:[%s12335_s12] sm:$0xff] }
 0x433   :  { %v1321_v30 = vpop.xlane.xlu1 %1320 }
 0x434   :  { %10542 = vrcp.f32 %v1321_v30  ;;  %v1318_v31 = vpop.xlane.xlu0 %1317  ;;  %v2078_v30 = vld [vmem:[%s12335_s12 + $0x8] sm:$0xff] }
 0x435   :  { %10544 = vrcp.f32 %v1318_v31  ;;  %v10241_v31 = vpack.c.bf16 %v2078_v30, %v2077_v29  ;;  %v8627_v29 = vld [vmem:[%s12326_s3 + $0x90] sm:$0xff]  ;;  %v8628_v30 = vld [vmem:[%s12326_s3 + $0x98] sm:$0xff] }
 0x436   :  { %v10539_v32 = vpop.eup %10538 }
 0x437   :  { %v1326_v33 = vmul.f32 %v10539_v32, %v10531_v19  ;;  %v2079_v32 = vld [vmem:[%s12335_s12 + $0x10] sm:$0xff] }
 0x439   :  { %9429 = vmatmul.mubr.msk.f32.vlgmr.msra.gmra.mrb[18].mxu0 %vm977_vm2, %v1326_v33  ;;  %v2080_v33 = vld [vmem:[%s12335_s12 + $0x18] sm:$0xff] }
 0x43a   :  { %v10541_v34 = vpop.eup %10540  ;;  %9437 = vmatpush3.msra.mxu0 %v10996_v49  ;;  %9438 = vmatprep.mubr.msk.f32.mxu0 %vm10645_vm1, %v10646_v20 }
 0x43b   :  { %v1327_v35 = vmul.f32 %v10541_v34, %v10533_v22  ;;  %9446 = vmatprep.subr.mxu0 %v10646_v20  ;;  %v10244_v34 = vpack.c.bf16 %v2080_v33, %v2079_v32  ;;  %v10256_v32 = vpack.c.bf16 %v8628_v30, %v8627_v29  ;;  %v8636_v33 = vld [vmem:[%s12326_s3 + $0xd8] sm:$0xff] }
 0x43d   :  { %9434 = vmatmul.mubr.msk.f32.vlgmr.msra.gmra.mrb[14].mxu1 %vm977_vm2, %v1327_v35  ;;  %v2081_v35 = vld [vmem:[%s12335_s12 + $0x20] sm:$0xff] }
 0x43e   :  { %v10543_v37 = vpop.eup %10542  ;;  %9442 = vmatpush3.msra.mxu1 %v10998_v50  ;;  %9443 = vmatprep.mubr.msk.f32.mxu1 %vm10645_vm1, %v10646_v20 }
 0x43f   :  { %v10545_v38 = vpop.eup %10544  ;;  %v1329_v39 = vmul.f32 %v10543_v37, %v10535_v24  ;;  %9451 = vmatprep.subr.mxu1 %v10646_v20  ;;  %v8614_v24 = vld [vmem:[%s12331_s8] ss:$0 sm:$0xff]  ;;  %v2082_v37 = vld [vmem:[%s12335_s12 + $0x28] sm:$0xff] }
 0x440   :  { %v1328_v40 = vmul.f32 %v10545_v38, %v10537_v25  ;;  %v10247_v38 = vpack.c.bf16 %v2082_v37, %v2081_v35 }
 0x441   :  { %9444 = vmatmul.mubr.msk.f32.vlgmr.msra.gmra.mrb[16].mxu1 %vm977_vm2, %v1329_v39  ;;  %v2083_v39 = vld [vmem:[%s12335_s12 + $0x30] sm:$0xff] }
 0x442   :  { %9439 = vmatmul.mubr.msk.f32.vlgmr.msra.gmra.mrb[20].mxu0 %vm977_vm2, %v1328_v40  ;;  %9453 = vmatprep.mubr.msk.f32.mxu1 %vm10645_vm1, %v10646_v20  ;;  %v2084_v40 = vld [vmem:[%s12335_s12 + $0x38] sm:$0xff] }
 0x443   :  { %9448 = vmatprep.mubr.msk.f32.mxu0 %vm10645_vm1, %v10646_v20  ;;  %9447 = vmatpush3.msra.mxu0 %v1622_v41  ;;  %v10250_v41 = vpack.c.bf16 %v2084_v40, %v2083_v39  ;;  %v8623_v40 = vld [vmem:[%s12324_s1 + $0x1] ss:$0 sm:$0xff] }
 0x444   :  { %9456 = vmatprep.subr.mxu0 %v10646_v20  ;;  %9452 = vmatpush3.msra.mxu1 %v1623_v36  ;;  %v8616_v36 = vld [vmem:[%s12334_s11] ss:$0 sm:$0xff] }
 0x445   :  { %9461 = vmatprep.subr.mxu1 %v10646_v20 }
 0x50c   :  { %v1399_v43 = vpop.f32.mrb[18].mxu0 }
 0x50d   :  { %v9430_v44 = vpop.f32.mrb[19].mxu0  ;;  %9449 = vmatmul.mubr.msk.f32.vlgmr.msra.gmra.mrb[22].mxu0 %vm977_vm2, %v1399_v43 }
 0x50e   :  { %9457 = vmatpush3.msra.mxu0 %v1624_v42  ;;  %9458 = vmatprep.mubr.msk.f32.mxu0 %vm10645_vm1, %v10646_v20 }
 0x50f   :  { %10234 = vmatprep.subr.bf16.mxu0 %v10644_v12 }
 0x510   :  { %v1472_v46 = vpop.f32.mrb[14].mxu1 }
 0x511   :  { %v9435_v47 = vpop.f32.mrb[15].mxu1  ;;  %9454 = vmatmul.mubr.msk.f32.vlgmr.msra.gmra.mrb[18].mxu1 %vm977_vm2, %v1472_v46 }
 0x512   :  { %9462 = vmatpush3.msra.mxu1 %v1625_v45  ;;  %9463 = vmatprep.mubr.msk.f32.mxu1 %vm10645_vm1, %v10646_v20 }
 0x513   :  { %10240 = vmatprep.subr.bf16.mxu1 %v10644_v12 }
 0x514   :  { %v1618_v48 = vpop.f32.mrb[16].mxu1 }
 0x515   :  { %v1545_v49 = vpop.f32.mrb[20].mxu0  ;;  %v9445_v50 = vpop.f32.mrb[17].mxu1  ;;  %9464 = vmatmul.mubr.msk.f32.vlgmr.msra.gmra.mrb[20].mxu1 %vm977_vm2, %v1618_v48 }
 0x516   :  { %v9440_v51 = vpop.f32.mrb[21].mxu0  ;;  %9459 = vmatmul.mubr.msk.f32.vlgmr.msra.gmra.mrb[24].mxu0 %vm977_vm2, %v1545_v49  ;;  %9493 = vmatprep.mubr.msk.f32.mxu1 %vm10645_vm1, %v10646_v20 }
 0x517   :  { %9474 = vmatprep.mubr.msk.f32.mxu0 %vm10645_vm1, %v10646_v20  ;;  %10242 = vmatpush3.bf16.msra.mxu1 %v10241_v31  ;;  %v8635_v31 = vld [vmem:[%s12326_s3 + $0xd0] sm:$0xff] }
 0x518   :  { %10243 = vmatprep.subr.bf16.mxu1 %v10644_v12 }
 0x51b   :  { %10245 = vmatpush3.bf16.msra.mxu1 %v10244_v34  ;;  %v10268_v34 = vpack.c.bf16 %v8636_v33, %v8635_v31  ;;  %v8669_v31 = vld [vmem:[%s12328_s5 + $0xa0] sm:$0xff] }
 0x51c   :  { %10246 = vmatprep.subr.bf16.mxu1 %v10644_v12 }
 0x51f   :  { %10248 = vmatpush3.bf16.msra.mxu1 %v10247_v38 }
 0x520   :  { %10249 = vmatprep.subr.bf16.mxu1 %v10644_v12 }
 0x523   :  { %10251 = vmatpush3.bf16.msra.mxu1 %v10250_v41  ;;  %v8629_v41 = vld [vmem:[%s12326_s3 + $0xa0] sm:$0xff] }
 0x524   :  { %10264 = vmatprep.subr.bf16.mxu1 %v10644_v12 }
 0x5e0   :  { %v1695_v52 = vpop.f32.mrb[22].mxu0 }
 0x5e1   :  { %v9450_v53 = vpop.f32.mrb[23].mxu0  ;;  %v1918_v55 = vsel %vm57_vm0, %v1695_v52, 0.0 }
 0x5e4   :  { %v1768_v54 = vpop.f32.mrb[18].mxu1 }
 0x5e5   :  { %v1919_v56 = vsel %vm57_vm0, %v1768_v54, 0.0  ;;  %v9455_v57 = vpop.f32.mrb[19].mxu1 }
 0x5e6   :  { %v1920_v58 = vadd.f32 %v1919_v56, %v1918_v55 }
 0x5e8   :  { %v1914_v59 = vpop.f32.mrb[20].mxu1 }
 0x5e9   :  { %v1841_v60 = vpop.f32.mrb[24].mxu0  ;;  %v9465_v61 = vpop.f32.mrb[21].mxu1  ;;  %v1923_v2 = vsel %vm57_vm0, %v1914_v59, 0.0 }
 0x5ea   :  { %v1921_v62 = vsel %vm57_vm0, %v1841_v60, 0.0  ;;  %v9460_v63 = vpop.f32.mrb[25].mxu0 }
 0x5eb   :  { %v1922_v1 = vadd.f32 %v1921_v62, %v1920_v58 }
 0x5ed   :  { %v1924_v4 = vadd.f32 %v1923_v2, %v1922_v1 }
 0x5ef   :  { %v1932_v5 = vadd.f32 %v8613_v3, %v1924_v4 }
 0x5f1   :  { %v11060_v6 = vadd.f32 %v1932_v5, %v10738_v0  ;;  %v1964_v0 = vld [vmem:[%s12333_s10 + $0x8] sm:$0xff] }
 0x5f2   :  { %v10235_v15 = vpack.c.bf16 %v1964_v0, %v1963_v14 }
 0x5f3   :  { %v1936_v7 = vsel %vm57_vm0, %v11060_v6, 0.0 }
 0x5f4   :  { %1937 = vadd.xlane.f32.xlu0 %v1936_v7  ;;  %10236 = vmatpush3.bf16.msra.mxu0 %v10235_v15 }
 0x5f5   :  { %10237 = vmatprep.subr.bf16.mxu0 %v10644_v12 }
 0x5f8   :  { %10239 = vmatpush3.bf16.msra.mxu0 %v10238_v18 }
 0x5f9   :  { %10252 = vmatprep.subr.bf16.mxu0 %v10644_v12 }
 0x681   :  { %v1938_v8 = vpop.xlane.xlu0 %1937 }
 0x682   :  { %v1939_v9 = vmul.f32 0.03125, %v1938_v8 }
 0x684   :  { %v1940_v10 = vsub.f32 %v11060_v6, %v1939_v9 }
 0x686   :  { %v1941_v11 = vmul.f32 %v1940_v10, %v1940_v10 }
 0x688   :  { %v1942_v13 = vsel %vm57_vm0, %v1941_v11, 0.0 }
 0x689   :  { %1943 = vadd.xlane.f32.xlu1 %v1942_v13  ;;  %v8619_v13 = vld [vmem:[%s12336_s13] ss:$0 sm:$0xff] }
 0x716   :  { %v1944_v19 = vpop.xlane.xlu1 %1943 }
 0x717   :  { %v1945_v21 = vmul.f32 0.03125, %v1944_v19 }
 0x719   :  { %v1946_v22 = vadd.f32 1e-05, %v1945_v21 }
 0x71b   :  { %10546 = vrsqrt.f32 %v1946_v22 }
 0x725   :  { %v10547_v23 = vpop.eup %10546 }
 0x726   :  { %v1948_v25 = vmul.f32 %v10547_v23, %v1940_v10 }
 0x728   :  { %v1955_v27 = vmul.f32 %v8614_v24, %v1948_v25  ;;  %v8625_v24 = vld [vmem:[%s12326_s3 + $0x80] sm:$0xff] }
 0x729   :  { %v8633_v25 = vld [vmem:[%s12326_s3 + $0xc0] sm:$0xff] }
 0x72a   :  { %v1962_v28 = vadd.f32 %v8615_v26, %v1955_v27  ;;  %v8634_v27 = vld [vmem:[%s12326_s3 + $0xc8] sm:$0xff] }
 0x72c   :  { %9475 = vmatmul.mubr.msk.f32.vlgmr.msra.gmra.mrb[26].mxu0 %vm57_vm0, %v1962_v28  ;;  %v10265_v28 = vpack.c.bf16 %v8634_v27, %v8633_v25  ;;  %v8659_v25 = vld [vmem:[%s12327_s4 + $0xf0] sm:$0xff] }
 0x72d   :  { %9504 = vmatprep.mubr.msk.f32.mxu0 %vm10645_vm1, %v10646_v20  ;;  %v8675_v27 = vld [vmem:[%s12328_s5 + $0xd0] sm:$0xff] }
 0x7ff   :  { %v2043_v42 = vpop.f32.mrb[26].mxu0 }
 0x800   :  { %v2044_v43 = vadd.f32 %v8616_v36, %v2043_v42  ;;  %v9476_v44 = vpop.f32.mrb[27].mxu0  ;;  %v8630_v42 = vld [vmem:[%s12326_s3 + $0xa8] sm:$0xff] }
 0x801   :  { %v8646_v44 = vld [vmem:[%s12327_s4 + $0x88] sm:$0xff] }
 0x802   :  { %v2048_v45 = vmul.f32 0.70710677, %v2044_v43  ;;  %v2047_v9 = vmul.f32 0.5, %v2044_v43  ;;  %v8645_v43 = vld [vmem:[%s12327_s4 + $0x80] sm:$0xff] }
 0x804   :  { %v8618_v46 = vclamps-f32 %v2048_v45, 4.0  ;;  %v8624_v45 = vld [vmem:[%s12325_s2 + $0x1] ss:$0 sm:$0xff] }
 0x806   :  { %v2051_v47 = vmul.f32 %v8618_v46, %v8618_v46 }
 0x808   :  { %v2052_v48 = vmul.f32 -2.7261424e-10, %v2051_v47  ;;  %v2065_v49 = vmul.f32 -1.45660715e-05, %v2051_v47 }
 0x80a   :  { %v2053_v50 = vadd.f32 2.7706815e-08, %v2052_v48  ;;  %v2066_v51 = vadd.f32 -0.00021337405, %v2065_v49  ;;  %v10277_v48 = vpack.c.bf16 %v8646_v44, %v8645_v43  ;;  %v8631_v49 = vld [vmem:[%s12326_s3 + $0xb0] sm:$0xff] }
 0x80c   :  { %v2054_v52 = vmul.f32 %v2053_v50, %v2051_v47  ;;  %v2067_v53 = vmul.f32 %v2066_v51, %v2051_v47  ;;  %v8632_v51 = vld [vmem:[%s12326_s3 + $0xb8] sm:$0xff] }
 0x80e   :  { %v2055_v54 = vadd.f32 -2.101024e-06, %v2054_v52  ;;  %v2068_v55 = vadd.f32 -0.001682827, %v2067_v53  ;;  %v8647_v52 = vld [vmem:[%s12327_s4 + $0x90] sm:$0xff]  ;;  %v8648_v53 = vld [vmem:[%s12327_s4 + $0x98] sm:$0xff] }
 0x810   :  { %v2056_v56 = vmul.f32 %v2055_v54, %v2051_v47  ;;  %v2069_v57 = vmul.f32 %v2068_v55, %v2051_v47  ;;  %v10262_v54 = vpack.c.bf16 %v8632_v51, %v8631_v49  ;;  %v10280_v55 = vpack.c.bf16 %v8648_v53, %v8647_v52 }
 0x812   :  { %v2057_v58 = vadd.f32 -5.6925062e-05, %v2056_v56  ;;  %v2070_v59 = vadd.f32 -0.0073733293, %v2069_v57  ;;  %v8637_v56 = vld [vmem:[%s12326_s3 + $0xe0] sm:$0xff]  ;;  %v8638_v57 = vld [vmem:[%s12326_s3 + $0xe8] sm:$0xff] }
 0x814   :  { %v2058_v60 = vmul.f32 %v2057_v58, %v2051_v47  ;;  %v2071_v61 = vmul.f32 %v2070_v59, %v2051_v47  ;;  %v8653_v58 = vld [vmem:[%s12327_s4 + $0xc0] sm:$0xff]  ;;  %v8654_v59 = vld [vmem:[%s12327_s4 + $0xc8] sm:$0xff] }
 0x816   :  { %v2059_v62 = vadd.f32 -0.00073499064, %v2058_v60  ;;  %v2072_v63 = vadd.f32 -0.014264739, %v2071_v61  ;;  %v10271_v60 = vpack.c.bf16 %v8638_v57, %v8637_v56  ;;  %v10289_v61 = vpack.c.bf16 %v8654_v59, %v8653_v58 }
 0x818   :  { %v2060_v1 = vmul.f32 %v2059_v62, %v2051_v47  ;;  %10548 = vrcp.f32 %v2072_v63  ;;  %v8639_v62 = vld [vmem:[%s12326_s3 + $0xf0] sm:$0xff]  ;;  %v8640_v63 = vld [vmem:[%s12326_s3 + $0xf8] sm:$0xff] }
 0x81a   :  { %v2061_v2 = vadd.f32 -0.0029546, %v2060_v1  ;;  %v8655_v1 = vld [vmem:[%s12327_s4 + $0xd0] sm:$0xff] }
 0x81c   :  { %v2062_v3 = vmul.f32 %v2061_v2, %v2051_v47  ;;  %v10259_v47 = vpack.c.bf16 %v8630_v42, %v8629_v41  ;;  %v8656_v2 = vld [vmem:[%s12327_s4 + $0xd8] sm:$0xff]  ;;  %v8679_v41 = vld [vmem:[%s12328_s5 + $0xf0] sm:$0xff] }
 0x81e   :  { %v2063_v4 = vadd.f32 -0.016096033, %v2062_v3  ;;  %v10274_v3 = vpack.c.bf16 %v8640_v63, %v8639_v62 }
 0x820   :  { %v2064_v5 = vmul.f32 %v8618_v46, %v2063_v4  ;;  %v10292_v4 = vpack.c.bf16 %v8656_v2, %v8655_v1 }
 0x822   :  { %v10549_v7 = vpop.eup %10548 }
 0x823   :  { %v2074_v8 = vmul.f32 %v10549_v7, %v2064_v5  ;;  %v8649_v5 = vld [vmem:[%s12327_s4 + $0xa0] sm:$0xff]  ;;  %v8650_v7 = vld [vmem:[%s12327_s4 + $0xa8] sm:$0xff] }
 0x825   :  { %v2075_v10 = vadd.f32 1.0, %v2074_v8  ;;  %v8665_v8 = vld [vmem:[%s12328_s5 + $0x80] sm:$0xff] }
 0x827   :  { %v2076_v11 = vmul.f32 %v2075_v10, %v2047_v9  ;;  %v8666_v9 = vld [vmem:[%s12328_s5 + $0x88] sm:$0xff]  ;;  %v10283_v10 = vpack.c.bf16 %v8650_v7, %v8649_v5 }
 0x829   :  { %9494 = vmatmul.mubr.msk.f32.vlgmr.msra.gmra.mrb[22].mxu1 %vm2092_vm3, %v2076_v11  ;;  %v10301_v11 = vpack.c.bf16 %v8666_v9, %v8665_v8 }
 0x82a   :  { %9526 = vmatprep.mubr.msk.f32.mxu1 %vm10645_vm1, %v10646_v20  ;;  %10266 = vmatpush3.bf16.msra.mxu1 %v10265_v28  ;;  %v8676_v28 = vld [vmem:[%s12328_s5 + $0xd8] sm:$0xff] }
 0x82b   :  { %10267 = vmatprep.subr.bf16.mxu1 %v10644_v12  ;;  %v10316_v30 = vpack.c.bf16 %v8676_v28, %v8675_v27 }
 0x82e   :  { %10269 = vmatpush3.bf16.msra.mxu1 %v10268_v34  ;;  %v8671_v34 = vld [vmem:[%s12328_s5 + $0xb0] sm:$0xff] }
 0x82f   :  { %10276 = vmatprep.subr.bf16.mxu1 %v10644_v12 }
 0x8fc   :  { %v2162_v14 = vpop.f32.mrb[22].mxu1 }
 0x8fd   :  { %v2163_v0 = vadd.f32 %v8619_v13, %v2162_v14  ;;  %v9495_v15 = vpop.f32.mrb[23].mxu1  ;;  %v8651_v13 = vld [vmem:[%s12327_s4 + $0xb0] sm:$0xff]  ;;  %v8652_v14 = vld [vmem:[%s12327_s4 + $0xb8] sm:$0xff] }
 0x8fe   :  { %v8668_v15 = vld [vmem:[%s12328_s5 + $0x98] sm:$0xff] }
 0x8ff   :  { %v11127_v16 = vadd.f32 %v2163_v0, %v11060_v6  ;;  %v8626_v6 = vld [vmem:[%s12326_s3 + $0x88] sm:$0xff]  ;;  %v8667_v0 = vld [vmem:[%s12328_s5 + $0x90] sm:$0xff] }
 0x900   :  { %v10253_v26 = vpack.c.bf16 %v8626_v6, %v8625_v24 }
 0x901   :  { %v2171_v17 = vsel %vm57_vm0, %v11127_v16, 0.0 }
 0x902   :  { %2172 = vadd.xlane.f32.xlu0 %v2171_v17  ;;  %10254 = vmatpush3.bf16.msra.mxu0 %v10253_v26  ;;  %v10286_v17 = vpack.c.bf16 %v8652_v14, %v8651_v13  ;;  %v8660_v26 = vld [vmem:[%s12327_s4 + $0xf8] sm:$0xff] }
 0x903   :  { %10255 = vmatprep.subr.bf16.mxu0 %v10644_v12  ;;  %v10298_v29 = vpack.c.bf16 %v8660_v26, %v8659_v25 }
 0x906   :  { %10257 = vmatpush3.bf16.msra.mxu0 %v10256_v32  ;;  %v8670_v32 = vld [vmem:[%s12328_s5 + $0xa8] sm:$0xff] }
 0x907   :  { %10258 = vmatprep.subr.bf16.mxu0 %v10644_v12  ;;  %v10307_v33 = vpack.c.bf16 %v8670_v32, %v8669_v31 }
 0x98f   :  { %v2173_v18 = vpop.xlane.xlu0 %2172 }
 0x990   :  { %v2174_v19 = vmul.f32 0.03125, %v2173_v18  ;;  %v10304_v18 = vpack.c.bf16 %v8668_v15, %v8667_v0 }
 0x992   :  { %v2175_v21 = vsub.f32 %v11127_v16, %v2174_v19  ;;  %v8657_v19 = vld [vmem:[%s12327_s4 + $0xe0] sm:$0xff] }
 0x994   :  { %v2176_v22 = vmul.f32 %v2175_v21, %v2175_v21 }
 0x996   :  { %v2177_v23 = vsel %vm57_vm0, %v2176_v22, 0.0  ;;  %v8673_v22 = vld [vmem:[%s12328_s5 + $0xc0] sm:$0xff] }
 0x997   :  { %2178 = vadd.xlane.f32.xlu1 %v2177_v23  ;;  %v8674_v23 = vld [vmem:[%s12328_s5 + $0xc8] sm:$0xff] }
 0x998   :  { %v10313_v6 = vpack.c.bf16 %v8674_v23, %v8673_v22 }
 0xa24   :  { %v2179_v35 = vpop.xlane.xlu1 %2178 }
 0xa25   :  { %v2180_v37 = vmul.f32 0.03125, %v2179_v35  ;;  %v8672_v35 = vld [vmem:[%s12328_s5 + $0xb8] sm:$0xff] }
 0xa27   :  { %v2181_v38 = vadd.f32 1e-05, %v2180_v37  ;;  %v10310_v37 = vpack.c.bf16 %v8672_v35, %v8671_v34 }
 0xa29   :  { %10550 = vrsqrt.f32 %v2181_v38  ;;  %v8677_v38 = vld [vmem:[%s12328_s5 + $0xe0] sm:$0xff] }
 0xa33   :  { %v10551_v39 = vpop.eup %10550 }
 0xa34   :  { %v2183_v36 = vmul.f32 %v10551_v39, %v2175_v21  ;;  %v8658_v21 = vld [vmem:[%s12327_s4 + $0xe8] sm:$0xff] }
 0xa35   :  { %v10295_v24 = vpack.c.bf16 %v8658_v21, %v8657_v19  ;;  %v8678_v39 = vld [vmem:[%s12328_s5 + $0xe8] sm:$0xff] }
 0xa36   :  { %v2190_v46 = vmul.f32 %v8623_v40, %v2183_v36  ;;  %v10319_v40 = vpack.c.bf16 %v8678_v39, %v8677_v38  ;;  %v8680_v36 = vld [vmem:[%s12328_s5 + $0xf8] sm:$0xff] }
 0xa37   :  { %v10322_v42 = vpack.c.bf16 %v8680_v36, %v8679_v41 }
 0xa38   :  { %v11182_v50 = vadd.f32 %v8624_v45, %v2190_v46 }
 0xa3a   :  { %9505 = vmatmul.mubr.msk.f32.vlgmr.msra.gmra.mrb[28].mxu0 %vm57_vm0, %v11182_v50  ;;  %9527 = vmatmul.mubr.msk.f32.vlgmr.msra.gmra.mrb[24].mxu1 %vm57_vm0, %v11182_v50 }
 0xa3b   :  { %10260 = vmatpush3.bf16.msra.mxu0 %v10259_v47  ;;  %10278 = vmatpush3.bf16.msra.mxu1 %v10277_v48 }
 0xa3c   :  { %10261 = vmatprep.subr.bf16.mxu0 %v10644_v12  ;;  %10279 = vmatprep.subr.bf16.mxu1 %v10644_v12 }
 0xa3d   :  { %9515 = vmatprep.mubr.msk.f32.mxu0 %vm10645_vm1, %v10646_v20  ;;  %9548 = vmatprep.mubr.msk.f32.mxu1 %vm10645_vm1, %v10646_v20 }
 0xa3f   :  { %10263 = vmatpush3.bf16.msra.mxu0 %v10262_v54  ;;  %10281 = vmatpush3.bf16.msra.mxu1 %v10280_v55 }
 0xa40   :  { %10270 = vmatprep.subr.bf16.mxu0 %v10644_v12  ;;  %10288 = vmatprep.subr.bf16.mxu1 %v10644_v12 }
 0xa42   :  { %9516 = vmatmul.mubr.msk.f32.vlgmr.msra.gmra.mrb[30].mxu0 %vm57_vm0, %v11182_v50  ;;  %9549 = vmatmul.mubr.msk.f32.vlgmr.msra.gmra.mrb[26].mxu1 %vm57_vm0, %v11182_v50 }
 0xa43   :  { %10272 = vmatpush3.bf16.msra.mxu0 %v10271_v60  ;;  %10290 = vmatpush3.bf16.msra.mxu1 %v10289_v61 }
 0xa44   :  { %10273 = vmatprep.subr.bf16.mxu0 %v10644_v12  ;;  %10291 = vmatprep.subr.bf16.mxu1 %v10644_v12 }
 0xa45   :  { %9537 = vmatprep.mubr.msk.f32.mxu0 %vm10645_vm1, %v10646_v20  ;;  %9570 = vmatprep.mubr.msk.f32.mxu1 %vm10645_vm1, %v10646_v20 }
 0xa47   :  { %10275 = vmatpush3.bf16.msra.mxu0 %v10274_v3  ;;  %10293 = vmatpush3.bf16.msra.mxu1 %v10292_v4 }
 0xa48   :  { %10282 = vmatprep.subr.bf16.mxu0 %v10644_v12  ;;  %10300 = vmatprep.subr.bf16.mxu1 %v10644_v12 }
 0xa4a   :  { %9538 = vmatmul.mubr.msk.f32.vlgmr.msra.gmra.mrb[32].mxu0 %vm57_vm0, %v11182_v50  ;;  %9571 = vmatmul.mubr.msk.f32.vlgmr.msra.gmra.mrb[28].mxu1 %vm57_vm0, %v11182_v50 }
 0xa4b   :  { %10284 = vmatpush3.bf16.msra.mxu0 %v10283_v10  ;;  %10302 = vmatpush3.bf16.msra.mxu1 %v10301_v11 }
 0xa4c   :  { %10285 = vmatprep.subr.bf16.mxu0 %v10644_v12  ;;  %10303 = vmatprep.subr.bf16.mxu1 %v10644_v12 }
 0xa4d   :  { %9559 = vmatprep.mubr.msk.f32.mxu0 %vm10645_vm1, %v10646_v20  ;;  %9592 = vmatprep.mubr.msk.f32.mxu1 %vm10645_vm1, %v10646_v20 }
 0xa4f   :  { %10287 = vmatpush3.bf16.msra.mxu0 %v10286_v17  ;;  %10305 = vmatpush3.bf16.msra.mxu1 %v10304_v18 }
 0xa50   :  { %10294 = vmatprep.subr.bf16.mxu0 %v10644_v12  ;;  %10312 = vmatprep.subr.bf16.mxu1 %v10644_v12 }
 0xa52   :  { %9560 = vmatmul.mubr.msk.f32.vlgmr.msra.gmra.mrb[34].mxu0 %vm57_vm0, %v11182_v50  ;;  %9593 = vmatmul.mubr.msk.f32.vlgmr.msra.gmra.mrb[30].mxu1 %vm57_vm0, %v11182_v50 }
 0xa53   :  { %10296 = vmatpush3.bf16.msra.mxu0 %v10295_v24  ;;  %10314 = vmatpush3.bf16.msra.mxu1 %v10313_v6 }
 0xa54   :  { %10297 = vmatprep.subr.bf16.mxu0 %v10644_v12  ;;  %10315 = vmatprep.subr.bf16.mxu1 %v10644_v12 }
 0xa55   :  { %9581 = vmatprep.mubr.msk.f32.mxu0 %vm10645_vm1, %v10646_v20  ;;  %9614 = vmatprep.mubr.msk.f32.mxu1 %vm10645_vm1, %v10646_v20 }
 0xa57   :  { %10299 = vmatpush3.bf16.msra.mxu0 %v10298_v29  ;;  %10317 = vmatpush3.bf16.msra.mxu1 %v10316_v30 }
 0xa58   :  { %10306 = vmatprep.subr.bf16.mxu0 %v10644_v12  ;;  %9628 = vmatprep.subr.mxu1 %v10646_v20 }
 0xa5a   :  { %9582 = vmatmul.mubr.msk.f32.vlgmr.msra.gmra.mrb[36].mxu0 %vm57_vm0, %v11182_v50  ;;  %9615 = vmatmul.mubr.msk.f32.vlgmr.msra.gmra.mrb[32].mxu1 %vm57_vm0, %v11182_v50 }
 0xa5b   :  { %10308 = vmatpush3.bf16.msra.mxu0 %v10307_v33  ;;  %9603 = vmatprep.mubr.msk.f32.mxu0 %vm10645_vm1, %v10646_v20 }
 0xa5c   :  { %10309 = vmatprep.subr.bf16.mxu0 %v10644_v12  ;;  %9630 = vmatprep.mubr.msk.f32.mxu1 %vm10645_vm1, %v10646_v20 }
 0xa5f   :  { %10311 = vmatpush3.bf16.msra.mxu0 %v10310_v37 }
 0xa60   :  { %10318 = vmatprep.subr.bf16.mxu0 %v10644_v12 }
 0xa62   :  { %9604 = vmatmul.mubr.msk.f32.vlgmr.msra.gmra.mrb[38].mxu0 %vm57_vm0, %v11182_v50 }
 0xa63   :  { %10320 = vmatpush3.bf16.msra.mxu0 %v10319_v40  ;;  %9625 = vmatprep.mubr.msk.f32.mxu0 %vm10645_vm1, %v10646_v20 }
 0xa64   :  { %10321 = vmatprep.subr.bf16.mxu0 %v10644_v12 }
 0xa67   :  { %10323 = vmatpush3.bf16.msra.mxu0 %v10322_v42 }
 0xa68   :  { %9638 = vmatprep.subr.mxu0 %v10646_v20 }
 0xa6a   :  { %9626 = vmatmul.mubr.msk.f32.vlgmr.msra.gmra.mrb[40].mxu0 %vm57_vm0, %v11182_v50 }
 0xa6b   :  { %9640 = vmatprep.mubr.msk.f32.mxu0 %vm10645_vm1, %v10646_v20 }
 0xb0d   :  { %v2284_v43 = vpop.f32.mrb[28].mxu0  ;;  %v2424_v44 = vpop.f32.mrb[24].mxu1 }
 0xb0e   :  { %v9506_v45 = vpop.f32.mrb[29].mxu0  ;;  %v9528_v46 = vpop.f32.mrb[25].mxu1 }
 0xb15   :  { %v2354_v47 = vpop.f32.mrb[30].mxu0  ;;  %v2581_v48 = vpop.f32.mrb[26].mxu1 }
 0xb16   :  { %v9517_v49 = vpop.f32.mrb[31].mxu0  ;;  %v9550_v51 = vpop.f32.mrb[27].mxu1  ;;  %9629 = vmatpush3.xpose.msk.msra.mxu1 %vm977_vm2, %v2581_v48 }
 0xb17   :  { %9633 = vmatprep.subr.mxu1 %v10646_v20 }
 0xb19   :  { %9631 = vmatmul.mubr.msk.f32.vlgmr.msra.gmra.mrb[34].mxu1 %vm977_vm2, %v2284_v43 }
 0xb1a   :  { %9635 = vmatprep.mubr.msk.f32.mxu1 %vm10645_vm1, %v10646_v20 }
 0xb1d   :  { %v2494_v50 = vpop.f32.mrb[32].mxu0  ;;  %v2721_v52 = vpop.f32.mrb[28].mxu1 }
 0xb1e   :  { %v9539_v53 = vpop.f32.mrb[33].mxu0  ;;  %v9572_v54 = vpop.f32.mrb[29].mxu1  ;;  %9639 = vmatpush3.xpose.msk.msra.mxu0 %vm977_vm2, %v2721_v52 }
 0xb1f   :  { %9648 = vmatprep.subr.mxu0 %v10646_v20  ;;  %v8697_v54 = vld [vmem:[%s12329_s6 + $0x20] sm:$0xff] }
 0xb21   :  { %9641 = vmatmul.mubr.msk.f32.vlgmr.msra.gmra.mrb[42].mxu0 %vm977_vm2, %v2424_v44 }
 0xb22   :  { %9650 = vmatprep.mubr.msk.f32.mxu0 %vm10645_vm1, %v10646_v20 }
 0xb25   :  { %v2651_v55 = vpop.f32.mrb[34].mxu0  ;;  %v2878_v56 = vpop.f32.mrb[30].mxu1 }
 0xb26   :  { %v9561_v57 = vpop.f32.mrb[35].mxu0  ;;  %v9594_v58 = vpop.f32.mrb[31].mxu1  ;;  %9634 = vmatpush3.xpose.msk.msra.mxu1 %vm977_vm2, %v2651_v55  ;;  %9649 = vmatpush3.msra.mxu0 %v2878_v56  ;;  %v8698_v55 = vld [vmem:[%s12329_s6 + $0x28] sm:$0xff]  ;;  %v8699_v56 = vld [vmem:[%s12329_s6 + $0x30] sm:$0xff] }
 0xb27   :  { %9643 = vmatprep.subr.mxu1 %v10646_v20  ;;  %9658 = vmatprep.subr.mxu0 %v10646_v20 }
 0xb29   :  { %9636 = vmatmul.mubr.msk.f32.vlgmr.msra.gmra.mrb[36].mxu1 %vm977_vm2, %v2354_v47 }
 0xb2a   :  { %9645 = vmatprep.mubr.msk.f32.mxu1 %vm10645_vm1, %v10646_v20 }
 0xb2d   :  { %v2791_v59 = vpop.f32.mrb[36].mxu0  ;;  %v11373_v60 = vpop.f32.mrb[32].mxu1 }
 0xb2e   :  { %v9583_v61 = vpop.f32.mrb[37].mxu0  ;;  %v9616_v62 = vpop.f32.mrb[33].mxu1  ;;  %9644 = vmatpush3.xpose.msk.msra.mxu1 %vm977_vm2, %v2791_v59 }
 0xb2f   :  { %9653 = vmatprep.subr.mxu1 %v10646_v20  ;;  %v8700_v61 = vld [vmem:[%s12329_s6 + $0x38] sm:$0xff] }
 0xb31   :  { %9646 = vmatmul.mubr.msk.f32.vlgmr.msra.gmra.mrb[38].mxu1 %vm977_vm2, %v2494_v50 }
 0xb32   :  { %9655 = vmatprep.mubr.msk.f32.mxu1 %vm10645_vm1, %v10646_v20 }
 0xb35   :  { %v2948_v63 = vpop.f32.mrb[38].mxu0 }
 0xb36   :  { %v9605_v1 = vpop.f32.mrb[39].mxu0  ;;  %9654 = vmatpush3.msra.mxu1 %v2948_v63 }
 0xb37   :  { %9663 = vmatprep.subr.mxu1 %v10646_v20 }
 0xb3d   :  { %v11381_v2 = vpop.f32.mrb[40].mxu0 }
 0xb3e   :  { %v9627_v3 = vpop.f32.mrb[41].mxu0 }
 0xbec   :  { %v3164_v4 = vpop.f32.mrb[34].mxu1 }
 0xbed   :  { %v3396_v5 = vmul.f32 0.35355338, %v3164_v4  ;;  %v9632_v7 = vpop.f32.mrb[35].mxu1 }
 0xbef   :  { %v3400_v8 = vsel %vm977_vm2, %v3396_v5, -inf }
 0xbf0   :  { %3401 = vmax.xlane.f32.xlu0 %v3400_v8 }
 0xbf4   :  { %v3316_v9 = vpop.f32.mrb[42].mxu0 }
 0xbf5   :  { %v3398_v10 = vmul.f32 0.35355338, %v3316_v9  ;;  %v9642_v11 = vpop.f32.mrb[43].mxu0 }
 0xbf7   :  { %v3406_v13 = vsel %vm977_vm2, %v3398_v10, -inf }
 0xbf8   :  { %3407 = vmax.xlane.f32.xlu0 %v3406_v13 }
 0xbfc   :  { %v3240_v14 = vpop.f32.mrb[36].mxu1 }
 0xbfd   :  { %v3397_v0 = vmul.f32 0.35355338, %v3240_v14  ;;  %v9637_v15 = vpop.f32.mrb[37].mxu1 }
 0xbff   :  { %v3403_v17 = vsel %vm977_vm2, %v3397_v0, -inf }
 0xc00   :  { %3404 = vmax.xlane.f32.xlu1 %v3403_v17 }
 0xc04   :  { %v3392_v18 = vpop.f32.mrb[38].mxu1 }
 0xc05   :  { %v3399_v19 = vmul.f32 0.35355338, %v3392_v18  ;;  %v9647_v21 = vpop.f32.mrb[39].mxu1  ;;  %v8706_v18 = vld [vmem:[%s12330_s7 + $0x1] ss:$0 sm:$0xff] }
 0xc07   :  { %v3409_v22 = vsel %vm977_vm2, %v3399_v19, -inf }
 0xc08   :  { %3410 = vmax.xlane.f32.xlu1 %v3409_v22 }
 0xc7d   :  { %v3402_v23 = vpop.xlane.xlu0 %3401 }
 0xc7e   :  { %v3412_v24 = vsub.f32 %v3396_v5, %v3402_v23 }
 0xc80   :  { %v3416_v6 = vmul.f32 1.442695, %v3412_v24  ;;  %v11448_v24 = vld [vmem:[%s12342_s23 + $0x8] sm:$0xff] }
 0xc82   :  { %10552 = vpow2.f32 %v3416_v6 }
 0xc85   :  { %v3408_v25 = vpop.xlane.xlu0 %3407 }
 0xc86   :  { %v3414_v26 = vsub.f32 %v3398_v10, %v3408_v25  ;;  %v4322_v25 = vsel %vm57_vm0, %v11448_v24, 0.0 }
 0xc88   :  { %v3420_v27 = vmul.f32 1.442695, %v3414_v26 }
 0xc8a   :  { %10554 = vpow2.f32 %v3420_v27 }
 0xc8c   :  { %v10553_v28 = vpop.eup %10552 }
 0xc8d   :  { %v3405_v29 = vpop.xlane.xlu1 %3404  ;;  %v3424_v30 = vsel %vm977_vm2, %v10553_v28, 0.0 }
 0xc8e   :  { %v3413_v31 = vsub.f32 %v3397_v0, %v3405_v29  ;;  %3425 = vadd.xlane.f32.xlu0 %v3424_v30 }
 0xc90   :  { %v3418_v32 = vmul.f32 1.442695, %v3413_v31 }
 0xc92   :  { %10556 = vpow2.f32 %v3418_v32 }
 0xc94   :  { %v10555_v33 = vpop.eup %10554 }
 0xc95   :  { %v3411_v34 = vpop.xlane.xlu1 %3410  ;;  %v3430_v35 = vsel %vm977_vm2, %v10555_v33, 0.0 }
 0xc96   :  { %v3415_v37 = vsub.f32 %v3399_v19, %v3411_v34  ;;  %3431 = vadd.xlane.f32.xlu0 %v3430_v35  ;;  %v8711_v35 = vld [vmem:[%s12333_s10 + $0x20] sm:$0xff] }
 0xc98   :  { %v3422_v38 = vmul.f32 1.442695, %v3415_v37  ;;  %v8712_v37 = vld [vmem:[%s12333_s10 + $0x28] sm:$0xff] }
 0xc9a   :  { %10558 = vpow2.f32 %v3422_v38  ;;  %v10325_v38 = vpack.c.bf16 %v8712_v37, %v8711_v35  ;;  %v4956_v35 = vld [vmem:[%s12328_s5 + $0x60] sm:$0xff]  ;;  %v4957_v37 = vld [vmem:[%s12328_s5 + $0x68] sm:$0xff] }
 0xc9c   :  { %v10557_v39 = vpop.eup %10556 }
 0xc9d   :  { %v3427_v40 = vsel %vm977_vm2, %v10557_v39, 0.0 }
 0xc9e   :  { %3428 = vadd.xlane.f32.xlu1 %v3427_v40  ;;  %v8714_v40 = vld [vmem:[%s12333_s10 + $0x38] sm:$0xff] }
 0xca4   :  { %v10559_v41 = vpop.eup %10558 }
 0xca5   :  { %v3433_v36 = vsel %vm977_vm2, %v10559_v41, 0.0 }
 0xca6   :  { %3434 = vadd.xlane.f32.xlu1 %v3433_v36 }
 0xd1b   :  { %v3426_v42 = vpop.xlane.xlu0 %3425 }
 0xd1c   :  { %10560 = vrcp.f32 %v3426_v42 }
 0xd23   :  { %v3432_v43 = vpop.xlane.xlu0 %3431 }
 0xd24   :  { %10562 = vrcp.f32 %v3432_v43 }
 0xd26   :  { %v10561_v44 = vpop.eup %10560 }
 0xd27   :  { %v3440_v45 = vmul.f32 %v10561_v44, %v10553_v28 }
 0xd29   :  { %9651 = vmatmul.mubr.msk.f32.vlgmr.msra.gmra.mrb[44].mxu0 %vm977_vm2, %v3440_v45 }
 0xd2a   :  { %9659 = vmatpush3.msra.mxu0 %v11373_v60  ;;  %9660 = vmatprep.mubr.msk.f32.mxu0 %vm10645_vm1, %v10646_v20 }
 0xd2b   :  { %v3429_v46 = vpop.xlane.xlu1 %3428  ;;  %9668 = vmatprep.subr.mxu0 %v10646_v20 }
 0xd2c   :  { %10564 = vrcp.f32 %v3429_v46 }
 0xd2e   :  { %v10563_v47 = vpop.eup %10562 }
 0xd2f   :  { %v3442_v48 = vmul.f32 %v10563_v47, %v10555_v33 }
 0xd31   :  { %9661 = vmatmul.mubr.msk.f32.vlgmr.msra.gmra.mrb[46].mxu0 %vm977_vm2, %v3442_v48  ;;  %v8709_v48 = vld [vmem:[%s12331_s8 + $0x1] ss:$0 sm:$0xff] }
 0xd32   :  { %9670 = vmatprep.mubr.msk.f32.mxu0 %vm10645_vm1, %v10646_v20  ;;  %9669 = vmatpush3.msra.mxu0 %v8697_v54 }
 0xd33   :  { %v3435_v49 = vpop.xlane.xlu1 %3434  ;;  %9678 = vmatprep.subr.mxu0 %v10646_v20 }
 0xd34   :  { %10566 = vrcp.f32 %v3435_v49 }
 0xd36   :  { %v10565_v51 = vpop.eup %10564 }
 0xd37   :  { %v3441_v50 = vmul.f32 %v10565_v51, %v10557_v39  ;;  %v8713_v39 = vld [vmem:[%s12333_s10 + $0x30] sm:$0xff]  ;;  %v4349_v51 = vld [vmem:[%s12326_s3] sm:$0xff] }
 0xd39   :  { %9656 = vmatmul.mubr.msk.f32.vlgmr.msra.gmra.mrb[40].mxu1 %vm977_vm2, %v3441_v50  ;;  %v4350_v50 = vld [vmem:[%s12326_s3 + $0x8] sm:$0xff] }
 0xd3a   :  { %9664 = vmatpush3.msra.mxu1 %v11381_v2  ;;  %9665 = vmatprep.mubr.msk.f32.mxu1 %vm10645_vm1, %v10646_v20 }
 0xd3b   :  { %9673 = vmatprep.subr.mxu1 %v10646_v20 }
 0xd3e   :  { %v10567_v52 = vpop.eup %10566 }
 0xd3f   :  { %v3443_v53 = vmul.f32 %v10567_v52, %v10559_v41  ;;  %v10328_v41 = vpack.c.bf16 %v8714_v40, %v8713_v39  ;;  %v8710_v52 = vld [vmem:[%s12332_s9 + $0x1] ss:$0 sm:$0xff]  ;;  %v4958_v39 = vld [vmem:[%s12328_s5 + $0x70] sm:$0xff]  ;;  %v4959_v40 = vld [vmem:[%s12328_s5 + $0x78] sm:$0xff] }
 0xd41   :  { %9666 = vmatmul.mubr.msk.f32.vlgmr.msra.gmra.mrb[42].mxu1 %vm977_vm2, %v3443_v53 }
 0xd42   :  { %9675 = vmatprep.mubr.msk.f32.mxu1 %vm10645_vm1, %v10646_v20  ;;  %9674 = vmatpush3.msra.mxu1 %v8698_v55  ;;  %v8733_v55 = vld [vmem:[%s12324_s1] ss:$0 sm:$0xff] }
 0xd43   :  { %9683 = vmatprep.subr.mxu1 %v10646_v20 }
 0xdfc   :  { %v3513_v57 = vpop.f32.mrb[44].mxu0 }
 0xdfd   :  { %v9652_v58 = vpop.f32.mrb[45].mxu0  ;;  %9671 = vmatmul.mubr.msk.f32.vlgmr.msra.gmra.mrb[48].mxu0 %vm977_vm2, %v3513_v57 }
 0xdfe   :  { %9679 = vmatpush3.msra.mxu0 %v8699_v56  ;;  %9680 = vmatprep.mubr.msk.f32.mxu0 %vm10645_vm1, %v10646_v20  ;;  %v10343_v56 = vpack.c.bf16 %v4350_v50, %v4349_v51  ;;  %v8725_v51 = vld [vmem:[%s12335_s12 + $0x70] sm:$0xff]  ;;  %v8726_v50 = vld [vmem:[%s12335_s12 + $0x78] sm:$0xff] }
 0xdff   :  { %10324 = vmatprep.subr.bf16.mxu0 %v10644_v12 }
 0xe04   :  { %v3659_v59 = vpop.f32.mrb[46].mxu0 }
 0xe05   :  { %v9662_v60 = vpop.f32.mrb[47].mxu0  ;;  %9681 = vmatmul.mubr.msk.f32.vlgmr.msra.gmra.mrb[50].mxu0 %vm977_vm2, %v3659_v59  ;;  %v4351_v59 = vld [vmem:[%s12326_s3 + $0x10] sm:$0xff] }
 0xe06   :  { %9696 = vmatprep.mubr.msk.f32.mxu0 %vm10645_vm1, %v10646_v20  ;;  %10326 = vmatpush3.bf16.msra.mxu0 %v10325_v38  ;;  %v4352_v60 = vld [vmem:[%s12326_s3 + $0x18] sm:$0xff]  ;;  %v10409_v38 = vpack.c.bf16 %v4957_v37, %v4956_v35 }
 0xe07   :  { %10327 = vmatprep.subr.bf16.mxu0 %v10644_v12 }
 0xe0a   :  { %10329 = vmatpush3.bf16.msra.mxu0 %v10328_v41  ;;  %v10412_v41 = vpack.c.bf16 %v4959_v40, %v4958_v39  ;;  %v4359_v39 = vld [vmem:[%s12326_s3 + $0x50] sm:$0xff]  ;;  %v4360_v40 = vld [vmem:[%s12326_s3 + $0x58] sm:$0xff] }
 0xe0b   :  { %10342 = vmatprep.subr.bf16.mxu0 %v10644_v12 }
 0xe0c   :  { %v3586_v62 = vpop.f32.mrb[40].mxu1 }
 0xe0d   :  { %v9657_v63 = vpop.f32.mrb[41].mxu1  ;;  %9676 = vmatmul.mubr.msk.f32.vlgmr.msra.gmra.mrb[44].mxu1 %vm977_vm2, %v3586_v62  ;;  %v8734_v62 = vld [vmem:[%s12325_s2] ss:$0 sm:$0xff] }
 0xe0e   :  { %9684 = vmatpush3.msra.mxu1 %v8700_v61  ;;  %9685 = vmatprep.mubr.msk.f32.mxu1 %vm10645_vm1, %v10646_v20  ;;  %v10346_v63 = vpack.c.bf16 %v4352_v60, %v4351_v59 }
 0xe0f   :  { %10330 = vmatprep.subr.bf16.mxu1 %v10644_v12 }
 0xe14   :  { %v3732_v1 = vpop.f32.mrb[42].mxu1 }
 0xe15   :  { %v9667_v2 = vpop.f32.mrb[43].mxu1  ;;  %9686 = vmatmul.mubr.msk.f32.vlgmr.msra.gmra.mrb[46].mxu1 %vm977_vm2, %v3732_v1  ;;  %v4353_v1 = vld [vmem:[%s12326_s3 + $0x20] sm:$0xff] }
 0xe16   :  { %9715 = vmatprep.mubr.msk.f32.mxu1 %vm10645_vm1, %v10646_v20  ;;  %v4354_v2 = vld [vmem:[%s12326_s3 + $0x28] sm:$0xff] }
 0xed0   :  { %v3810_v3 = vpop.f32.mrb[48].mxu0 }
 0xed1   :  { %v9672_v4 = vpop.f32.mrb[49].mxu0  ;;  %v4033_v9 = vsel %vm57_vm0, %v3810_v3, 0.0 }
 0xed2   :  { %v10349_v4 = vpack.c.bf16 %v4354_v2, %v4353_v1 }
 0xed8   :  { %v3956_v5 = vpop.f32.mrb[50].mxu0 }
 0xed9   :  { %v9682_v7 = vpop.f32.mrb[51].mxu0  ;;  %v4036_v14 = vsel %vm57_vm0, %v3956_v5, 0.0  ;;  %v4355_v5 = vld [vmem:[%s12326_s3 + $0x30] sm:$0xff] }
 0xeda   :  { %v4356_v7 = vld [vmem:[%s12326_s3 + $0x38] sm:$0xff] }
 0xee0   :  { %v3883_v8 = vpop.f32.mrb[44].mxu1 }
 0xee1   :  { %v4034_v10 = vsel %vm57_vm0, %v3883_v8, 0.0  ;;  %v9677_v11 = vpop.f32.mrb[45].mxu1  ;;  %v10352_v8 = vpack.c.bf16 %v4356_v7, %v4355_v5 }
 0xee2   :  { %v4035_v13 = vadd.f32 %v4034_v10, %v4033_v9  ;;  %v4361_v9 = vld [vmem:[%s12326_s3 + $0x60] sm:$0xff]  ;;  %v4362_v10 = vld [vmem:[%s12326_s3 + $0x68] sm:$0xff] }
 0xee3   :  { %v10361_v11 = vpack.c.bf16 %v4362_v10, %v4361_v9 }
 0xee4   :  { %v4037_v0 = vadd.f32 %v4036_v14, %v4035_v13  ;;  %v4363_v13 = vld [vmem:[%s12326_s3 + $0x70] sm:$0xff]  ;;  %v4364_v14 = vld [vmem:[%s12326_s3 + $0x78] sm:$0xff] }
 0xee8   :  { %v4029_v15 = vpop.f32.mrb[46].mxu1 }
 0xee9   :  { %v4038_v17 = vsel %vm57_vm0, %v4029_v15, 0.0  ;;  %v9687_v19 = vpop.f32.mrb[47].mxu1  ;;  %v4652_v15 = vld [vmem:[%s12327_s4 + $0x20] sm:$0xff] }
 0xeea   :  { %v4039_v21 = vadd.f32 %v4038_v17, %v4037_v0  ;;  %v10364_v0 = vpack.c.bf16 %v4364_v14, %v4363_v13  ;;  %v4653_v17 = vld [vmem:[%s12327_s4 + $0x28] sm:$0xff]  ;;  %v4654_v19 = vld [vmem:[%s12327_s4 + $0x30] sm:$0xff] }
 0xeec   :  { %v4048_v22 = vadd.f32 %v8706_v18, %v4039_v21  ;;  %v10373_v18 = vpack.c.bf16 %v4653_v17, %v4652_v15  ;;  %v4655_v21 = vld [vmem:[%s12327_s4 + $0x38] sm:$0xff] }
 0xeee   :  { %v11443_v23 = vadd.f32 %v4048_v22, %v11127_v16  ;;  %v10376_v22 = vpack.c.bf16 %v4655_v21, %v4654_v19 }
 0xef0   :  { %v4054_v6 = vsel %vm57_vm0, %v11443_v23, 0.0 }
 0xef1   :  { %4055 = vadd.xlane.f32.xlu0 %v4054_v6  ;;  %v4660_v6 = vld [vmem:[%s12327_s4 + $0x60] sm:$0xff] }
 0xef5   :  { %4323 = vadd.xlane.f32.xlu0 %v4322_v25  ;;  %v4661_v25 = vld [vmem:[%s12327_s4 + $0x68] sm:$0xff] }
 0xf7e   :  { %v4056_v26 = vpop.xlane.xlu0 %4055 }
 0xf7f   :  { %v4057_v27 = vmul.f32 0.03125, %v4056_v26  ;;  %v10385_v26 = vpack.c.bf16 %v4661_v25, %v4660_v6 }
 0xf81   :  { %v4058_v28 = vsub.f32 %v11443_v23, %v4057_v27  ;;  %v4662_v27 = vld [vmem:[%s12327_s4 + $0x70] sm:$0xff] }
 0xf82   :  { %v4324_v29 = vpop.xlane.xlu0 %4323 }
 0xf83   :  { %v4059_v16 = vmul.f32 %v4058_v28, %v4058_v28  ;;  %v4325_v30 = vmul.f32 0.03125, %v4324_v29 }
 0xf85   :  { %v4060_v31 = vsel %vm57_vm0, %v4059_v16, 0.0  ;;  %v4326_v32 = vsub.f32 %v11448_v24, %v4325_v30  ;;  %v4948_v16 = vld [vmem:[%s12328_s5 + $0x20] sm:$0xff]  ;;  %v4949_v30 = vld [vmem:[%s12328_s5 + $0x28] sm:$0xff] }
 0xf86   :  { %4061 = vadd.xlane.f32.xlu1 %v4060_v31  ;;  %v10397_v31 = vpack.c.bf16 %v4949_v30, %v4948_v16 }
 0xf87   :  { %v4327_v33 = vmul.f32 %v4326_v32, %v4326_v32 }
 0xf89   :  { %v4328_v34 = vsel %vm57_vm0, %v4327_v33, 0.0  ;;  %v4951_v33 = vld [vmem:[%s12328_s5 + $0x38] sm:$0xff] }
 0xf8a   :  { %4329 = vadd.xlane.f32.xlu1 %v4328_v34 }
0x1013   :  { %v4062_v36 = vpop.xlane.xlu1 %4061 }
0x1014   :  { %v4063_v42 = vmul.f32 0.03125, %v4062_v36  ;;  %v8719_v36 = vld [vmem:[%s12335_s12 + $0x40] sm:$0xff] }
0x1016   :  { %v4064_v43 = vadd.f32 1e-05, %v4063_v42  ;;  %v8720_v42 = vld [vmem:[%s12335_s12 + $0x48] sm:$0xff] }
0x1017   :  { %v4330_v44 = vpop.xlane.xlu1 %4329 }
0x1018   :  { %10568 = vrsqrt.f32 %v4064_v43  ;;  %v4331_v45 = vmul.f32 0.03125, %v4330_v44  ;;  %v10331_v43 = vpack.c.bf16 %v8720_v42, %v8719_v36  ;;  %v8721_v44 = vld [vmem:[%s12335_s12 + $0x50] sm:$0xff]  ;;  %v10358_v42 = vpack.c.bf16 %v4360_v40, %v4359_v39 }
0x101a   :  { %v4332_v46 = vadd.f32 1e-05, %v4331_v45  ;;  %10332 = vmatpush3.bf16.msra.mxu1 %v10331_v43  ;;  %v8722_v45 = vld [vmem:[%s12335_s12 + $0x58] sm:$0xff]  ;;  %v4648_v43 = vld [vmem:[%s12327_s4] sm:$0xff] }
0x101b   :  { %10333 = vmatprep.subr.bf16.mxu1 %v10644_v12 }
0x101c   :  { %10570 = vrsqrt.f32 %v4332_v46  ;;  %v10334_v46 = vpack.c.bf16 %v8722_v45, %v8721_v44  ;;  %v4649_v44 = vld [vmem:[%s12327_s4 + $0x8] sm:$0xff] }
0x101d   :  { %v10367_v45 = vpack.c.bf16 %v4649_v44, %v4648_v43 }
0x101e   :  { %10335 = vmatpush3.bf16.msra.mxu1 %v10334_v46  ;;  %v4650_v46 = vld [vmem:[%s12327_s4 + $0x10] sm:$0xff] }
0x101f   :  { %10336 = vmatprep.subr.bf16.mxu1 %v10644_v12 }
0x1022   :  { %v10569_v47 = vpop.eup %10568 }
0x1023   :  { %v4066_v49 = vmul.f32 %v10569_v47, %v4058_v28  ;;  %v4663_v28 = vld [vmem:[%s12327_s4 + $0x78] sm:$0xff]  ;;  %v8723_v47 = vld [vmem:[%s12335_s12 + $0x60] sm:$0xff] }
0x1024   :  { %v10388_v29 = vpack.c.bf16 %v4663_v28, %v4662_v27 }
0x1025   :  { %v4073_v53 = vmul.f32 %v8709_v48, %v4066_v49  ;;  %v8724_v48 = vld [vmem:[%s12335_s12 + $0x68] sm:$0xff] }
0x1026   :  { %v10571_v54 = vpop.eup %10570  ;;  %v10337_v49 = vpack.c.bf16 %v8724_v48, %v8723_v47  ;;  %v4651_v47 = vld [vmem:[%s12327_s4 + $0x18] sm:$0xff] }
0x1027   :  { %v4080_v57 = vadd.f32 %v8710_v52, %v4073_v53  ;;  %v4334_v58 = vmul.f32 %v10571_v54, %v4326_v32  ;;  %v4950_v32 = vld [vmem:[%s12328_s5 + $0x30] sm:$0xff]  ;;  %v10340_v52 = vpack.c.bf16 %v8726_v50, %v8725_v51  ;;  %v8716_v53 = vld [vmem:[%s12334_s11 + $0x1] ss:$0 sm:$0xff]  ;;  %v10370_v51 = vpack.c.bf16 %v4651_v47, %v4650_v46 }
0x1028   :  { %v10400_v34 = vpack.c.bf16 %v4951_v33, %v4950_v32  ;;  %10338 = vmatpush3.bf16.msra.mxu1 %v10337_v49  ;;  %v4357_v32 = vld [vmem:[%s12326_s3 + $0x40] sm:$0xff]  ;;  %v4358_v33 = vld [vmem:[%s12326_s3 + $0x48] sm:$0xff] }
0x1029   :  { %9697 = vmatmul.mubr.msk.f32.vlgmr.msra.gmra.mrb[52].mxu0 %vm57_vm0, %v4080_v57  ;;  %v4341_v61 = vmul.f32 %v8733_v55, %v4334_v58  ;;  %10339 = vmatprep.subr.bf16.mxu1 %v10644_v12  ;;  %v10355_v37 = vpack.c.bf16 %v4358_v33, %v4357_v32  ;;  %v4656_v50 = vld [vmem:[%s12327_s4 + $0x40] sm:$0xff] }
0x102a   :  { %10344 = vmatpush3.bf16.msra.mxu0 %v10343_v56  ;;  %9726 = vmatprep.mubr.msk.f32.mxu0 %vm10645_vm1, %v10646_v20 }
0x102b   :  { %10345 = vmatprep.subr.bf16.mxu0 %v10644_v12  ;;  %v11506_v3 = vadd.f32 %v8734_v62, %v4341_v61 }
0x102c   :  { %10341 = vmatpush3.bf16.msra.mxu1 %v10340_v52  ;;  %v4657_v52 = vld [vmem:[%s12327_s4 + $0x48] sm:$0xff] }
0x102d   :  { %10354 = vmatprep.subr.bf16.mxu1 %v10644_v12 }
0x102e   :  { %10347 = vmatpush3.bf16.msra.mxu0 %v10346_v63 }
0x102f   :  { %10348 = vmatprep.subr.bf16.mxu0 %v10644_v12 }
0x1031   :  { %9727 = vmatmul.mubr.msk.f32.vlgmr.msra.gmra.mrb[54].mxu0 %vm57_vm0, %v11506_v3 }
0x1032   :  { %10350 = vmatpush3.bf16.msra.mxu0 %v10349_v4  ;;  %9737 = vmatprep.mubr.msk.f32.mxu0 %vm10645_vm1, %v10646_v20 }
0x1033   :  { %10351 = vmatprep.subr.bf16.mxu0 %v10644_v12 }
0x1036   :  { %10353 = vmatpush3.bf16.msra.mxu0 %v10352_v8 }
0x1037   :  { %10360 = vmatprep.subr.bf16.mxu0 %v10644_v12 }
0x1039   :  { %9738 = vmatmul.mubr.msk.f32.vlgmr.msra.gmra.mrb[56].mxu0 %vm57_vm0, %v11506_v3 }
0x103a   :  { %10362 = vmatpush3.bf16.msra.mxu0 %v10361_v11  ;;  %9759 = vmatprep.mubr.msk.f32.mxu0 %vm10645_vm1, %v10646_v20 }
0x103b   :  { %10363 = vmatprep.subr.bf16.mxu0 %v10644_v12 }
0x103e   :  { %10365 = vmatpush3.bf16.msra.mxu0 %v10364_v0 }
0x103f   :  { %10372 = vmatprep.subr.bf16.mxu0 %v10644_v12 }
0x1041   :  { %9760 = vmatmul.mubr.msk.f32.vlgmr.msra.gmra.mrb[58].mxu0 %vm57_vm0, %v11506_v3 }
0x1042   :  { %10374 = vmatpush3.bf16.msra.mxu0 %v10373_v18  ;;  %9781 = vmatprep.mubr.msk.f32.mxu0 %vm10645_vm1, %v10646_v20 }
0x1043   :  { %10375 = vmatprep.subr.bf16.mxu0 %v10644_v12 }
0x1046   :  { %10377 = vmatpush3.bf16.msra.mxu0 %v10376_v22 }
0x1047   :  { %10384 = vmatprep.subr.bf16.mxu0 %v10644_v12 }
0x1049   :  { %9782 = vmatmul.mubr.msk.f32.vlgmr.msra.gmra.mrb[60].mxu0 %vm57_vm0, %v11506_v3 }
0x104a   :  { %10386 = vmatpush3.bf16.msra.mxu0 %v10385_v26  ;;  %9803 = vmatprep.mubr.msk.f32.mxu0 %vm10645_vm1, %v10646_v20 }
0x104b   :  { %10387 = vmatprep.subr.bf16.mxu0 %v10644_v12 }
0x104e   :  { %10389 = vmatpush3.bf16.msra.mxu0 %v10388_v29 }
0x104f   :  { %10396 = vmatprep.subr.bf16.mxu0 %v10644_v12 }
0x1051   :  { %9804 = vmatmul.mubr.msk.f32.vlgmr.msra.gmra.mrb[62].mxu0 %vm57_vm0, %v11506_v3 }
0x1052   :  { %10398 = vmatpush3.bf16.msra.mxu0 %v10397_v31  ;;  %9825 = vmatprep.mubr.msk.f32.mxu0 %vm10645_vm1, %v10646_v20 }
0x1053   :  { %10399 = vmatprep.subr.bf16.mxu0 %v10644_v12 }
0x1056   :  { %10401 = vmatpush3.bf16.msra.mxu0 %v10400_v34 }
0x1057   :  { %10408 = vmatprep.subr.bf16.mxu0 %v10644_v12 }
0x1059   :  { %9826 = vmatmul.mubr.msk.f32.vlgmr.msra.gmra.mrb[64].mxu0 %vm57_vm0, %v11506_v3 }
0x105a   :  { %10410 = vmatpush3.bf16.msra.mxu0 %v10409_v38  ;;  %9847 = vmatprep.mubr.msk.f32.mxu0 %vm10645_vm1, %v10646_v20 }
0x105b   :  { %10411 = vmatprep.subr.bf16.mxu0 %v10644_v12 }
0x105e   :  { %10413 = vmatpush3.bf16.msra.mxu0 %v10412_v41 }
0x105f   :  { %9860 = vmatprep.subr.mxu0 %v10646_v20 }
0x1061   :  { %9848 = vmatmul.mubr.msk.f32.vlgmr.msra.gmra.mrb[66].mxu0 %vm57_vm0, %v11506_v3 }
0x1062   :  { %9862 = vmatprep.mubr.msk.f32.mxu0 %vm10645_vm1, %v10646_v20 }
0x10fc   :  { %v4163_v54 = vpop.f32.mrb[52].mxu0 }
0x10fd   :  { %v4164_v55 = vadd.f32 %v8716_v53, %v4163_v54  ;;  %v9698_v56 = vpop.f32.mrb[53].mxu0  ;;  %v10379_v53 = vpack.c.bf16 %v4657_v52, %v4656_v50  ;;  %v4658_v54 = vld [vmem:[%s12327_s4 + $0x50] sm:$0xff] }
0x10ff   :  { %v4168_v57 = vmul.f32 0.70710677, %v4164_v55  ;;  %v4167_v34 = vmul.f32 0.5, %v4164_v55  ;;  %v4659_v55 = vld [vmem:[%s12327_s4 + $0x58] sm:$0xff] }
0x1101   :  { %v8718_v58 = vclamps-f32 %v4168_v57, 4.0 }
0x1103   :  { %v4171_v59 = vmul.f32 %v8718_v58, %v8718_v58 }
0x1104   :  { %v11646_v60 = vpop.f32.mrb[54].mxu0 }
0x1105   :  { %v4172_v61 = vmul.f32 -2.7261424e-10, %v4171_v59  ;;  %v4185_v62 = vmul.f32 -1.45660715e-05, %v4171_v59  ;;  %v9728_v63 = vpop.f32.mrb[55].mxu0 }
0x1106   :  { %v4946_v63 = vld [vmem:[%s12328_s5 + $0x10] sm:$0xff] }
0x1107   :  { %v4173_v1 = vadd.f32 2.7706815e-08, %v4172_v61  ;;  %v4186_v2 = vadd.f32 -0.00021337405, %v4185_v62  ;;  %v4945_v61 = vld [vmem:[%s12328_s5 + $0x8] sm:$0xff] }
0x1109   :  { %v4174_v4 = vmul.f32 %v4173_v1, %v4171_v59  ;;  %v4187_v5 = vmul.f32 %v4186_v2, %v4171_v59  ;;  %v4947_v1 = vld [vmem:[%s12328_s5 + $0x18] sm:$0xff] }
0x110a   :  { %v10394_v2 = vpack.c.bf16 %v4947_v1, %v4946_v63 }
0x110b   :  { %v4175_v7 = vadd.f32 -2.101024e-06, %v4174_v4  ;;  %v4188_v8 = vadd.f32 -0.001682827, %v4187_v5  ;;  %v4952_v4 = vld [vmem:[%s12328_s5 + $0x40] sm:$0xff]  ;;  %v4953_v5 = vld [vmem:[%s12328_s5 + $0x48] sm:$0xff] }
0x110c   :  { %v11648_v9 = vpop.f32.mrb[56].mxu0 }
0x110d   :  { %v4176_v10 = vmul.f32 %v4175_v7, %v4171_v59  ;;  %v4189_v11 = vmul.f32 %v4188_v8, %v4171_v59  ;;  %v9739_v13 = vpop.f32.mrb[57].mxu0  ;;  %v10403_v7 = vpack.c.bf16 %v4953_v5, %v4952_v4  ;;  %v4954_v8 = vld [vmem:[%s12328_s5 + $0x50] sm:$0xff] }
0x110f   :  { %v4177_v14 = vadd.f32 -5.6925062e-05, %v4176_v10  ;;  %v4190_v0 = vadd.f32 -0.0073733293, %v4189_v11  ;;  %v4955_v10 = vld [vmem:[%s12328_s5 + $0x58] sm:$0xff] }
0x1110   :  { %v10406_v11 = vpack.c.bf16 %v4955_v10, %v4954_v8 }
0x1111   :  { %v4178_v15 = vmul.f32 %v4177_v14, %v4171_v59  ;;  %v4191_v17 = vmul.f32 %v4190_v0, %v4171_v59 }
0x1113   :  { %v4179_v18 = vadd.f32 -0.00073499064, %v4178_v15  ;;  %v4192_v19 = vadd.f32 -0.014264739, %v4191_v17 }
0x1114   :  { %v11650_v21 = vpop.f32.mrb[58].mxu0 }
0x1115   :  { %v4180_v22 = vmul.f32 %v4179_v18, %v4171_v59  ;;  %10572 = vrcp.f32 %v4192_v19  ;;  %v9761_v6 = vpop.f32.mrb[59].mxu0 }
0x1117   :  { %v4181_v25 = vadd.f32 -0.0029546, %v4180_v22 }
0x1119   :  { %v4182_v26 = vmul.f32 %v4181_v25, %v4171_v59  ;;  %v4944_v59 = vld [vmem:[%s12328_s5] sm:$0xff] }
0x111a   :  { %v10391_v62 = vpack.c.bf16 %v4945_v61, %v4944_v59 }
0x111b   :  { %v4183_v27 = vadd.f32 -0.016096033, %v4182_v26 }
0x111c   :  { %v11652_v28 = vpop.f32.mrb[60].mxu0 }
0x111d   :  { %v4184_v29 = vmul.f32 %v8718_v58, %v4183_v27  ;;  %v9783_v16 = vpop.f32.mrb[61].mxu0  ;;  %v10382_v58 = vpack.c.bf16 %v4659_v55, %v4658_v54 }
0x111f   :  { %v10573_v30 = vpop.eup %10572 }
0x1120   :  { %v4194_v31 = vmul.f32 %v10573_v30, %v4184_v29 }
0x1122   :  { %v4195_v35 = vadd.f32 1.0, %v4194_v31 }
0x1124   :  { %v4196_v38 = vmul.f32 %v4195_v35, %v4167_v34  ;;  %v11666_v41 = vpop.f32.mrb[62].mxu0 }
0x1125   :  { %v9805_v36 = vpop.f32.mrb[63].mxu0 }
0x1126   :  { %9716 = vmatmul.mubr.msk.f32.vlgmr.msra.gmra.mrb[48].mxu1 %vm2092_vm3, %v4196_v38 }
0x1127   :  { %10356 = vmatpush3.bf16.msra.mxu1 %v10355_v37  ;;  %9748 = vmatprep.mubr.msk.f32.mxu1 %vm10645_vm1, %v10646_v20 }
0x1128   :  { %10357 = vmatprep.subr.bf16.mxu1 %v10644_v12 }
0x112b   :  { %10359 = vmatpush3.bf16.msra.mxu1 %v10358_v42 }
0x112c   :  { %10366 = vmatprep.subr.bf16.mxu1 %v10644_v12  ;;  %v11685_v48 = vpop.f32.mrb[64].mxu0 }
0x112d   :  { %v9827_v49 = vpop.f32.mrb[65].mxu0 }
0x112e   :  { %9749 = vmatmul.mubr.msk.f32.vlgmr.msra.gmra.mrb[50].mxu1 %vm57_vm0, %v11506_v3 }
0x112f   :  { %10368 = vmatpush3.bf16.msra.mxu1 %v10367_v45  ;;  %9770 = vmatprep.mubr.msk.f32.mxu1 %vm10645_vm1, %v10646_v20 }
0x1130   :  { %10369 = vmatprep.subr.bf16.mxu1 %v10644_v12 }
0x1133   :  { %10371 = vmatpush3.bf16.msra.mxu1 %v10370_v51 }
0x1134   :  { %10378 = vmatprep.subr.bf16.mxu1 %v10644_v12  ;;  %v11705_v56 = vpop.f32.mrb[66].mxu0 }
0x1135   :  { %v9849_v57 = vpop.f32.mrb[67].mxu0 }
0x1136   :  { %9771 = vmatmul.mubr.msk.f32.vlgmr.msra.gmra.mrb[52].mxu1 %vm57_vm0, %v11506_v3 }
0x1137   :  { %10380 = vmatpush3.bf16.msra.mxu1 %v10379_v53  ;;  %9792 = vmatprep.mubr.msk.f32.mxu1 %vm10645_vm1, %v10646_v20 }
0x1138   :  { %10381 = vmatprep.subr.bf16.mxu1 %v10644_v12 }
0x113b   :  { %10383 = vmatpush3.bf16.msra.mxu1 %v10382_v58 }
0x113c   :  { %10390 = vmatprep.subr.bf16.mxu1 %v10644_v12 }
0x113e   :  { %9793 = vmatmul.mubr.msk.f32.vlgmr.msra.gmra.mrb[54].mxu1 %vm57_vm0, %v11506_v3 }
0x113f   :  { %10392 = vmatpush3.bf16.msra.mxu1 %v10391_v62  ;;  %9814 = vmatprep.mubr.msk.f32.mxu1 %vm10645_vm1, %v10646_v20 }
0x1140   :  { %10393 = vmatprep.subr.bf16.mxu1 %v10644_v12 }
0x1143   :  { %10395 = vmatpush3.bf16.msra.mxu1 %v10394_v2 }
0x1144   :  { %10402 = vmatprep.subr.bf16.mxu1 %v10644_v12 }
0x1146   :  { %9815 = vmatmul.mubr.msk.f32.vlgmr.msra.gmra.mrb[56].mxu1 %vm57_vm0, %v11506_v3 }
0x1147   :  { %10404 = vmatpush3.bf16.msra.mxu1 %v10403_v7  ;;  %9836 = vmatprep.mubr.msk.f32.mxu1 %vm10645_vm1, %v10646_v20 }
0x1148   :  { %10405 = vmatprep.subr.bf16.mxu1 %v10644_v12 }
0x114b   :  { %10407 = vmatpush3.bf16.msra.mxu1 %v10406_v11 }
0x114c   :  { %9850 = vmatprep.subr.mxu1 %v10646_v20 }
0x114e   :  { %9837 = vmatmul.mubr.msk.f32.vlgmr.msra.gmra.mrb[58].mxu1 %vm57_vm0, %v11506_v3 }
0x114f   :  { %9852 = vmatprep.mubr.msk.f32.mxu1 %vm10645_vm1, %v10646_v20 }
0x11f9   :  { %v11753_v13 = vpop.f32.mrb[48].mxu1 }
0x11fa   :  { %v9717_v14 = vpop.f32.mrb[49].mxu1 }
0x1201   :  { %v4574_v0 = vpop.f32.mrb[50].mxu1 }
0x1202   :  { %v9750_v15 = vpop.f32.mrb[51].mxu1 }
0x1203   :  { %v5886_v15 = vld [vmem:[%s12329_s6 + $0x10] sm:$0xff] }
0x1209   :  { %v4730_v17 = vpop.f32.mrb[52].mxu1 }
0x120a   :  { %v9772_v18 = vpop.f32.mrb[53].mxu1  ;;  %9851 = vmatpush3.xpose.msk.msra.mxu1 %vm977_vm2, %v4730_v17 }
0x120b   :  { %9855 = vmatprep.subr.mxu1 %v10646_v20 }
0x120d   :  { %9853 = vmatmul.mubr.msk.f32.vlgmr.msra.gmra.mrb[60].mxu1 %vm977_vm2, %v11646_v60 }
0x120e   :  { %9856 = vmatpush3.xpose.msk.msra.mxu1 %vm977_vm2, %v11652_v28  ;;  %9857 = vmatprep.mubr.msk.f32.mxu1 %vm10645_vm1, %v10646_v20 }
0x120f   :  { %9865 = vmatprep.subr.mxu1 %v10646_v20 }
0x1211   :  { %v4870_v3 = vpop.f32.mrb[54].mxu1  ;;  %9858 = vmatmul.mubr.msk.f32.vlgmr.msra.gmra.mrb[62].mxu1 %vm977_vm2, %v11648_v9 }
0x1212   :  { %v9794_v19 = vpop.f32.mrb[55].mxu1  ;;  %9861 = vmatpush3.xpose.msk.msra.mxu0 %vm977_vm2, %v4870_v3  ;;  %9866 = vmatpush3.xpose.msk.msra.mxu1 %vm977_vm2, %v11666_v41  ;;  %v5887_v3 = vld [vmem:[%s12329_s6 + $0x18] sm:$0xff] }
0x1213   :  { %9867 = vmatprep.mubr.msk.f32.mxu1 %vm10645_vm1, %v10646_v20  ;;  %9875 = vmatprep.subr.mxu1 %v10646_v20 }
0x1214   :  { %9870 = vmatprep.subr.mxu0 %v10646_v20 }
0x1215   :  { %9863 = vmatmul.mubr.msk.f32.vlgmr.msra.gmra.mrb[68].mxu0 %vm977_vm2, %v4574_v0  ;;  %9868 = vmatmul.mubr.msk.f32.vlgmr.msra.gmra.mrb[64].mxu1 %vm977_vm2, %v11650_v21  ;;  %v5885_v0 = vld [vmem:[%s12329_s6 + $0x8] sm:$0xff] }
0x1216   :  { %9876 = vmatpush3.msra.mxu1 %v11685_v48  ;;  %9872 = vmatprep.mubr.msk.f32.mxu0 %vm10645_vm1, %v10646_v20 }
0x1217   :  { %9877 = vmatprep.mubr.msk.f32.mxu1 %vm10645_vm1, %v10646_v20  ;;  %9885 = vmatprep.subr.mxu1 %v10646_v20 }
0x1219   :  { %v5026_v60 = vpop.f32.mrb[56].mxu1 }
0x121a   :  { %v9816_v9 = vpop.f32.mrb[57].mxu1  ;;  %9871 = vmatpush3.msra.mxu0 %v5026_v60 }
0x121b   :  { %9880 = vmatprep.subr.mxu0 %v10646_v20 }
0x1221   :  { %v5166_v22 = vpop.f32.mrb[58].mxu1 }
0x1222   :  { %v9838_v6 = vpop.f32.mrb[59].mxu1 }
0x12e0   :  { %v5312_v25 = vpop.f32.mrb[60].mxu1 }
0x12e1   :  { %v5544_v26 = vmul.f32 0.35355338, %v5312_v25  ;;  %v9854_v21 = vpop.f32.mrb[61].mxu1 }
0x12e3   :  { %v5548_v27 = vsel %vm977_vm2, %v5544_v26, -inf }
0x12e4   :  { %5549 = vmax.xlane.f32.xlu0 %v5548_v27  ;;  %v5388_v28 = vpop.f32.mrb[62].mxu1 }
0x12e5   :  { %v5545_v29 = vmul.f32 0.35355338, %v5388_v28  ;;  %v9859_v16 = vpop.f32.mrb[63].mxu1 }
0x12e7   :  { %v5551_v30 = vsel %vm977_vm2, %v5545_v29, -inf }
0x12e8   :  { %5552 = vmax.xlane.f32.xlu1 %v5551_v30  ;;  %v5464_v31 = vpop.f32.mrb[68].mxu0  ;;  %v5540_v32 = vpop.f32.mrb[64].mxu1 }
0x12e9   :  { %v5546_v33 = vmul.f32 0.35355338, %v5464_v31  ;;  %v5547_v34 = vmul.f32 0.35355338, %v5540_v32  ;;  %v9864_v35 = vpop.f32.mrb[69].mxu0  ;;  %v9869_v37 = vpop.f32.mrb[65].mxu1 }
0x12eb   :  { %v5557_v38 = vsel %vm977_vm2, %v5547_v34, -inf  ;;  %v5554_v39 = vsel %vm977_vm2, %v5546_v33, -inf }
0x12ec   :  { %5558 = vmax.xlane.f32.xlu1 %v5557_v38  ;;  %5555 = vmax.xlane.f32.xlu0 %v5554_v39  ;;  %v8763_v39 = vld [vmem:[%s12330_s7] ss:$0 sm:$0xff] }
0x1371   :  { %v5550_v40 = vpop.xlane.xlu0 %5549 }
0x1372   :  { %v5560_v41 = vsub.f32 %v5544_v26, %v5550_v40 }
0x1374   :  { %v5564_v36 = vmul.f32 1.442695, %v5560_v41 }
0x1375   :  { %v5553_v42 = vpop.xlane.xlu1 %5552 }
0x1376   :  { %10574 = vpow2.f32 %v5564_v36  ;;  %v5561_v43 = vsub.f32 %v5545_v29, %v5553_v42 }
0x1378   :  { %v5566_v44 = vmul.f32 1.442695, %v5561_v43 }
0x1379   :  { %v5559_v45 = vpop.xlane.xlu1 %5558  ;;  %v5556_v46 = vpop.xlane.xlu0 %5555 }
0x137a   :  { %10576 = vpow2.f32 %v5566_v44  ;;  %v5563_v47 = vsub.f32 %v5547_v34, %v5559_v45  ;;  %v5562_v48 = vsub.f32 %v5546_v33, %v5556_v46 }
0x137c   :  { %v5570_v49 = vmul.f32 1.442695, %v5563_v47  ;;  %v5568_v51 = vmul.f32 1.442695, %v5562_v48  ;;  %v6225_v48 = vld [vmem:[%s12333_s10] sm:$0xff] }
0x137e   :  { %10578 = vpow2.f32 %v5570_v49 }
0x137f   :  { %10580 = vpow2.f32 %v5568_v51  ;;  %v6227_v51 = vld [vmem:[%s12333_s10 + $0x10] sm:$0xff] }
0x1380   :  { %v10575_v50 = vpop.eup %10574 }
0x1381   :  { %v5572_v52 = vsel %vm977_vm2, %v10575_v50, 0.0 }
0x1382   :  { %5573 = vadd.xlane.f32.xlu0 %v5572_v52 }
0x1384   :  { %v10577_v53 = vpop.eup %10576 }
0x1385   :  { %v5575_v54 = vsel %vm977_vm2, %v10577_v53, 0.0 }
0x1386   :  { %5576 = vadd.xlane.f32.xlu1 %v5575_v54 }
0x1388   :  { %v10579_v55 = vpop.eup %10578 }
0x1389   :  { %v10581_v57 = vpop.eup %10580  ;;  %v5581_v58 = vsel %vm977_vm2, %v10579_v55, 0.0 }
0x138a   :  { %5582 = vadd.xlane.f32.xlu1 %v5581_v58  ;;  %v5578_v59 = vsel %vm977_vm2, %v10581_v57, 0.0  ;;  %v8764_v58 = vld [vmem:[%s12331_s8] ss:$0 sm:$0xff] }
0x138b   :  { %5579 = vadd.xlane.f32.xlu0 %v5578_v59 }
0x140f   :  { %v5574_v61 = vpop.xlane.xlu0 %5573 }
0x1410   :  { %10582 = vrcp.f32 %v5574_v61  ;;  %v8765_v61 = vld [vmem:[%s12332_s9] ss:$0 sm:$0xff] }
0x1413   :  { %v5577_v62 = vpop.xlane.xlu1 %5576 }
0x1414   :  { %10584 = vrcp.f32 %v5577_v62 }
0x1417   :  { %v5583_v63 = vpop.xlane.xlu1 %5582 }
0x1418   :  { %10586 = vrcp.f32 %v5583_v63  ;;  %v5580_v1 = vpop.xlane.xlu0 %5579 }
0x1419   :  { %10588 = vrcp.f32 %v5580_v1  ;;  %v6339_v1 = vld [vmem:[%s12335_s12] sm:$0xff] }
0x141a   :  { %v10583_v2 = vpop.eup %10582 }
0x141b   :  { %v5588_v4 = vmul.f32 %v10583_v2, %v10575_v50  ;;  %v6228_v50 = vld [vmem:[%s12333_s10 + $0x18] sm:$0xff]  ;;  %v6340_v2 = vld [vmem:[%s12335_s12 + $0x8] sm:$0xff] }
0x141c   :  { %v10418_v52 = vpack.c.bf16 %v6228_v50, %v6227_v51 }
0x141d   :  { %9873 = vmatmul.mubr.msk.f32.vlgmr.msra.gmra.mrb[70].mxu0 %vm977_vm2, %v5588_v4  ;;  %v10421_v4 = vpack.c.bf16 %v6340_v2, %v6339_v1  ;;  %v8784_v1 = vld [vmem:[%s12326_s3 + $0xc8] sm:$0xff] }
0x141e   :  { %v10585_v5 = vpop.eup %10584  ;;  %9881 = vmatpush3.msra.mxu0 %v5166_v22  ;;  %9882 = vmatprep.mubr.msk.f32.mxu0 %vm10645_vm1, %v10646_v20 }
0x141f   :  { %v5589_v7 = vmul.f32 %v10585_v5, %v10577_v53  ;;  %9890 = vmatprep.subr.mxu0 %v10646_v20  ;;  %v6341_v5 = vld [vmem:[%s12335_s12 + $0x10] sm:$0xff] }
0x1421   :  { %9878 = vmatmul.mubr.msk.f32.vlgmr.msra.gmra.mrb[66].mxu1 %vm977_vm2, %v5589_v7  ;;  %v6342_v7 = vld [vmem:[%s12335_s12 + $0x18] sm:$0xff] }
0x1422   :  { %v10587_v8 = vpop.eup %10586  ;;  %9886 = vmatpush3.msra.mxu1 %v11705_v56  ;;  %9887 = vmatprep.mubr.msk.f32.mxu1 %vm10645_vm1, %v10646_v20  ;;  %v5884_v56 = vld [vmem:[%s12329_s6] sm:$0xff] }
0x1423   :  { %v10589_v10 = vpop.eup %10588  ;;  %v5591_v11 = vmul.f32 %v10587_v8, %v10579_v55  ;;  %9895 = vmatprep.subr.mxu1 %v10646_v20  ;;  %v10424_v8 = vpack.c.bf16 %v6342_v7, %v6341_v5  ;;  %v8778_v5 = vld [vmem:[%s12326_s3 + $0x98] sm:$0xff]  ;;  %v8785_v7 = vld [vmem:[%s12326_s3 + $0xd0] sm:$0xff] }
0x1424   :  { %v5590_v14 = vmul.f32 %v10589_v10, %v10581_v57  ;;  %v6343_v10 = vld [vmem:[%s12335_s12 + $0x20] sm:$0xff] }
0x1425   :  { %9888 = vmatmul.mubr.msk.f32.vlgmr.msra.gmra.mrb[68].mxu1 %vm977_vm2, %v5591_v11  ;;  %v6344_v11 = vld [vmem:[%s12335_s12 + $0x28] sm:$0xff] }
0x1426   :  { %9883 = vmatmul.mubr.msk.f32.vlgmr.msra.gmra.mrb[72].mxu0 %vm977_vm2, %v5590_v14  ;;  %9897 = vmatprep.mubr.msk.f32.mxu1 %vm10645_vm1, %v10646_v20  ;;  %v10427_v14 = vpack.c.bf16 %v6344_v11, %v6343_v10  ;;  %v8786_v10 = vld [vmem:[%s12326_s3 + $0xd8] sm:$0xff] }
0x1427   :  { %9892 = vmatprep.mubr.msk.f32.mxu0 %vm10645_vm1, %v10646_v20  ;;  %9891 = vmatpush3.msra.mxu0 %v5884_v56  ;;  %v6345_v56 = vld [vmem:[%s12335_s12 + $0x30] sm:$0xff]  ;;  %v10448_v11 = vpack.c.bf16 %v8786_v10, %v8785_v7  ;;  %v8819_v10 = vld [vmem:[%s12328_s5 + $0xa0] sm:$0xff] }
0x1428   :  { %9900 = vmatprep.subr.mxu0 %v10646_v20  ;;  %9896 = vmatpush3.msra.mxu1 %v5885_v0  ;;  %v6346_v0 = vld [vmem:[%s12335_s12 + $0x38] sm:$0xff] }
0x1429   :  { %9905 = vmatprep.subr.mxu1 %v10646_v20 }
0x14f0   :  { %v5661_v17 = vpop.f32.mrb[70].mxu0 }
0x14f1   :  { %v9874_v18 = vpop.f32.mrb[71].mxu0  ;;  %9893 = vmatmul.mubr.msk.f32.vlgmr.msra.gmra.mrb[74].mxu0 %vm977_vm2, %v5661_v17  ;;  %v8766_v17 = vld [vmem:[%s12334_s11] ss:$0 sm:$0xff] }
0x14f2   :  { %9901 = vmatpush3.msra.mxu0 %v5886_v15  ;;  %9902 = vmatprep.mubr.msk.f32.mxu0 %vm10645_vm1, %v10646_v20  ;;  %v10430_v15 = vpack.c.bf16 %v6346_v0, %v6345_v56 }
0x14f3   :  { %10414 = vmatprep.subr.bf16.mxu0 %v10644_v12 }
0x14f4   :  { %v5734_v19 = vpop.f32.mrb[66].mxu1 }
0x14f5   :  { %v9879_v60 = vpop.f32.mrb[67].mxu1  ;;  %9898 = vmatmul.mubr.msk.f32.vlgmr.msra.gmra.mrb[70].mxu1 %vm977_vm2, %v5734_v19 }
0x14f6   :  { %9906 = vmatpush3.msra.mxu1 %v5887_v3  ;;  %9907 = vmatprep.mubr.msk.f32.mxu1 %vm10645_vm1, %v10646_v20 }
0x14f7   :  { %10420 = vmatprep.subr.bf16.mxu1 %v10644_v12 }
0x14f8   :  { %v5880_v9 = vpop.f32.mrb[68].mxu1 }
0x14f9   :  { %v5807_v22 = vpop.f32.mrb[72].mxu0  ;;  %v9889_v6 = vpop.f32.mrb[69].mxu1  ;;  %9908 = vmatmul.mubr.msk.f32.vlgmr.msra.gmra.mrb[72].mxu1 %vm977_vm2, %v5880_v9 }
0x14fa   :  { %v9884_v25 = vpop.f32.mrb[73].mxu0  ;;  %9903 = vmatmul.mubr.msk.f32.vlgmr.msra.gmra.mrb[76].mxu0 %vm977_vm2, %v5807_v22  ;;  %9937 = vmatprep.mubr.msk.f32.mxu1 %vm10645_vm1, %v10646_v20 }
0x14fb   :  { %9918 = vmatprep.mubr.msk.f32.mxu0 %vm10645_vm1, %v10646_v20  ;;  %10422 = vmatpush3.bf16.msra.mxu1 %v10421_v4  ;;  %v8777_v4 = vld [vmem:[%s12326_s3 + $0x90] sm:$0xff] }
0x14fc   :  { %10423 = vmatprep.subr.bf16.mxu1 %v10644_v12 }
0x14ff   :  { %10425 = vmatpush3.bf16.msra.mxu1 %v10424_v8  ;;  %v10436_v8 = vpack.c.bf16 %v8778_v5, %v8777_v4  ;;  %v8825_v4 = vld [vmem:[%s12328_s5 + $0xd0] sm:$0xff]  ;;  %v8826_v5 = vld [vmem:[%s12328_s5 + $0xd8] sm:$0xff] }
0x1500   :  { %10426 = vmatprep.subr.bf16.mxu1 %v10644_v12 }
0x1503   :  { %10428 = vmatpush3.bf16.msra.mxu1 %v10427_v14 }
0x1504   :  { %10429 = vmatprep.subr.bf16.mxu1 %v10644_v12 }
0x1507   :  { %10431 = vmatpush3.bf16.msra.mxu1 %v10430_v15 }
0x1508   :  { %10444 = vmatprep.subr.bf16.mxu1 %v10644_v12 }
0x15c4   :  { %v5957_v26 = vpop.f32.mrb[74].mxu0 }
0x15c5   :  { %v9894_v21 = vpop.f32.mrb[75].mxu0  ;;  %v6180_v28 = vsel %vm57_vm0, %v5957_v26, 0.0 }
0x15c8   :  { %v6030_v27 = vpop.f32.mrb[70].mxu1 }
0x15c9   :  { %v6181_v29 = vsel %vm57_vm0, %v6030_v27, 0.0  ;;  %v9899_v16 = vpop.f32.mrb[71].mxu1 }
0x15ca   :  { %v6182_v30 = vadd.f32 %v6181_v29, %v6180_v28 }
0x15cc   :  { %v6176_v31 = vpop.f32.mrb[72].mxu1 }
0x15cd   :  { %v6103_v32 = vpop.f32.mrb[76].mxu0  ;;  %v9909_v33 = vpop.f32.mrb[73].mxu1  ;;  %v6185_v38 = vsel %vm57_vm0, %v6176_v31, 0.0 }
0x15ce   :  { %v6183_v34 = vsel %vm57_vm0, %v6103_v32, 0.0  ;;  %v9904_v35 = vpop.f32.mrb[77].mxu0 }
0x15cf   :  { %v6184_v37 = vadd.f32 %v6183_v34, %v6182_v30 }
0x15d1   :  { %v6186_v40 = vadd.f32 %v6185_v38, %v6184_v37 }
0x15d3   :  { %v6194_v41 = vadd.f32 %v8763_v39, %v6186_v40 }
0x15d5   :  { %v11842_v36 = vadd.f32 %v11448_v24, %v6194_v41  ;;  %v6226_v24 = vld [vmem:[%s12333_s10 + $0x8] sm:$0xff] }
0x15d6   :  { %v10415_v49 = vpack.c.bf16 %v6226_v24, %v6225_v48  ;;  %v8769_v24 = vld [vmem:[%s12336_s13] ss:$0 sm:$0xff] }
0x15d7   :  { %v6198_v42 = vsel %vm57_vm0, %v11842_v36, 0.0 }
0x15d8   :  { %6199 = vadd.xlane.f32.xlu0 %v6198_v42  ;;  %10416 = vmatpush3.bf16.msra.mxu0 %v10415_v49 }
0x15d9   :  { %10417 = vmatprep.subr.bf16.mxu0 %v10644_v12 }
0x15dc   :  { %10419 = vmatpush3.bf16.msra.mxu0 %v10418_v52 }
0x15dd   :  { %10432 = vmatprep.subr.bf16.mxu0 %v10644_v12 }
0x1665   :  { %v6200_v43 = vpop.xlane.xlu0 %6199 }
0x1666   :  { %v6201_v44 = vmul.f32 0.03125, %v6200_v43 }
0x1668   :  { %v6202_v45 = vsub.f32 %v11842_v36, %v6201_v44 }
0x166a   :  { %v6203_v46 = vmul.f32 %v6202_v45, %v6202_v45 }
0x166c   :  { %v6204_v47 = vsel %vm57_vm0, %v6203_v46, 0.0 }
0x166d   :  { %6205 = vadd.xlane.f32.xlu1 %v6204_v47 }
0x16fa   :  { %v6206_v53 = vpop.xlane.xlu1 %6205 }
0x16fb   :  { %v6207_v54 = vmul.f32 0.03125, %v6206_v53 }
0x16fd   :  { %v6208_v55 = vadd.f32 1e-05, %v6207_v54 }
0x16ff   :  { %10590 = vrsqrt.f32 %v6208_v55 }
0x1709   :  { %v10591_v57 = vpop.eup %10590 }
0x170a   :  { %v6210_v59 = vmul.f32 %v10591_v57, %v6202_v45 }
0x170c   :  { %v6217_v62 = vmul.f32 %v8764_v58, %v6210_v59 }
0x170e   :  { %v6224_v63 = vadd.f32 %v8765_v61, %v6217_v62  ;;  %v8775_v61 = vld [vmem:[%s12326_s3 + $0x80] sm:$0xff] }
0x170f   :  { %v8783_v62 = vld [vmem:[%s12326_s3 + $0xc0] sm:$0xff] }
0x1710   :  { %9919 = vmatmul.mubr.msk.f32.vlgmr.msra.gmra.mrb[78].mxu0 %vm57_vm0, %v6224_v63  ;;  %v10445_v2 = vpack.c.bf16 %v8784_v1, %v8783_v62  ;;  %v8809_v1 = vld [vmem:[%s12327_s4 + $0xf0] sm:$0xff] }
0x1711   :  { %9948 = vmatprep.mubr.msk.f32.mxu0 %vm10645_vm1, %v10646_v20 }
0x17e3   :  { %v6305_v18 = vpop.f32.mrb[78].mxu0 }
0x17e4   :  { %v6306_v3 = vadd.f32 %v8766_v17, %v6305_v18  ;;  %v9920_v19 = vpop.f32.mrb[79].mxu0  ;;  %v8773_v17 = vld [vmem:[%s12324_s1 + $0x1] ss:$0 sm:$0xff] }
0x17e5   :  { %v8779_v18 = vld [vmem:[%s12326_s3 + $0xa0] sm:$0xff]  ;;  %v8780_v19 = vld [vmem:[%s12326_s3 + $0xa8] sm:$0xff] }
0x17e6   :  { %v6310_v60 = vmul.f32 0.70710677, %v6306_v3  ;;  %v6309_v46 = vmul.f32 0.5, %v6306_v3 }
0x17e8   :  { %v8768_v9 = vclamps-f32 %v6310_v60, 4.0  ;;  %v8795_v60 = vld [vmem:[%s12327_s4 + $0x80] sm:$0xff] }
0x17ea   :  { %v6313_v22 = vmul.f32 %v8768_v9, %v8768_v9 }
0x17ec   :  { %v6314_v6 = vmul.f32 -2.7261424e-10, %v6313_v22  ;;  %v6327_v25 = vmul.f32 -1.45660715e-05, %v6313_v22 }
0x17ee   :  { %v6315_v26 = vadd.f32 2.7706815e-08, %v6314_v6  ;;  %v6328_v21 = vadd.f32 -0.00021337405, %v6327_v25  ;;  %v10439_v25 = vpack.c.bf16 %v8780_v19, %v8779_v18  ;;  %v8828_v18 = vld [vmem:[%s12328_s5 + $0xe8] sm:$0xff]  ;;  %v8829_v19 = vld [vmem:[%s12328_s5 + $0xf0] sm:$0xff] }
0x17f0   :  { %v6316_v27 = vmul.f32 %v6315_v26, %v6313_v22  ;;  %v6329_v28 = vmul.f32 %v6328_v21, %v6313_v22  ;;  %v8781_v21 = vld [vmem:[%s12326_s3 + $0xb0] sm:$0xff] }
0x17f2   :  { %v6317_v29 = vadd.f32 -2.101024e-06, %v6316_v27  ;;  %v6330_v16 = vadd.f32 -0.001682827, %v6329_v28  ;;  %v8782_v28 = vld [vmem:[%s12326_s3 + $0xb8] sm:$0xff] }
0x17f4   :  { %v6318_v30 = vmul.f32 %v6317_v29, %v6313_v22  ;;  %v6331_v31 = vmul.f32 %v6330_v16, %v6313_v22  ;;  %v8797_v29 = vld [vmem:[%s12327_s4 + $0x90] sm:$0xff]  ;;  %v8798_v16 = vld [vmem:[%s12327_s4 + $0x98] sm:$0xff] }
0x17f6   :  { %v6319_v32 = vadd.f32 -5.6925062e-05, %v6318_v30  ;;  %v6332_v33 = vadd.f32 -0.0073733293, %v6331_v31  ;;  %v10442_v30 = vpack.c.bf16 %v8782_v28, %v8781_v21  ;;  %v10460_v31 = vpack.c.bf16 %v8798_v16, %v8797_v29 }
0x17f8   :  { %v6320_v34 = vmul.f32 %v6319_v32, %v6313_v22  ;;  %v6333_v35 = vmul.f32 %v6332_v33, %v6313_v22  ;;  %v8787_v32 = vld [vmem:[%s12326_s3 + $0xe0] sm:$0xff]  ;;  %v8788_v33 = vld [vmem:[%s12326_s3 + $0xe8] sm:$0xff] }
0x17fa   :  { %v6321_v37 = vadd.f32 -0.00073499064, %v6320_v34  ;;  %v6334_v38 = vadd.f32 -0.014264739, %v6333_v35  ;;  %v8803_v34 = vld [vmem:[%s12327_s4 + $0xc0] sm:$0xff]  ;;  %v8804_v35 = vld [vmem:[%s12327_s4 + $0xc8] sm:$0xff] }
0x17fc   :  { %v6322_v39 = vmul.f32 %v6321_v37, %v6313_v22  ;;  %10592 = vrcp.f32 %v6334_v38  ;;  %v10451_v37 = vpack.c.bf16 %v8788_v33, %v8787_v32  ;;  %v10469_v38 = vpack.c.bf16 %v8804_v35, %v8803_v34 }
0x17fe   :  { %v6323_v40 = vadd.f32 -0.0029546, %v6322_v39  ;;  %v8789_v39 = vld [vmem:[%s12326_s3 + $0xf0] sm:$0xff] }
0x1800   :  { %v6324_v41 = vmul.f32 %v6323_v40, %v6313_v22  ;;  %v8774_v22 = vld [vmem:[%s12325_s2 + $0x1] ss:$0 sm:$0xff]  ;;  %v8790_v40 = vld [vmem:[%s12326_s3 + $0xf8] sm:$0xff] }
0x1802   :  { %v6325_v42 = vadd.f32 -0.016096033, %v6324_v41  ;;  %v8805_v41 = vld [vmem:[%s12327_s4 + $0xd0] sm:$0xff] }
0x1804   :  { %v6326_v43 = vmul.f32 %v8768_v9, %v6325_v42  ;;  %v8796_v9 = vld [vmem:[%s12327_s4 + $0x88] sm:$0xff]  ;;  %v8806_v42 = vld [vmem:[%s12327_s4 + $0xd8] sm:$0xff] }
0x1805   :  { %v10457_v26 = vpack.c.bf16 %v8796_v9, %v8795_v60  ;;  %v8830_v60 = vld [vmem:[%s12328_s5 + $0xf8] sm:$0xff] }
0x1806   :  { %v10593_v44 = vpop.eup %10592  ;;  %v10502_v9 = vpack.c.bf16 %v8830_v60, %v8829_v19 }
0x1807   :  { %v6336_v45 = vmul.f32 %v10593_v44, %v6326_v43  ;;  %v10454_v43 = vpack.c.bf16 %v8790_v40, %v8789_v39  ;;  %v10472_v44 = vpack.c.bf16 %v8806_v42, %v8805_v41 }
0x1809   :  { %v6337_v47 = vadd.f32 1.0, %v6336_v45  ;;  %v8799_v45 = vld [vmem:[%s12327_s4 + $0xa0] sm:$0xff] }
0x180b   :  { %v6338_v48 = vmul.f32 %v6337_v47, %v6309_v46  ;;  %v8800_v46 = vld [vmem:[%s12327_s4 + $0xa8] sm:$0xff]  ;;  %v8815_v47 = vld [vmem:[%s12328_s5 + $0x80] sm:$0xff] }
0x180d   :  { %9938 = vmatmul.mubr.msk.f32.vlgmr.msra.gmra.mrb[74].mxu1 %vm2092_vm3, %v6338_v48  ;;  %v8816_v48 = vld [vmem:[%s12328_s5 + $0x88] sm:$0xff] }
0x180e   :  { %9970 = vmatprep.mubr.msk.f32.mxu1 %vm10645_vm1, %v10646_v20  ;;  %10446 = vmatpush3.bf16.msra.mxu1 %v10445_v2  ;;  %v8810_v2 = vld [vmem:[%s12327_s4 + $0xf8] sm:$0xff] }
0x180f   :  { %10447 = vmatprep.subr.bf16.mxu1 %v10644_v12  ;;  %v10478_v7 = vpack.c.bf16 %v8810_v2, %v8809_v1 }
0x1812   :  { %10449 = vmatpush3.bf16.msra.mxu1 %v10448_v11  ;;  %v8820_v11 = vld [vmem:[%s12328_s5 + $0xa8] sm:$0xff] }
0x1813   :  { %10456 = vmatprep.subr.bf16.mxu1 %v10644_v12 }
0x18e0   :  { %v6423_v49 = vpop.f32.mrb[74].mxu1 }
0x18e1   :  { %v6424_v51 = vadd.f32 %v8769_v24, %v6423_v49  ;;  %v9939_v50 = vpop.f32.mrb[75].mxu1  ;;  %v10463_v24 = vpack.c.bf16 %v8800_v46, %v8799_v45  ;;  %v10481_v49 = vpack.c.bf16 %v8816_v48, %v8815_v47 }
0x18e2   :  { %v8802_v50 = vld [vmem:[%s12327_s4 + $0xb8] sm:$0xff] }
0x18e3   :  { %v11909_v52 = vadd.f32 %v6424_v51, %v11842_v36  ;;  %v8776_v36 = vld [vmem:[%s12326_s3 + $0x88] sm:$0xff]  ;;  %v8801_v51 = vld [vmem:[%s12327_s4 + $0xb0] sm:$0xff] }
0x18e4   :  { %v10433_v63 = vpack.c.bf16 %v8776_v36, %v8775_v61  ;;  %v8823_v61 = vld [vmem:[%s12328_s5 + $0xc0] sm:$0xff]  ;;  %v8824_v36 = vld [vmem:[%s12328_s5 + $0xc8] sm:$0xff] }
0x18e5   :  { %v6430_v53 = vsel %vm57_vm0, %v11909_v52, 0.0 }
0x18e6   :  { %6431 = vadd.xlane.f32.xlu0 %v6430_v53  ;;  %10434 = vmatpush3.bf16.msra.mxu0 %v10433_v63  ;;  %v8817_v53 = vld [vmem:[%s12328_s5 + $0x90] sm:$0xff]  ;;  %v10493_v63 = vpack.c.bf16 %v8824_v36, %v8823_v61 }
0x18e7   :  { %10435 = vmatprep.subr.bf16.mxu0 %v10644_v12 }
0x18ea   :  { %10437 = vmatpush3.bf16.msra.mxu0 %v10436_v8  ;;  %v10496_v8 = vpack.c.bf16 %v8826_v5, %v8825_v4 }
0x18eb   :  { %10438 = vmatprep.subr.bf16.mxu0 %v10644_v12 }
0x1973   :  { %v6432_v54 = vpop.xlane.xlu0 %6431 }
0x1974   :  { %v6433_v55 = vmul.f32 0.03125, %v6432_v54  ;;  %v8818_v54 = vld [vmem:[%s12328_s5 + $0x98] sm:$0xff] }
0x1976   :  { %v6434_v57 = vsub.f32 %v11909_v52, %v6433_v55  ;;  %v10466_v55 = vpack.c.bf16 %v8802_v50, %v8801_v51 }
0x1978   :  { %v6435_v58 = vmul.f32 %v6434_v57, %v6434_v57 }
0x197a   :  { %v6436_v59 = vsel %vm57_vm0, %v6435_v58, 0.0  ;;  %v8807_v58 = vld [vmem:[%s12327_s4 + $0xe0] sm:$0xff] }
0x197b   :  { %6437 = vadd.xlane.f32.xlu1 %v6436_v59  ;;  %v8808_v59 = vld [vmem:[%s12327_s4 + $0xe8] sm:$0xff] }
0x197c   :  { %v10475_v62 = vpack.c.bf16 %v8808_v59, %v8807_v58 }
0x1a08   :  { %v6438_v14 = vpop.xlane.xlu1 %6437 }
0x1a09   :  { %v6439_v56 = vmul.f32 0.03125, %v6438_v14  ;;  %v10487_v14 = vpack.c.bf16 %v8820_v11, %v8819_v10 }
0x1a0b   :  { %v6440_v0 = vadd.f32 1e-05, %v6439_v56  ;;  %v8821_v56 = vld [vmem:[%s12328_s5 + $0xb0] sm:$0xff] }
0x1a0d   :  { %10594 = vrsqrt.f32 %v6440_v0  ;;  %v8822_v0 = vld [vmem:[%s12328_s5 + $0xb8] sm:$0xff] }
0x1a17   :  { %v10595_v15 = vpop.eup %10594 }
0x1a18   :  { %v6442_v3 = vmul.f32 %v10595_v15, %v6434_v57  ;;  %v10484_v57 = vpack.c.bf16 %v8818_v54, %v8817_v53  ;;  %v10490_v15 = vpack.c.bf16 %v8822_v0, %v8821_v56 }
0x1a1a   :  { %v6449_v6 = vmul.f32 %v8773_v17, %v6442_v3  ;;  %v8827_v17 = vld [vmem:[%s12328_s5 + $0xe0] sm:$0xff] }
0x1a1b   :  { %v10499_v3 = vpack.c.bf16 %v8828_v18, %v8827_v17 }
0x1a1c   :  { %v11964_v27 = vadd.f32 %v8774_v22, %v6449_v6 }
0x1a1e   :  { %9949 = vmatmul.mubr.msk.f32.vlgmr.msra.gmra.mrb[80].mxu0 %vm57_vm0, %v11964_v27  ;;  %9971 = vmatmul.mubr.msk.f32.vlgmr.msra.gmra.mrb[76].mxu1 %vm57_vm0, %v11964_v27 }
0x1a1f   :  { %10440 = vmatpush3.bf16.msra.mxu0 %v10439_v25  ;;  %10458 = vmatpush3.bf16.msra.mxu1 %v10457_v26 }
0x1a20   :  { %10441 = vmatprep.subr.bf16.mxu0 %v10644_v12  ;;  %10459 = vmatprep.subr.bf16.mxu1 %v10644_v12 }
0x1a21   :  { %9959 = vmatprep.mubr.msk.f32.mxu0 %vm10645_vm1, %v10646_v20  ;;  %9992 = vmatprep.mubr.msk.f32.mxu1 %vm10645_vm1, %v10646_v20 }
0x1a23   :  { %10443 = vmatpush3.bf16.msra.mxu0 %v10442_v30  ;;  %10461 = vmatpush3.bf16.msra.mxu1 %v10460_v31 }
0x1a24   :  { %10450 = vmatprep.subr.bf16.mxu0 %v10644_v12  ;;  %10468 = vmatprep.subr.bf16.mxu1 %v10644_v12 }
0x1a26   :  { %9960 = vmatmul.mubr.msk.f32.vlgmr.msra.gmra.mrb[82].mxu0 %vm57_vm0, %v11964_v27  ;;  %9993 = vmatmul.mubr.msk.f32.vlgmr.msra.gmra.mrb[78].mxu1 %vm57_vm0, %v11964_v27 }
0x1a27   :  { %10452 = vmatpush3.bf16.msra.mxu0 %v10451_v37  ;;  %10470 = vmatpush3.bf16.msra.mxu1 %v10469_v38 }
0x1a28   :  { %10453 = vmatprep.subr.bf16.mxu0 %v10644_v12  ;;  %10471 = vmatprep.subr.bf16.mxu1 %v10644_v12 }
0x1a29   :  { %9981 = vmatprep.mubr.msk.f32.mxu0 %vm10645_vm1, %v10646_v20  ;;  %10014 = vmatprep.mubr.msk.f32.mxu1 %vm10645_vm1, %v10646_v20 }
0x1a2b   :  { %10455 = vmatpush3.bf16.msra.mxu0 %v10454_v43  ;;  %10473 = vmatpush3.bf16.msra.mxu1 %v10472_v44 }
0x1a2c   :  { %10462 = vmatprep.subr.bf16.mxu0 %v10644_v12  ;;  %10480 = vmatprep.subr.bf16.mxu1 %v10644_v12 }
0x1a2e   :  { %9982 = vmatmul.mubr.msk.f32.vlgmr.msra.gmra.mrb[84].mxu0 %vm57_vm0, %v11964_v27  ;;  %10015 = vmatmul.mubr.msk.f32.vlgmr.msra.gmra.mrb[80].mxu1 %vm57_vm0, %v11964_v27 }
0x1a2f   :  { %10464 = vmatpush3.bf16.msra.mxu0 %v10463_v24  ;;  %10482 = vmatpush3.bf16.msra.mxu1 %v10481_v49 }
0x1a30   :  { %10465 = vmatprep.subr.bf16.mxu0 %v10644_v12  ;;  %10483 = vmatprep.subr.bf16.mxu1 %v10644_v12 }
0x1a31   :  { %10003 = vmatprep.mubr.msk.f32.mxu0 %vm10645_vm1, %v10646_v20  ;;  %10036 = vmatprep.mubr.msk.f32.mxu1 %vm10645_vm1, %v10646_v20 }
0x1a33   :  { %10467 = vmatpush3.bf16.msra.mxu0 %v10466_v55  ;;  %10485 = vmatpush3.bf16.msra.mxu1 %v10484_v57 }
0x1a34   :  { %10474 = vmatprep.subr.bf16.mxu0 %v10644_v12  ;;  %10492 = vmatprep.subr.bf16.mxu1 %v10644_v12 }
0x1a36   :  { %10004 = vmatmul.mubr.msk.f32.vlgmr.msra.gmra.mrb[86].mxu0 %vm57_vm0, %v11964_v27  ;;  %10037 = vmatmul.mubr.msk.f32.vlgmr.msra.gmra.mrb[82].mxu1 %vm57_vm0, %v11964_v27 }
0x1a37   :  { %10476 = vmatpush3.bf16.msra.mxu0 %v10475_v62  ;;  %10494 = vmatpush3.bf16.msra.mxu1 %v10493_v63 }
0x1a38   :  { %10477 = vmatprep.subr.bf16.mxu0 %v10644_v12  ;;  %10495 = vmatprep.subr.bf16.mxu1 %v10644_v12 }
0x1a39   :  { %10025 = vmatprep.mubr.msk.f32.mxu0 %vm10645_vm1, %v10646_v20  ;;  %10058 = vmatprep.mubr.msk.f32.mxu1 %vm10645_vm1, %v10646_v20 }
0x1a3b   :  { %10479 = vmatpush3.bf16.msra.mxu0 %v10478_v7  ;;  %10497 = vmatpush3.bf16.msra.mxu1 %v10496_v8 }
0x1a3c   :  { %10486 = vmatprep.subr.bf16.mxu0 %v10644_v12  ;;  %10072 = vmatprep.subr.mxu1 %v10646_v20 }
0x1a3e   :  { %10026 = vmatmul.mubr.msk.f32.vlgmr.msra.gmra.mrb[88].mxu0 %vm57_vm0, %v11964_v27  ;;  %10059 = vmatmul.mubr.msk.f32.vlgmr.msra.gmra.mrb[84].mxu1 %vm57_vm0, %v11964_v27 }
0x1a3f   :  { %10488 = vmatpush3.bf16.msra.mxu0 %v10487_v14  ;;  %10047 = vmatprep.mubr.msk.f32.mxu0 %vm10645_vm1, %v10646_v20 }
0x1a40   :  { %10489 = vmatprep.subr.bf16.mxu0 %v10644_v12  ;;  %10074 = vmatprep.mubr.msk.f32.mxu1 %vm10645_vm1, %v10646_v20 }
0x1a43   :  { %10491 = vmatpush3.bf16.msra.mxu0 %v10490_v15 }
0x1a44   :  { %10498 = vmatprep.subr.bf16.mxu0 %v10644_v12 }
0x1a46   :  { %10048 = vmatmul.mubr.msk.f32.vlgmr.msra.gmra.mrb[90].mxu0 %vm57_vm0, %v11964_v27 }
0x1a47   :  { %10500 = vmatpush3.bf16.msra.mxu0 %v10499_v3  ;;  %10069 = vmatprep.mubr.msk.f32.mxu0 %vm10645_vm1, %v10646_v20 }
0x1a48   :  { %10501 = vmatprep.subr.bf16.mxu0 %v10644_v12 }
0x1a4b   :  { %10503 = vmatpush3.bf16.msra.mxu0 %v10502_v9 }
0x1a4c   :  { %10082 = vmatprep.subr.mxu0 %v10646_v20 }
0x1a4e   :  { %10070 = vmatmul.mubr.msk.f32.vlgmr.msra.gmra.mrb[92].mxu0 %vm57_vm0, %v11964_v27 }
0x1a4f   :  { %10084 = vmatprep.mubr.msk.f32.mxu0 %vm10645_vm1, %v10646_v20 }
0x1af1   :  { %v6542_v22 = vpop.f32.mrb[80].mxu0  ;;  %v6682_v6 = vpop.f32.mrb[76].mxu1 }
0x1af2   :  { %v9950_v25 = vpop.f32.mrb[81].mxu0  ;;  %v9972_v26 = vpop.f32.mrb[77].mxu1 }
0x1af9   :  { %v6612_v21 = vpop.f32.mrb[82].mxu0  ;;  %v6838_v28 = vpop.f32.mrb[78].mxu1 }
0x1afa   :  { %v9961_v29 = vpop.f32.mrb[83].mxu0  ;;  %v9994_v16 = vpop.f32.mrb[79].mxu1  ;;  %10073 = vmatpush3.xpose.msk.msra.mxu1 %vm977_vm2, %v6838_v28 }
0x1afb   :  { %10077 = vmatprep.subr.mxu1 %v10646_v20 }
0x1afd   :  { %10075 = vmatmul.mubr.msk.f32.vlgmr.msra.gmra.mrb[86].mxu1 %vm977_vm2, %v6542_v22 }
0x1afe   :  { %10079 = vmatprep.mubr.msk.f32.mxu1 %vm10645_vm1, %v10646_v20 }
0x1b01   :  { %v6752_v27 = vpop.f32.mrb[84].mxu0  ;;  %v6978_v30 = vpop.f32.mrb[80].mxu1 }
0x1b02   :  { %v9983_v31 = vpop.f32.mrb[85].mxu0  ;;  %v10016_v32 = vpop.f32.mrb[81].mxu1  ;;  %10083 = vmatpush3.xpose.msk.msra.mxu0 %vm977_vm2, %v6978_v30 }
0x1b03   :  { %10092 = vmatprep.subr.mxu0 %v10646_v20 }
0x1b05   :  { %10085 = vmatmul.mubr.msk.f32.vlgmr.msra.gmra.mrb[94].mxu0 %vm977_vm2, %v6682_v6 }
0x1b06   :  { %10094 = vmatprep.mubr.msk.f32.mxu0 %vm10645_vm1, %v10646_v20 }
0x1b09   :  { %v6908_v33 = vpop.f32.mrb[86].mxu0  ;;  %v7134_v34 = vpop.f32.mrb[82].mxu1 }
0x1b0a   :  { %v10005_v35 = vpop.f32.mrb[87].mxu0  ;;  %v10038_v37 = vpop.f32.mrb[83].mxu1  ;;  %10078 = vmatpush3.xpose.msk.msra.mxu1 %vm977_vm2, %v6908_v33  ;;  %10093 = vmatpush3.msra.mxu0 %v7134_v34  ;;  %v8847_v34 = vld [vmem:[%s12329_s6 + $0x20] sm:$0xff] }
0x1b0b   :  { %10087 = vmatprep.subr.mxu1 %v10646_v20  ;;  %10102 = vmatprep.subr.mxu0 %v10646_v20  ;;  %v8848_v35 = vld [vmem:[%s12329_s6 + $0x28] sm:$0xff]  ;;  %v8849_v37 = vld [vmem:[%s12329_s6 + $0x30] sm:$0xff] }
0x1b0d   :  { %10080 = vmatmul.mubr.msk.f32.vlgmr.msra.gmra.mrb[88].mxu1 %vm977_vm2, %v6612_v21 }
0x1b0e   :  { %10089 = vmatprep.mubr.msk.f32.mxu1 %vm10645_vm1, %v10646_v20 }
0x1b11   :  { %v7048_v38 = vpop.f32.mrb[88].mxu0  ;;  %v12155_v39 = vpop.f32.mrb[84].mxu1 }
0x1b12   :  { %v10027_v40 = vpop.f32.mrb[89].mxu0  ;;  %v10060_v41 = vpop.f32.mrb[85].mxu1  ;;  %10088 = vmatpush3.xpose.msk.msra.mxu1 %vm977_vm2, %v7048_v38 }
0x1b13   :  { %10097 = vmatprep.subr.mxu1 %v10646_v20 }
0x1b15   :  { %10090 = vmatmul.mubr.msk.f32.vlgmr.msra.gmra.mrb[90].mxu1 %vm977_vm2, %v6752_v27 }
0x1b16   :  { %10099 = vmatprep.mubr.msk.f32.mxu1 %vm10645_vm1, %v10646_v20 }
0x1b19   :  { %v7204_v42 = vpop.f32.mrb[90].mxu0 }
0x1b1a   :  { %v10049_v43 = vpop.f32.mrb[91].mxu0  ;;  %10098 = vmatpush3.msra.mxu1 %v7204_v42  ;;  %v8850_v42 = vld [vmem:[%s12329_s6 + $0x38] sm:$0xff] }
0x1b1b   :  { %10107 = vmatprep.subr.mxu1 %v10646_v20 }
0x1b21   :  { %v12163_v44 = vpop.f32.mrb[92].mxu0 }
0x1b22   :  { %v10071_v45 = vpop.f32.mrb[93].mxu0 }
0x1bd0   :  { %v7420_v46 = vpop.f32.mrb[86].mxu1 }
0x1bd1   :  { %v7652_v47 = vmul.f32 0.35355338, %v7420_v46  ;;  %v10076_v48 = vpop.f32.mrb[87].mxu1 }
0x1bd3   :  { %v7656_v24 = vsel %vm977_vm2, %v7652_v47, -inf }
0x1bd4   :  { %7657 = vmax.xlane.f32.xlu0 %v7656_v24 }
0x1bd8   :  { %v7572_v49 = vpop.f32.mrb[94].mxu0 }
0x1bd9   :  { %v7654_v51 = vmul.f32 0.35355338, %v7572_v49  ;;  %v10086_v50 = vpop.f32.mrb[95].mxu0 }
0x1bdb   :  { %v7662_v53 = vsel %vm977_vm2, %v7654_v51, -inf }
0x1bdc   :  { %7663 = vmax.xlane.f32.xlu0 %v7662_v53 }
0x1be0   :  { %v7496_v54 = vpop.f32.mrb[88].mxu1 }
0x1be1   :  { %v7653_v55 = vmul.f32 0.35355338, %v7496_v54  ;;  %v10081_v57 = vpop.f32.mrb[89].mxu1 }
0x1be3   :  { %v7659_v58 = vsel %vm977_vm2, %v7653_v55, -inf }
0x1be4   :  { %7660 = vmax.xlane.f32.xlu1 %v7659_v58 }
0x1be8   :  { %v7648_v59 = vpop.f32.mrb[90].mxu1 }
0x1be9   :  { %v7655_v61 = vmul.f32 0.35355338, %v7648_v59  ;;  %v10091_v36 = vpop.f32.mrb[91].mxu1 }
0x1bea   :  { %v8856_v36 = vld [vmem:[%s12330_s7 + $0x1] ss:$0 sm:$0xff] }
0x1beb   :  { %v7665_v62 = vsel %vm977_vm2, %v7655_v61, -inf }
0x1bec   :  { %7666 = vmax.xlane.f32.xlu1 %v7665_v62 }
0x1c61   :  { %v7658_v63 = vpop.xlane.xlu0 %7657 }
0x1c62   :  { %v7668_v1 = vsub.f32 %v7652_v47, %v7658_v63 }
0x1c64   :  { %v7672_v2 = vmul.f32 1.442695, %v7668_v1 }
0x1c66   :  { %10596 = vpow2.f32 %v7672_v2 }
0x1c69   :  { %v7664_v4 = vpop.xlane.xlu0 %7663 }
0x1c6a   :  { %v7670_v5 = vsub.f32 %v7654_v51, %v7664_v4 }
0x1c6c   :  { %v7676_v7 = vmul.f32 1.442695, %v7670_v5 }
0x1c6e   :  { %10598 = vpow2.f32 %v7676_v7 }
0x1c70   :  { %v10597_v8 = vpop.eup %10596 }
0x1c71   :  { %v7661_v10 = vpop.xlane.xlu1 %7660  ;;  %v7680_v11 = vsel %vm977_vm2, %v10597_v8, 0.0 }
0x1c72   :  { %v7669_v14 = vsub.f32 %v7653_v55, %v7661_v10  ;;  %7681 = vadd.xlane.f32.xlu0 %v7680_v11 }
0x1c74   :  { %v7674_v56 = vmul.f32 1.442695, %v7669_v14 }
0x1c76   :  { %10600 = vpow2.f32 %v7674_v56 }
0x1c78   :  { %v10599_v0 = vpop.eup %10598 }
0x1c79   :  { %v7667_v15 = vpop.xlane.xlu1 %7666  ;;  %v7686_v17 = vsel %vm977_vm2, %v10599_v0, 0.0 }
0x1c7a   :  { %v7671_v18 = vsub.f32 %v7655_v61, %v7667_v15  ;;  %7687 = vadd.xlane.f32.xlu0 %v7686_v17  ;;  %v8728_v61 = vld [vmem:[%s12336_s13 + $0x1] ss:$0 sm:$0xff] }
0x1c7b   :  { %v4284_v1 = vadd.f32 %v8728_v61, %v11753_v13 }
0x1c7c   :  { %v7678_v3 = vmul.f32 1.442695, %v7671_v18 }
0x1c7d   :  { %v4287_v7 = vadd.f32 %v4284_v1, %v11443_v23  ;;  %v8861_v23 = vld [vmem:[%s12333_s10 + $0x20] sm:$0xff] }
0x1c7e   :  { %10602 = vpow2.f32 %v7678_v3  ;;  %v8862_v3 = vld [vmem:[%s12333_s10 + $0x28] sm:$0xff] }
0x1c80   :  { %v10601_v19 = vpop.eup %10600 }
0x1c81   :  { %v7683_v60 = vsel %vm977_vm2, %v10601_v19, 0.0 }
0x1c82   :  { %7684 = vadd.xlane.f32.xlu1 %v7683_v60  ;;  %v8863_v60 = vld [vmem:[%s12333_s10 + $0x30] sm:$0xff] }
0x1c88   :  { %v10603_v9 = vpop.eup %10602 }
0x1c89   :  { %v7689_v22 = vsel %vm977_vm2, %v10603_v9, 0.0 }
0x1c8a   :  { %7690 = vadd.xlane.f32.xlu1 %v7689_v22 }
0x1cff   :  { %v7682_v6 = vpop.xlane.xlu0 %7681 }
0x1d00   :  { %10604 = vrcp.f32 %v7682_v6 }
0x1d07   :  { %v7688_v25 = vpop.xlane.xlu0 %7687 }
0x1d08   :  { %10606 = vrcp.f32 %v7688_v25 }
0x1d0a   :  { %v10605_v26 = vpop.eup %10604 }
0x1d0b   :  { %v7696_v21 = vmul.f32 %v10605_v26, %v10597_v8  ;;  %v4290_v8 = vsel %vm57_vm0, %v4287_v7, 0.0 }
0x1d0d   :  { %10095 = vmatmul.mubr.msk.f32.vlgmr.msra.gmra.mrb[96].mxu0 %vm977_vm2, %v7696_v21 }
0x1d0e   :  { %10103 = vmatpush3.msra.mxu0 %v12155_v39  ;;  %10104 = vmatprep.mubr.msk.f32.mxu0 %vm10645_vm1, %v10646_v20 }
0x1d0f   :  { %v7685_v28 = vpop.xlane.xlu1 %7684  ;;  %10112 = vmatprep.subr.mxu0 %v10646_v20 }
0x1d10   :  { %10608 = vrcp.f32 %v7685_v28 }
0x1d12   :  { %v10607_v29 = vpop.eup %10606 }
0x1d13   :  { %v7698_v16 = vmul.f32 %v10607_v29, %v10599_v0 }
0x1d15   :  { %10105 = vmatmul.mubr.msk.f32.vlgmr.msra.gmra.mrb[98].mxu0 %vm977_vm2, %v7698_v16 }
0x1d16   :  { %10114 = vmatprep.mubr.msk.f32.mxu0 %vm10645_vm1, %v10646_v20  ;;  %10113 = vmatpush3.msra.mxu0 %v8847_v34  ;;  %v12260_v34 = vld [vmem:[%s12337_s14] ss:$0 sm:$0xff] }
0x1d17   :  { %v7691_v27 = vpop.xlane.xlu1 %7690  ;;  %10122 = vmatprep.subr.mxu0 %v10646_v20 }
0x1d18   :  { %10610 = vrcp.f32 %v7691_v27  ;;  %v8859_v27 = vld [vmem:[%s12331_s8 + $0x1] ss:$0 sm:$0xff] }
0x1d1a   :  { %v10609_v30 = vpop.eup %10608 }
0x1d1b   :  { %v7697_v31 = vmul.f32 %v10609_v30, %v10601_v19  ;;  %v10505_v19 = vpack.c.bf16 %v8862_v3, %v8861_v23 }
0x1d1d   :  { %10100 = vmatmul.mubr.msk.f32.vlgmr.msra.gmra.mrb[92].mxu1 %vm977_vm2, %v7697_v31  ;;  %v8860_v31 = vld [vmem:[%s12332_s9 + $0x1] ss:$0 sm:$0xff] }
0x1d1e   :  { %10108 = vmatpush3.msra.mxu1 %v12163_v44  ;;  %10109 = vmatprep.mubr.msk.f32.mxu1 %vm10645_vm1, %v10646_v20 }
0x1d1f   :  { %10117 = vmatprep.subr.mxu1 %v10646_v20 }
0x1d22   :  { %v10611_v32 = vpop.eup %10610 }
0x1d23   :  { %v7699_v33 = vmul.f32 %v10611_v32, %v10603_v9  ;;  %v8864_v9 = vld [vmem:[%s12333_s10 + $0x38] sm:$0xff] }
0x1d24   :  { %v10508_v22 = vpack.c.bf16 %v8864_v9, %v8863_v60 }
0x1d25   :  { %10110 = vmatmul.mubr.msk.f32.vlgmr.msra.gmra.mrb[94].mxu1 %vm977_vm2, %v7699_v33 }
0x1d26   :  { %10119 = vmatprep.mubr.msk.f32.mxu1 %vm10645_vm1, %v10646_v20  ;;  %10118 = vmatpush3.msra.mxu1 %v8848_v35 }
0x1d27   :  { %10127 = vmatprep.subr.mxu1 %v10646_v20 }
0x1de0   :  { %v7769_v38 = vpop.f32.mrb[96].mxu0 }
0x1de1   :  { %v10096_v39 = vpop.f32.mrb[97].mxu0  ;;  %10115 = vmatmul.mubr.msk.f32.vlgmr.msra.gmra.mrb[100].mxu0 %vm977_vm2, %v7769_v38  ;;  %v12265_v38 = vld [vmem:[%s12338_s15] ss:$0 sm:$0xff] }
0x1de2   :  { %10123 = vmatpush3.msra.mxu0 %v8849_v37  ;;  %10124 = vmatprep.mubr.msk.f32.mxu0 %vm10645_vm1, %v10646_v20 }
0x1de3   :  { %10504 = vmatprep.subr.bf16.mxu0 %v10644_v12 }
0x1de8   :  { %v7915_v40 = vpop.f32.mrb[98].mxu0 }
0x1de9   :  { %v10106_v41 = vpop.f32.mrb[99].mxu0  ;;  %10125 = vmatmul.mubr.msk.f32.vlgmr.msra.gmra.mrb[102].mxu0 %vm977_vm2, %v7915_v40 }
0x1dea   :  { %10140 = vmatprep.mubr.msk.f32.mxu0 %vm10645_vm1, %v10646_v20  ;;  %10506 = vmatpush3.bf16.msra.mxu0 %v10505_v19  ;;  %v8869_v41 = vld [vmem:[%s12335_s12 + $0x40] sm:$0xff] }
0x1deb   :  { %10507 = vmatprep.subr.bf16.mxu0 %v10644_v12 }
0x1dee   :  { %10509 = vmatpush3.bf16.msra.mxu0 %v10508_v22 }
0x1df0   :  { %v7842_v43 = vpop.f32.mrb[92].mxu1 }
0x1df1   :  { %v10101_v44 = vpop.f32.mrb[93].mxu1  ;;  %10120 = vmatmul.mubr.msk.f32.vlgmr.msra.gmra.mrb[96].mxu1 %vm977_vm2, %v7842_v43 }
0x1df2   :  { %10128 = vmatpush3.msra.mxu1 %v8850_v42  ;;  %10129 = vmatprep.mubr.msk.f32.mxu1 %vm10645_vm1, %v10646_v20  ;;  %v8870_v42 = vld [vmem:[%s12335_s12 + $0x48] sm:$0xff]  ;;  %v8871_v44 = vld [vmem:[%s12335_s12 + $0x50] sm:$0xff] }
0x1df3   :  { %10510 = vmatprep.subr.bf16.mxu1 %v10644_v12  ;;  %v10511_v43 = vpack.c.bf16 %v8870_v42, %v8869_v41 }
0x1df8   :  { %v7988_v45 = vpop.f32.mrb[94].mxu1 }
0x1df9   :  { %v10111_v46 = vpop.f32.mrb[95].mxu1  ;;  %10130 = vmatmul.mubr.msk.f32.vlgmr.msra.gmra.mrb[98].mxu1 %vm977_vm2, %v7988_v45  ;;  %v8872_v45 = vld [vmem:[%s12335_s12 + $0x58] sm:$0xff] }
0x1dfa   :  { %10159 = vmatprep.mubr.msk.f32.mxu1 %vm10645_vm1, %v10646_v20  ;;  %10512 = vmatpush3.bf16.msra.mxu1 %v10511_v43  ;;  %v10514_v46 = vpack.c.bf16 %v8872_v45, %v8871_v44 }
0x1dfb   :  { %10513 = vmatprep.subr.bf16.mxu1 %v10644_v12 }
0x1dfe   :  { %10515 = vmatpush3.bf16.msra.mxu1 %v10514_v46 }
0x1dff   :  { %10516 = vmatprep.subr.bf16.mxu1 %v10644_v12 }
0x1eb4   :  { %v8065_v47 = vpop.f32.mrb[100].mxu0 }
0x1eb5   :  { %v10116_v48 = vpop.f32.mrb[101].mxu0  ;;  %v8288_v50 = vsel %vm57_vm0, %v8065_v47, 0.0  ;;  %v8873_v47 = vld [vmem:[%s12335_s12 + $0x60] sm:$0xff] }
0x1eb6   :  { %v8874_v48 = vld [vmem:[%s12335_s12 + $0x68] sm:$0xff] }
0x1ebc   :  { %v8211_v24 = vpop.f32.mrb[102].mxu0 }
0x1ebd   :  { %v10126_v49 = vpop.f32.mrb[103].mxu0  ;;  %v8291_v57 = vsel %vm57_vm0, %v8211_v24, 0.0  ;;  %v10517_v24 = vpack.c.bf16 %v8874_v48, %v8873_v47 }
0x1ebe   :  { %v8875_v49 = vld [vmem:[%s12335_s12 + $0x70] sm:$0xff] }
0x1ebf   :  { %10518 = vmatpush3.bf16.msra.mxu1 %v10517_v24 }
0x1ec0   :  { %10519 = vmatprep.subr.bf16.mxu1 %v10644_v12 }
0x1ec4   :  { %v8138_v51 = vpop.f32.mrb[96].mxu1 }
0x1ec5   :  { %v8289_v53 = vsel %vm57_vm0, %v8138_v51, 0.0  ;;  %v10121_v54 = vpop.f32.mrb[97].mxu1  ;;  %v8876_v51 = vld [vmem:[%s12335_s12 + $0x78] sm:$0xff] }
0x1ec6   :  { %v8290_v55 = vadd.f32 %v8289_v53, %v8288_v50  ;;  %v10520_v50 = vpack.c.bf16 %v8876_v51, %v8875_v49  ;;  %v8866_v53 = vld [vmem:[%s12334_s11 + $0x1] ss:$0 sm:$0xff] }
0x1ec8   :  { %v8292_v58 = vadd.f32 %v8291_v57, %v8290_v55  ;;  %10521 = vmatpush3.bf16.msra.mxu1 %v10520_v50 }
0x1ecc   :  { %v8284_v59 = vpop.f32.mrb[98].mxu1 }
0x1ecd   :  { %v8293_v20 = vsel %vm57_vm0, %v8284_v59, 0.0  ;;  %v10131_v62 = vpop.f32.mrb[99].mxu1 }
0x1ece   :  { %v8294_v63 = vadd.f32 %v8293_v20, %v8292_v58 }
0x1ed0   :  { %v8302_v2 = vadd.f32 %v8856_v36, %v8294_v63 }
0x1ed2   :  { %v12229_v4 = vadd.f32 %v8302_v2, %v11909_v52 }
0x1ed4   :  { %v8306_v5 = vsel %vm57_vm0, %v12229_v4, 0.0 }
0x1ed5   :  { %8307 = vadd.xlane.f32.xlu0 %v8306_v5 }
0x1ed9   :  { %4291 = vadd.xlane.f32.xlu0 %v4290_v8 }
0x1f62   :  { %v8308_v10 = vpop.xlane.xlu0 %8307 }
0x1f63   :  { %v8309_v11 = vmul.f32 0.03125, %v8308_v10 }
0x1f65   :  { %v8310_v14 = vsub.f32 %v12229_v4, %v8309_v11 }
0x1f66   :  { %v4292_v56 = vpop.xlane.xlu0 %4291 }
0x1f67   :  { %v4293_v0 = vmul.f32 0.03125, %v4292_v56  ;;  %v8311_v13 = vmul.f32 %v8310_v14, %v8310_v14 }
0x1f69   :  { %v4294_v15 = vsub.f32 %v4287_v7, %v4293_v0  ;;  %v8312_v52 = vsel %vm57_vm0, %v8311_v13, 0.0 }
0x1f6a   :  { %8313 = vadd.xlane.f32.xlu1 %v8312_v52 }
0x1f6b   :  { %v4295_v17 = vmul.f32 %v4294_v15, %v4294_v15 }
0x1f6d   :  { %v4296_v18 = vsel %vm57_vm0, %v4295_v17, 0.0 }
0x1f6e   :  { %4297 = vadd.xlane.f32.xlu0 %v4296_v18 }
0x1ff7   :  { %v8314_v6 = vpop.xlane.xlu1 %8313 }
0x1ff8   :  { %v8315_v25 = vmul.f32 0.03125, %v8314_v6  ;;  %v8878_v6 = vld [vmem:[%s12336_s13 + $0x1] ss:$0 sm:$0xff]  ;;  %s10647_s13 = smov [#allocation2]  }
0x1ff9   :  { %s8572_s27 = sshll.u32 %s10647_s13, 4  ;;  %s8573_s27 = int_to_ptr.vmem [resolvable:$true] %s8572_s27 }
0x1ffa   :  { %v8316_v26 = vadd.f32 1e-05, %v8315_v25  ;;  %s10620_s28 = scalar_lea.vmem %s8573_s27, 256  ;;  %p10625_p1 = scmp.lt.s32.totalorder %s8573_s27, %s8573_s27 }
0x1ffb   :  { %v4298_v21 = vpop.xlane.xlu0 %4297  ;;  %p10621_p0 = scmp.ne.s32.totalorder %s8573_s27, %s10620_s28  ;;  %p10626_p2 = scmp.lt.s32.totalorder %s10620_s28, %s10620_s28 }
0x1ffc   :  { %10612 = vrsqrt.f32 %v8316_v26  ;;  %v4299_v28 = vmul.f32 0.03125, %v4298_v21 }
0x1ffd   :  { %p10627_p3 = por %p10626_p2, %p10625_p1 }
0x1ffe   :  { %v4300_v29 = vadd.f32 1e-05, %v4299_v28 }
0x1fff   :  { %p10628_p4 = pnand %p10627_p3, %p10621_p0 }
0x2000   :  { %10614 = vrsqrt.f32 %v4300_v29 }
0x2006   :  { %v10613_v16 = vpop.eup %10612 }
0x2007   :  { %v8318_v30 = vmul.f32 %v10613_v16, %v8310_v14 }
0x2009   :  { %v8325_v32 = vmul.f32 %v8859_v27, %v8318_v30 }
0x200a   :  { %v10615_v33 = vpop.eup %10614 }
0x200b   :  { %v4302_v35 = vmul.f32 %v10615_v33, %v4294_v15  ;;  %v8332_v37 = vadd.f32 %v8860_v31, %v8325_v32 }
0x200d   :  { %10141 = vmatmul.mubr.msk.f32.vlgmr.msra.gmra.mrb[104].mxu0 %vm57_vm0, %v8332_v37  ;;  %v4309_v39 = vmul.f32 %v12260_v34, %v4302_v35 }
0x200f   :  { %v4316_v40 = vadd.f32 %v12265_v38, %v4309_v39 }
0x2011   :  { %4317 = vst.msk [vmem:[#allocation2] sm:$0xff] %vm57_vm0, %v4316_v40 }
0x20e0   :  { %v8413_v54 = vpop.f32.mrb[104].mxu0 }
0x20e1   :  { %v8414_v55 = vadd.f32 %v8866_v53, %v8413_v54  ;;  %v10142_v57 = vpop.f32.mrb[105].mxu0 }
0x20e3   :  { %v8418_v58 = vmul.f32 0.70710677, %v8414_v55  ;;  %v8417_v60 = vmul.f32 0.5, %v8414_v55 }
0x20e5   :  { %v8868_v59 = vclamps-f32 %v8418_v58, 4.0 }
0x20e7   :  { %v8421_v12 = vmul.f32 %v8868_v59, %v8868_v59 }
0x20e9   :  { %v8422_v61 = vmul.f32 -2.7261424e-10, %v8421_v12  ;;  %v8435_v20 = vmul.f32 -1.45660715e-05, %v8421_v12 }
0x20eb   :  { %v8423_v36 = vadd.f32 2.7706815e-08, %v8422_v61  ;;  %v8436_v62 = vadd.f32 -0.00021337405, %v8435_v20 }
0x20ed   :  { %v8424_v63 = vmul.f32 %v8423_v36, %v8421_v12  ;;  %v8437_v1 = vmul.f32 %v8436_v62, %v8421_v12 }
0x20ef   :  { %v8425_v2 = vadd.f32 -2.101024e-06, %v8424_v63  ;;  %v8438_v5 = vadd.f32 -0.001682827, %v8437_v1 }
0x20f1   :  { %v8426_v7 = vmul.f32 %v8425_v2, %v8421_v12  ;;  %v8439_v8 = vmul.f32 %v8438_v5, %v8421_v12 }
0x20f3   :  { %v8427_v10 = vadd.f32 -5.6925062e-05, %v8426_v7  ;;  %v8440_v11 = vadd.f32 -0.0073733293, %v8439_v8 }
0x20f5   :  { %v8428_v14 = vmul.f32 %v8427_v10, %v8421_v12  ;;  %v8441_v56 = vmul.f32 %v8440_v11, %v8421_v12 }
0x20f7   :  { %v8429_v0 = vadd.f32 -0.00073499064, %v8428_v14  ;;  %v8442_v13 = vadd.f32 -0.014264739, %v8441_v56 }
0x20f9   :  { %v8430_v15 = vmul.f32 %v8429_v0, %v8421_v12  ;;  %10616 = vrcp.f32 %v8442_v13 }
0x20fb   :  { %v8431_v52 = vadd.f32 -0.0029546, %v8430_v15 }
0x20fd   :  { %v8432_v17 = vmul.f32 %v8431_v52, %v8421_v12 }
0x20ff   :  { %v8433_v18 = vadd.f32 -0.016096033, %v8432_v17 }
0x2101   :  { %v8434_v23 = vmul.f32 %v8868_v59, %v8433_v18 }
0x2103   :  { %v10617_v3 = vpop.eup %10616 }
0x2104   :  { %v8444_v19 = vmul.f32 %v10617_v3, %v8434_v23 }
0x2106   :  { %v8445_v9 = vadd.f32 1.0, %v8444_v19 }
0x2108   :  { %v8446_v22 = vmul.f32 %v8445_v9, %v8417_v60 }
0x210a   :  { %10160 = vmatmul.mubr.msk.f32.vlgmr.msra.gmra.mrb[100].mxu1 %vm2092_vm3, %v8446_v22 }
0x21dd   :  { %v8531_v25 = vpop.f32.mrb[100].mxu1 }
0x21de   :  { %v8532_v26 = vadd.f32 %v8878_v6, %v8531_v25  ;;  %v10161_v21 = vpop.f32.mrb[101].mxu1 }
0x21e0   :  { %v8535_v28 = vadd.f32 %v8532_v26, %v12229_v4 }
0x21e2   :  { %v8538_v29 = vsel %vm57_vm0, %v8535_v28, 0.0 }
0x21e3   :  { %8539 = vadd.xlane.f32.xlu1 %v8538_v29 }
0x2270   :  { %v8540_v16 = vpop.xlane.xlu1 %8539 }
0x2271   :  { %v8541_v27 = vmul.f32 0.03125, %v8540_v16 }
0x2273   :  { %v8542_v30 = vsub.f32 %v8535_v28, %v8541_v27 }
0x2275   :  { %v8543_v31 = vmul.f32 %v8542_v30, %v8542_v30 }
0x2277   :  { %v8544_v32 = vsel %vm57_vm0, %v8543_v31, 0.0 }
0x2278   :  { %8545 = vadd.xlane.f32.xlu1 %v8544_v32 }
0x2305   :  { %v8546_v33 = vpop.xlane.xlu1 %8545 }
0x2306   :  { %v8547_v35 = vmul.f32 0.03125, %v8546_v33 }
0x2308   :  { %v8548_v37 = vadd.f32 1e-05, %v8547_v35 }
0x230a   :  { %10618 = vrsqrt.f32 %v8548_v37 }
0x2314   :  { %v10619_v39 = vpop.eup %10618 }
0x2315   :  { %v8550_v40 = vmul.f32 %v10619_v39, %v8542_v30 }
0x2317   :  { %v8557_v4 = vmul.f32 %v12260_v34, %v8550_v40 }
0x2319   :  { %v8564_v41 = vadd.f32 %v12265_v38, %v8557_v4 }
0x231b   :  { %8566 = vst.msk [vmem:[#allocation2 + $0x8] sm:$0xff] %vm57_vm0, %v8564_v41 }
0x231c   :  { %10631 = shalt.err (!%p10628_p4)
}
0x231d   :  { %s10632_s1 = scalar_lea.hbm %s12339_s16, 256 }
0x231e   :  { %p10633_p5 = scmp.ne.s32.totalorder %s12339_s16, %s10632_s1  ;;  %p10636_p6 = scmp.lt.u32.totalorder %s10632_s1, %s12339_s16 }
0x2320   :  { %p10638_p7 = pnand %p10636_p6, %p10633_p5 }
0x2322   :  { %10641 = shalt.err (!%p10638_p7)
}
0x2323   :  { %s10648_s8 = smov 128   ;;  %s10649_s9 = smov 8  }
0x2324   :  { %8578 = dma.vmem_to_hbm [thread:$0]  %s8573_s27, 256, %s12339_s16, [#allocation3], %s10648_s8, %s10648_s8, %s10649_s9  }
0x2325   :  { %10642 = dma.done.wait [#allocation3], 256  }
0x2326   :  { %10643 = vsyncadd [#allocation3], 4294967040 }
0x2327   :  { %8582 = vsyncpa [#allocation3], 1 }

</bundles_post_ra>
